<compile_context>
chip_gen: v7x
topology: tpu7x:2x2x1
jax: 0.10.0
libtpu: 0.0.40
codegen_flags: <defaults>
</compile_context>

<pallas_src>
import functools

import jax
import jax.numpy as jnp
from jax.experimental import pallas as pl
from jax.experimental.pallas import tpu as pltpu


def _round_up(v, m):
    return (v + m - 1) // m * m


def _pick_vmem_limit():
    """~3/4 of physical VMEM: ~96 MiB on v5e/v6e (128 MiB), ~48 MiB on v7x (64 MiB/TC)."""
    try:
        cap = getattr(pltpu.get_tpu_info(), "vmem_capacity_bytes", None)
        if cap:
            return int(min(cap * 3 // 4, 100 * 1024 * 1024))
    except Exception:
        pass
    return 48 * 1024 * 1024


_VMEM_LIMIT = _pick_vmem_limit()


# --------------------------------------------------------------------------- #
# Tile selection: divisor tiles so padding of the big LHS patch matrix is a no-op.
# --------------------------------------------------------------------------- #
def _pick_m_tile(M, max_tile=512):
    Mp = _round_up(M, 8)
    t = _round_up(min(max_tile, Mp), 8)
    while Mp % t:
        t -= 8
    return t, Mp


def _pick_n_tile(N, max_tile=512):
    Np = _round_up(N, 128)
    t = min(max_tile, Np)
    while Np % t:
        t -= 128
    return t, Np


def _pick_k_tile(K, max_tile=1024):
    if K % 128 == 0:
        t = min(max_tile, K)
        while K % t:
            t -= 128
        return t
    return K          # unaligned K: one full-K step (legal: block dim == full dim), no pad copy


# --------------------------------------------------------------------------- #
# Pallas kernel: tiled GEMM (bf16 MXU, f32 accumulator)
#   epilogue = +bias, optional tanh, per-tile BatchNorm partial sums (sum, sumsq)
# --------------------------------------------------------------------------- #
def _gemm_kernel(x_ref, w_ref, b_ref, o_ref, sum_ref, sq_ref, acc_ref, *, act_out):
    @pl.when(pl.program_id(2) == 0)
    def _init():
        acc_ref[...] = jnp.zeros_like(acc_ref)

    acc_ref[...] += jnp.dot(x_ref[...], w_ref[...],
                            preferred_element_type=jnp.float32)

    @pl.when(pl.program_id(2) == pl.num_programs(2) - 1)
    def _finalize():
        r = acc_ref[...] + b_ref[...]
        # BatchNorm partial statistics (pre-activation) -- f32, written once per (i, j).
        sum_ref[0] = jnp.sum(r, axis=0, keepdims=True)
        sq_ref[0] = jnp.sum(r * r, axis=0, keepdims=True)
        if act_out == "tanh":
            r = jnp.tanh(r)
        o_ref[...] = r.astype(o_ref.dtype)


def pallas_gemm(x, w, bias=None, act_out=None, out_dtype=jnp.bfloat16):
    """x: [M, K] bf16, w: [K, N] bf16, bias: [N] f32 or None.
    Returns (out [M, N] out_dtype, col_sum [gM, N] f32, col_sumsq [gM, N] f32)."""
    M, K = x.shape
    N = w.shape[1]
    tm, Mp = _pick_m_tile(M)
    tn, Np = _pick_n_tile(N)
    tk = _pick_k_tile(K)
    gM = Mp // tm

    xp = x if Mp == M else jnp.pad(x, ((0, Mp - M), (0, 0)))
    wp = w if Np == N else jnp.pad(w, ((0, 0), (0, Np - N)))
    b = bias if bias is not None else jnp.zeros((N,), jnp.float32)
    bp = b.astype(jnp.float32).reshape(1, N)
    if Np != N:
        bp = jnp.pad(bp, ((0, 0), (0, Np - N)))

    out_bytes = jnp.dtype(out_dtype).itemsize
    grid = (gM, Np // tn, K // tk)
    out, psum, psq = pl.pallas_call(
        functools.partial(_gemm_kernel, act_out=act_out),
        out_shape=(jax.ShapeDtypeStruct((Mp, Np), out_dtype),
                   jax.ShapeDtypeStruct((gM, 1, Np), jnp.float32),
                   jax.ShapeDtypeStruct((gM, 1, Np), jnp.float32)),
        grid_spec=pltpu.PrefetchScalarGridSpec(
            num_scalar_prefetch=0,
            grid=grid,
            in_specs=[
                pl.BlockSpec((tm, tk), lambda i, j, k: (i, k)),
                pl.BlockSpec((tk, tn), lambda i, j, k: (k, j)),
                pl.BlockSpec((1, tn), lambda i, j, k: (0, j)),
            ],
            out_specs=[
                pl.BlockSpec((tm, tn), lambda i, j, k: (i, j)),
                pl.BlockSpec((1, 1, tn), lambda i, j, k: (i, 0, j)),
                pl.BlockSpec((1, 1, tn), lambda i, j, k: (i, 0, j)),
            ],
            scratch_shapes=[pltpu.VMEM((tm, tn), jnp.float32)],
        ),
        compiler_params=pltpu.CompilerParams(
            dimension_semantics=("parallel", "parallel", "arbitrary"),
            vmem_limit_bytes=_VMEM_LIMIT,
        ),
        cost_estimate=pl.CostEstimate(
            flops=2 * Mp * K * Np,
            transcendentals=(Mp * Np if act_out == "tanh" else 0),
            bytes_accessed=2 * Mp * K + 2 * K * Np + out_bytes * Mp * Np
                           + 4 * Np + 8 * gM * Np,
        ),
    )(xp, wp, bp)

    if Mp != M or Np != N:
        out = out[:M, :N]
    return out, psum[:, 0, :N], psq[:, 0, :N]


# --------------------------------------------------------------------------- #
# BatchNorm2d (training mode): scale/shift from the fused GEMM partial stats.
#   bn(x) == x * scale + shift ; the affine is applied lazily at the next conv.
# --------------------------------------------------------------------------- #
def bn_scale_shift_from_stats(stats, gamma, beta, eps=1e-5):
    s, q, count = stats
    mean = s / count
    var = q / count - mean * mean            # biased (training-mode) variance
    inv = jax.lax.rsqrt(jnp.maximum(var, 0.0) + eps)
    scale = gamma.astype(jnp.float32) * inv
    shift = beta.astype(jnp.float32) - mean * scale
    return scale, shift


# Lazy per-channel affine (pending BatchNorm) + activation; XLA fuses this into the
# im2col gather so it costs no extra HBM pass.
def _apply_affine_act(x, scale, shift, act):
    v = x.astype(jnp.float32) * scale.reshape(1, 1, 1, -1) + shift.reshape(1, 1, 1, -1)
    if act == "leaky_relu":
        v = jnp.where(v >= 0.0, v, 0.2 * v)
    elif act == "relu":
        v = jnp.maximum(v, 0.0)
    return v


# --------------------------------------------------------------------------- #
# Convolutions (bf16 im2col + Pallas GEMM, BN stats fused in the epilogue)
# --------------------------------------------------------------------------- #
def conv4x4_s2(x, scale, shift, act_in, w, bias=None, act_out=None,
               out_dtype=jnp.bfloat16):
    """Conv2d(k=4, s=2, p=1) of v = act_in(x*scale+shift). w: [Cout, Cin, 4, 4]."""
    N, H, W, C = x.shape
    Cout = w.shape[0]
    v = _apply_affine_act(x, scale, shift, act_in)
    vp = jnp.pad(v, ((0, 0), (1, 1), (1, 1), (0, 0)))
    Ho, Wo = H // 2, W // 2
    # TODO(synk): fold this im2col gather into the GEMM (in-kernel tap accumulation /
    # Element-offset LHS blocks) to avoid materializing the [M, 16C] bf16 patch matrix.
    cols = [vp[:, kh:kh + 2 * Ho:2, kw:kw + 2 * Wo:2, :]
            for kh in range(4) for kw in range(4)]
    patches = jnp.concatenate(cols, axis=-1).astype(jnp.bfloat16)      # [N,Ho,Wo,16C]
    pm = patches.reshape(N * Ho * Wo, 16 * C)
    w2 = jnp.transpose(w, (2, 3, 1, 0)).reshape(16 * C, Cout).astype(jnp.bfloat16)
    y, psum, psq = pallas_gemm(pm, w2, bias, act_out=act_out, out_dtype=out_dtype)
    stats = (psum.sum(axis=0), psq.sum(axis=0), N * Ho * Wo)
    return y.reshape(N, Ho, Wo, Cout), stats


def conv_transpose4x4_s2(x, scale, shift, act_in, w, bias=None, act_out=None,
                         out_dtype=jnp.bfloat16):
    """ConvTranspose2d(k=4, s=2, p=1) of v = act_in(x*scale+shift) as ONE GEMM:
    the 4 output-pixel parities are 4 column groups of a [9*Cin, 4*Cout] weight built
    from the shared 3x3-neighbourhood im2col.  w: [Cin, Cout, 4, 4] (torch layout)."""
    N, H, W, C = x.shape
    Cout = w.shape[1]
    v = _apply_affine_act(x, scale, shift, act_in)
    vp = jnp.pad(v, ((0, 0), (1, 1), (1, 1), (0, 0)))
    cols = [vp[:, dh:dh + H, dw:dw + W, :] for dh in range(3) for dw in range(3)]
    patches = jnp.concatenate(cols, axis=-1).astype(jnp.bfloat16)      # [N,H,W,9C]
    pm = patches.reshape(N * H * W, 9 * C)

    # out(2h+a, 2w+b) = sum_{u,t} v[h+u+a-1, w+t+b-1] * w[:, :, 3-a-2u, 3-b-2t]
    w9 = jnp.zeros((3, 3, C, 2, 2, Cout), jnp.float32)
    for a in (0, 1):
        for b in (0, 1):
            for u in (0, 1):
                for t in (0, 1):
                    w9 = w9.at[u + a, t + b, :, a, b, :].set(
                        w[:, :, 3 - a - 2 * u, 3 - b - 2 * t])
    w9 = w9.reshape(9 * C, 4 * Cout).astype(jnp.bfloat16)
    b4 = None if bias is None else jnp.tile(bias.astype(jnp.float32), 4)

    y, psum, psq = pallas_gemm(pm, w9, b4, act_out=act_out, out_dtype=out_dtype)
    # interleave parities: [N,H,W,a,b,Cout] -> [N,2H,2W,Cout] (bf16, single shuffle)
    y = y.reshape(N, H, W, 2, 2, Cout)
    y = jnp.transpose(y, (0, 1, 3, 2, 4, 5)).reshape(N, 2 * H, 2 * W, Cout)
    stats = (psum.reshape(psum.shape[0], 4, Cout).sum(axis=(0, 1)),
             psq.reshape(psq.shape[0], 4, Cout).sum(axis=(0, 1)),
             4 * N * H * W)
    return y, stats


# --------------------------------------------------------------------------- #
# UnetSkipConnectionBlock / UnetGenerator (parameters + forward)
# --------------------------------------------------------------------------- #
def _winit(key, shape):
    return 0.02 * jax.random.normal(key, shape, dtype=jnp.float32)


def init_block(key, outer_nc, inner_nc, input_nc=None, submodule=None,
               outermost=False, innermost=False):
    if input_nc is None:
        input_nc = outer_nc
    k0, k1, k2 = jax.random.split(key, 3)
    p = {"outermost": outermost, "innermost": innermost, "submodule": submodule}
    p["down_w"] = _winit(k0, (inner_nc, input_nc, 4, 4))          # Conv2d(.., bias=False)
    if outermost:
        p["up_w"] = _winit(k1, (inner_nc * 2, outer_nc, 4, 4))    # ConvTranspose2d(+bias)
        p["up_b"] = _winit(k2, (outer_nc,))
    elif innermost:
        p["up_w"] = _winit(k1, (inner_nc, outer_nc, 4, 4))
        p["up_gamma"] = jnp.ones((outer_nc,), jnp.float32)
        p["up_beta"] = jnp.zeros((outer_nc,), jnp.float32)
    else:
        p["down_gamma"] = jnp.ones((inner_nc,), jnp.float32)
        p["down_beta"] = jnp.zeros((inner_nc,), jnp.float32)
        p["up_w"] = _winit(k1, (inner_nc * 2, outer_nc, 4, 4))
        p["up_gamma"] = jnp.ones((outer_nc,), jnp.float32)
        p["up_beta"] = jnp.zeros((outer_nc,), jnp.float32)
    return p


def _identity_affine(c):
    return jnp.ones((c,), jnp.float32), jnp.zeros((c,), jnp.float32)


def block_forward(p, x, x_scale, x_shift):
    """x: NHWC raw data with lazy per-channel affine (value = x*x_scale + x_shift).
    Non-outermost blocks return (data, scale, shift) of the skip-concatenated output."""
    if p["outermost"]:
        h, _ = conv4x4_s2(x, x_scale, x_shift, None, p["down_w"])            # downconv
        ones, zeros = _identity_affine(h.shape[-1])
        m, ms, mh = block_forward(p["submodule"], h, ones, zeros)            # submodule
        y, _ = conv_transpose4x4_s2(m, ms, mh, "relu", p["up_w"], p["up_b"],
                                    act_out="tanh", out_dtype=jnp.float32)   # relu/up/tanh
        return y
    elif p["innermost"]:
        h, _ = conv4x4_s2(x, x_scale, x_shift, "leaky_relu", p["down_w"])    # lrelu+conv
        ones, zeros = _identity_affine(h.shape[-1])
        u, ustats = conv_transpose4x4_s2(h, ones, zeros, "relu", p["up_w"])  # relu+upconv
        us, uh = bn_scale_shift_from_stats(ustats, p["up_gamma"], p["up_beta"])
        data = jnp.concatenate([x, u], axis=-1)                              # skip
        return data, jnp.concatenate([x_scale, us]), jnp.concatenate([x_shift, uh])
    else:
        # TODO(synk): nn.Dropout path (use_dropout=True) not exercised (default False).
        h, hstats = conv4x4_s2(x, x_scale, x_shift, "leaky_relu", p["down_w"])
        hs, hh = bn_scale_shift_from_stats(hstats, p["down_gamma"], p["down_beta"])
        m, ms, mh = block_forward(p["submodule"], h, hs, hh)                 # submodule
        u, ustats = conv_transpose4x4_s2(m, ms, mh, "relu", p["up_w"])       # relu+upconv
        us, uh = bn_scale_shift_from_stats(ustats, p["up_gamma"], p["up_beta"])
        data = jnp.concatenate([x, u], axis=-1)                              # skip
        return data, jnp.concatenate([x_scale, us]), jnp.concatenate([x_shift, uh])


def init_unet_generator(key, input_nc, output_nc, num_downs, ngf=64):
    """Mirrors UnetGenerator.__init__ (built innermost -> outermost)."""
    keys = jax.random.split(key, num_downs + 2)
    ki = 0
    blk = init_block(keys[ki], ngf * 8, ngf * 8, innermost=True); ki += 1
    for _ in range(num_downs - 5):
        blk = init_block(keys[ki], ngf * 8, ngf * 8, submodule=blk); ki += 1
    blk = init_block(keys[ki], ngf * 4, ngf * 8, submodule=blk); ki += 1
    blk = init_block(keys[ki], ngf * 2, ngf * 4, submodule=blk); ki += 1
    blk = init_block(keys[ki], ngf, ngf * 2, submodule=blk); ki += 1
    blk = init_block(keys[ki], output_nc, ngf, input_nc=input_nc,
                     submodule=blk, outermost=True)
    return blk


def unet_generator_forward(params, x_nchw):
    """Public entry: NCHW in, NCHW out (like the PyTorch module)."""
    x = jnp.transpose(x_nchw.astype(jnp.float32), (0, 2, 3, 1))   # NCHW -> NHWC
    ones, zeros = _identity_affine(x.shape[-1])
    y = block_forward(params, x, ones, zeros)
    return jnp.transpose(y, (0, 3, 1, 2))                         # NHWC -> NCHW


# --------------------------------------------------------------------------- #
if __name__ == "__main__":
    # Small but valid config: num_downs=5 needs spatial >= 32 so the bottleneck is 1x1.
    batch, input_nc, output_nc, num_downs, ngf, hw = 2, 3, 3, 5, 8, 32

    key = jax.random.PRNGKey(0)
    k_params, k_input = jax.random.split(key)

    params = init_unet_generator(k_params, input_nc, output_nc, num_downs, ngf=ngf)
    x = jax.random.normal(k_input, (batch, input_nc, hw, hw), dtype=jnp.float32)

    fwd = jax.jit(functools.partial(unet_generator_forward, params))
    y = jax.block_until_ready(fwd(x))

    assert y.shape == (batch, output_nc, hw, hw), y.shape
    assert bool(jnp.all(jnp.isfinite(y)))
    print("KERNEL_OK")
</pallas_src>

<mosaic_0001>
module attributes {stable_mosaic.version = 11 : i64} {
  func.func @_gemm_kernel(%arg0: i32, %arg1: i32, %arg2: i32, %arg3: memref<512x48xbf16, #tpu.memory_space<vmem>>, %arg4: memref<48x128xbf16, #tpu.memory_space<vmem>>, %arg5: memref<1x128xf32, #tpu.memory_space<vmem>>, %arg6: memref<512x128xbf16, #tpu.memory_space<vmem>>, %arg7: memref<1x1x128xf32, #tpu.memory_space<vmem>>, %arg8: memref<1x1x128xf32, #tpu.memory_space<vmem>>, %arg9: memref<512x128xf32, #tpu.memory_space<vmem>>) attributes {dimension_semantics = [#tpu.dimension_semantics<parallel>, #tpu.dimension_semantics<parallel>, #tpu.dimension_semantics<arbitrary>], iteration_bounds = array<i64: 1, 1, 1>, scalar_prefetch = 0 : i64, scratch_operands = 1 : i64, tpu.core_type = #tpu.core_type<tc>, window_params = [{transform_indices = @transform_0, window_bounds = array<i64: 512, 48>}, {transform_indices = @transform_1, window_bounds = array<i64: 48, 128>}, {transform_indices = @transform_2, window_bounds = array<i64: 1, 128>}, {transform_indices = @transform_3, window_bounds = array<i64: 512, 128>}, {transform_indices = @transform_4, window_bounds = array<i64: 1, 1, 128>}, {transform_indices = @transform_5, window_bounds = array<i64: 1, 1, 128>}]} {
    %c0_i32 = arith.constant 0 : i32
    %0 = arith.cmpi eq, %arg2, %c0_i32 : i32
    %1 = arith.extui %0 : i1 to i32
    %c0_i32_0 = arith.constant 0 : i32
    %2 = arith.cmpi ne, %1, %c0_i32_0 : i32
    scf.if %2 {
      %cst_10 = arith.constant 0.000000e+00 : f32
      %12 = vector.broadcast %cst_10 : f32 to vector<512x128xf32>
      %c0_11 = arith.constant 0 : index
      %c0_12 = arith.constant 0 : index
      %13 = vector.load %arg9[%c0_11, %c0_12] : memref<512x128xf32, #tpu.memory_space<vmem>>, vector<512x128xf32>
      tpu.vector_store %arg9[%c0_11, %c0_12], %12 {strides = array<i32>} : memref<512x128xf32, #tpu.memory_space<vmem>>, vector<512x128xf32>,
    } else {
    }
    %c0 = arith.constant 0 : index
    %c0_1 = arith.constant 0 : index
    %3 = vector.load %arg9[%c0, %c0_1] : memref<512x128xf32, #tpu.memory_space<vmem>>, vector<512x128xf32>
    %c0_2 = arith.constant 0 : index
    %c0_3 = arith.constant 0 : index
    %4 = vector.load %arg3[%c0_2, %c0_3] : memref<512x48xbf16, #tpu.memory_space<vmem>>, vector<512x48xbf16>
    %c0_4 = arith.constant 0 : index
    %c0_5 = arith.constant 0 : index
    %5 = vector.load %arg4[%c0_4, %c0_5] : memref<48x128xbf16, #tpu.memory_space<vmem>>, vector<48x128xbf16>
    %cst = arith.constant dense<0.000000e+00> : vector<512x128xf32>
    %6 = tpu.matmul %4, %5, %cst {dimension_numbers = #tpu.dot_dimension_numbers<[1], [0], [0], [1], [0, 0, 1, 1], [], []>} : vector<512x48xbf16>, vector<48x128xbf16>, vector<512x128xf32> -> vector<512x128xf32>
    %7 = arith.addf %3, %6 : vector<512x128xf32>
    %c0_6 = arith.constant 0 : index
    %c0_7 = arith.constant 0 : index
    %8 = vector.load %arg9[%c0_6, %c0_7] : memref<512x128xf32, #tpu.memory_space<vmem>>, vector<512x128xf32>
    tpu.vector_store %arg9[%c0_6, %c0_7], %7 {strides = array<i32>} : memref<512x128xf32, #tpu.memory_space<vmem>>, vector<512x128xf32>,
    %c0_i32_8 = arith.constant 0 : i32
    %9 = arith.cmpi eq, %arg2, %c0_i32_8 : i32
    %10 = arith.extui %9 : i1 to i32
    %c0_i32_9 = arith.constant 0 : i32
    %11 = arith.cmpi ne, %10, %c0_i32_9 : i32
    scf.if %11 {
      %c0_10 = arith.constant 0 : index
      %c0_11 = arith.constant 0 : index
      %12 = vector.load %arg9[%c0_10, %c0_11] : memref<512x128xf32, #tpu.memory_space<vmem>>, vector<512x128xf32>
      %c0_12 = arith.constant 0 : index
      %c0_13 = arith.constant 0 : index
      %13 = vector.load %arg5[%c0_12, %c0_13] : memref<1x128xf32, #tpu.memory_space<vmem>>, vector<1x128xf32>
      %14 = vector.broadcast %13 : vector<1x128xf32> to vector<512x128xf32>
      %15 = arith.addf %12, %14 : vector<512x128xf32>
      %cst_14 = arith.constant dense<0.000000e+00> : vector<128xf32>
      %16 = vector.multi_reduction <add>, %15, %cst_14 [0] : vector<512x128xf32> to vector<128xf32>
      %17 = vector.shape_cast %16 : vector<128xf32> to vector<1x128xf32>
      %c0_15 = arith.constant 0 : index
      %c0_16 = arith.constant 0 : index
      %c0_17 = arith.constant 0 : index
      %18 = vector.load %arg7[%c0_15, %c0_16, %c0_17] : memref<1x1x128xf32, #tpu.memory_space<vmem>>, vector<1x1x128xf32>
      %19 = vector.shape_cast %18 : vector<1x1x128xf32> to vector<1x128xf32>
      %20 = vector.shape_cast %17 : vector<1x128xf32> to vector<1x1x128xf32>
      tpu.vector_store %arg7[%c0_15, %c0_16, %c0_17], %20 {strides = array<i32>} : memref<1x1x128xf32, #tpu.memory_space<vmem>>, vector<1x1x128xf32>,
      %21 = arith.mulf %15, %15 : vector<512x128xf32>
      %cst_18 = arith.constant dense<0.000000e+00> : vector<128xf32>
      %22 = vector.multi_reduction <add>, %21, %cst_18 [0] : vector<512x128xf32> to vector<128xf32>
      %23 = vector.shape_cast %22 : vector<128xf32> to vector<1x128xf32>
      %c0_19 = arith.constant 0 : index
      %c0_20 = arith.constant 0 : index
      %c0_21 = arith.constant 0 : index
      %24 = vector.load %arg8[%c0_19, %c0_20, %c0_21] : memref<1x1x128xf32, #tpu.memory_space<vmem>>, vector<1x1x128xf32>
      %25 = vector.shape_cast %24 : vector<1x1x128xf32> to vector<1x128xf32>
      %26 = vector.shape_cast %23 : vector<1x128xf32> to vector<1x1x128xf32>
      tpu.vector_store %arg8[%c0_19, %c0_20, %c0_21], %26 {strides = array<i32>} : memref<1x1x128xf32, #tpu.memory_space<vmem>>, vector<1x1x128xf32>,
      %27 = arith.truncf %15 : vector<512x128xf32> to vector<512x128xbf16>
      %c0_22 = arith.constant 0 : index
      %c0_23 = arith.constant 0 : index
      %28 = vector.load %arg6[%c0_22, %c0_23] : memref<512x128xbf16, #tpu.memory_space<vmem>>, vector<512x128xbf16>
      tpu.vector_store %arg6[%c0_22, %c0_23], %27 {strides = array<i32>} : memref<512x128xbf16, #tpu.memory_space<vmem>>, vector<512x128xbf16>,
    } else {
    }
    return
  }
  func.func @transform_0(%arg0: i32, %arg1: i32, %arg2: i32) -> (i32, i32) {
    %c0_i32 = arith.constant 0 : i32
    return %arg0, %arg2 : i32, i32
  }
  func.func @transform_1(%arg0: i32, %arg1: i32, %arg2: i32) -> (i32, i32) {
    %c0_i32 = arith.constant 0 : i32
    return %arg2, %arg1 : i32, i32
  }
  func.func @transform_2(%arg0: i32, %arg1: i32, %arg2: i32) -> (i32, i32) {
    %c0_i32 = arith.constant 0 : i32
    %c0_i32_0 = arith.constant 0 : i32
    return %c0_i32, %arg1 : i32, i32
  }
  func.func @transform_3(%arg0: i32, %arg1: i32, %arg2: i32) -> (i32, i32) {
    %c0_i32 = arith.constant 0 : i32
    return %arg0, %arg1 : i32, i32
  }
  func.func @transform_4(%arg0: i32, %arg1: i32, %arg2: i32) -> (i32, i32, i32) {
    %c0_i32 = arith.constant 0 : i32
    %c0_i32_0 = arith.constant 0 : i32
    return %arg0, %c0_i32, %arg1 : i32, i32, i32
  }
  func.func @transform_5(%arg0: i32, %arg1: i32, %arg2: i32) -> (i32, i32, i32) {
    %c0_i32 = arith.constant 0 : i32
    %c0_i32_0 = arith.constant 0 : i32
    return %arg0, %c0_i32, %arg1 : i32, i32, i32
  }
}

module attributes {stable_mosaic.version = 11 : i64} {
  func.func @_gemm_kernel(%arg0: i32, %arg1: i32, %arg2: i32, %arg3: memref<128x128xbf16, #tpu.memory_space<vmem>>, %arg4: memref<128x128xbf16, #tpu.memory_space<vmem>>, %arg5: memref<1x128xf32, #tpu.memory_space<vmem>>, %arg6: memref<128x128xbf16, #tpu.memory_space<vmem>>, %arg7: memref<1x1x128xf32, #tpu.memory_space<vmem>>, %arg8: memref<1x1x128xf32, #tpu.memory_space<vmem>>, %arg9: memref<128x128xf32, #tpu.memory_space<vmem>>) attributes {dimension_semantics = [#tpu.dimension_semantics<parallel>, #tpu.dimension_semantics<parallel>, #tpu.dimension_semantics<arbitrary>], iteration_bounds = array<i64: 1, 1, 1>, scalar_prefetch = 0 : i64, scratch_operands = 1 : i64, tpu.core_type = #tpu.core_type<tc>, window_params = [{transform_indices = @transform_0, window_bounds = array<i64: 128, 128>}, {transform_indices = @transform_1, window_bounds = array<i64: 128, 128>}, {transform_indices = @transform_2, window_bounds = array<i64: 1, 128>}, {transform_indices = @transform_3, window_bounds = array<i64: 128, 128>}, {transform_indices = @transform_4, window_bounds = array<i64: 1, 1, 128>}, {transform_indices = @transform_5, window_bounds = array<i64: 1, 1, 128>}]} {
    %c0_i32 = arith.constant 0 : i32
    %0 = arith.cmpi eq, %arg2, %c0_i32 : i32
    %1 = arith.extui %0 : i1 to i32
    %c0_i32_0 = arith.constant 0 : i32
    %2 = arith.cmpi ne, %1, %c0_i32_0 : i32
    scf.if %2 {
      %cst_10 = arith.constant 0.000000e+00 : f32
      %12 = vector.broadcast %cst_10 : f32 to vector<128x128xf32>
      %c0_11 = arith.constant 0 : index
      %c0_12 = arith.constant 0 : index
      %13 = vector.load %arg9[%c0_11, %c0_12] : memref<128x128xf32, #tpu.memory_space<vmem>>, vector<128x128xf32>
      tpu.vector_store %arg9[%c0_11, %c0_12], %12 {strides = array<i32>} : memref<128x128xf32, #tpu.memory_space<vmem>>, vector<128x128xf32>,
    } else {
    }
    %c0 = arith.constant 0 : index
    %c0_1 = arith.constant 0 : index
    %3 = vector.load %arg9[%c0, %c0_1] : memref<128x128xf32, #tpu.memory_space<vmem>>, vector<128x128xf32>
    %c0_2 = arith.constant 0 : index
    %c0_3 = arith.constant 0 : index
    %4 = vector.load %arg3[%c0_2, %c0_3] : memref<128x128xbf16, #tpu.memory_space<vmem>>, vector<128x128xbf16>
    %c0_4 = arith.constant 0 : index
    %c0_5 = arith.constant 0 : index
    %5 = vector.load %arg4[%c0_4, %c0_5] : memref<128x128xbf16, #tpu.memory_space<vmem>>, vector<128x128xbf16>
    %cst = arith.constant dense<0.000000e+00> : vector<128x128xf32>
    %6 = tpu.matmul %4, %5, %cst {dimension_numbers = #tpu.dot_dimension_numbers<[1], [0], [0], [1], [0, 0, 1, 1], [], []>} : vector<128x128xbf16>, vector<128x128xbf16>, vector<128x128xf32> -> vector<128x128xf32>
    %7 = arith.addf %3, %6 : vector<128x128xf32>
    %c0_6 = arith.constant 0 : index
    %c0_7 = arith.constant 0 : index
    %8 = vector.load %arg9[%c0_6, %c0_7] : memref<128x128xf32, #tpu.memory_space<vmem>>, vector<128x128xf32>
    tpu.vector_store %arg9[%c0_6, %c0_7], %7 {strides = array<i32>} : memref<128x128xf32, #tpu.memory_space<vmem>>, vector<128x128xf32>,
    %c0_i32_8 = arith.constant 0 : i32
    %9 = arith.cmpi eq, %arg2, %c0_i32_8 : i32
    %10 = arith.extui %9 : i1 to i32
    %c0_i32_9 = arith.constant 0 : i32
    %11 = arith.cmpi ne, %10, %c0_i32_9 : i32
    scf.if %11 {
      %c0_10 = arith.constant 0 : index
      %c0_11 = arith.constant 0 : index
      %12 = vector.load %arg9[%c0_10, %c0_11] : memref<128x128xf32, #tpu.memory_space<vmem>>, vector<128x128xf32>
      %c0_12 = arith.constant 0 : index
      %c0_13 = arith.constant 0 : index
      %13 = vector.load %arg5[%c0_12, %c0_13] : memref<1x128xf32, #tpu.memory_space<vmem>>, vector<1x128xf32>
      %14 = vector.broadcast %13 : vector<1x128xf32> to vector<128x128xf32>
      %15 = arith.addf %12, %14 : vector<128x128xf32>
      %cst_14 = arith.constant dense<0.000000e+00> : vector<128xf32>
      %16 = vector.multi_reduction <add>, %15, %cst_14 [0] : vector<128x128xf32> to vector<128xf32>
      %17 = vector.shape_cast %16 : vector<128xf32> to vector<1x128xf32>
      %c0_15 = arith.constant 0 : index
      %c0_16 = arith.constant 0 : index
      %c0_17 = arith.constant 0 : index
      %18 = vector.load %arg7[%c0_15, %c0_16, %c0_17] : memref<1x1x128xf32, #tpu.memory_space<vmem>>, vector<1x1x128xf32>
      %19 = vector.shape_cast %18 : vector<1x1x128xf32> to vector<1x128xf32>
      %20 = vector.shape_cast %17 : vector<1x128xf32> to vector<1x1x128xf32>
      tpu.vector_store %arg7[%c0_15, %c0_16, %c0_17], %20 {strides = array<i32>} : memref<1x1x128xf32, #tpu.memory_space<vmem>>, vector<1x1x128xf32>,
      %21 = arith.mulf %15, %15 : vector<128x128xf32>
      %cst_18 = arith.constant dense<0.000000e+00> : vector<128xf32>
      %22 = vector.multi_reduction <add>, %21, %cst_18 [0] : vector<128x128xf32> to vector<128xf32>
      %23 = vector.shape_cast %22 : vector<128xf32> to vector<1x128xf32>
      %c0_19 = arith.constant 0 : index
      %c0_20 = arith.constant 0 : index
      %c0_21 = arith.constant 0 : index
      %24 = vector.load %arg8[%c0_19, %c0_20, %c0_21] : memref<1x1x128xf32, #tpu.memory_space<vmem>>, vector<1x1x128xf32>
      %25 = vector.shape_cast %24 : vector<1x1x128xf32> to vector<1x128xf32>
      %26 = vector.shape_cast %23 : vector<1x128xf32> to vector<1x1x128xf32>
      tpu.vector_store %arg8[%c0_19, %c0_20, %c0_21], %26 {strides = array<i32>} : memref<1x1x128xf32, #tpu.memory_space<vmem>>, vector<1x1x128xf32>,
      %27 = arith.truncf %15 : vector<128x128xf32> to vector<128x128xbf16>
      %c0_22 = arith.constant 0 : index
      %c0_23 = arith.constant 0 : index
      %28 = vector.load %arg6[%c0_22, %c0_23] : memref<128x128xbf16, #tpu.memory_space<vmem>>, vector<128x128xbf16>
      tpu.vector_store %arg6[%c0_22, %c0_23], %27 {strides = array<i32>} : memref<128x128xbf16, #tpu.memory_space<vmem>>, vector<128x128xbf16>,
    } else {
    }
    return
  }
  func.func @transform_0(%arg0: i32, %arg1: i32, %arg2: i32) -> (i32, i32) {
    %c0_i32 = arith.constant 0 : i32
    return %arg0, %arg2 : i32, i32
  }
  func.func @transform_1(%arg0: i32, %arg1: i32, %arg2: i32) -> (i32, i32) {
    %c0_i32 = arith.constant 0 : i32
    return %arg2, %arg1 : i32, i32
  }
  func.func @transform_2(%arg0: i32, %arg1: i32, %arg2: i32) -> (i32, i32) {
    %c0_i32 = arith.constant 0 : i32
    %c0_i32_0 = arith.constant 0 : i32
    return %c0_i32, %arg1 : i32, i32
  }
  func.func @transform_3(%arg0: i32, %arg1: i32, %arg2: i32) -> (i32, i32) {
    %c0_i32 = arith.constant 0 : i32
    return %arg0, %arg1 : i32, i32
  }
  func.func @transform_4(%arg0: i32, %arg1: i32, %arg2: i32) -> (i32, i32, i32) {
    %c0_i32 = arith.constant 0 : i32
    %c0_i32_0 = arith.constant 0 : i32
    return %arg0, %c0_i32, %arg1 : i32, i32, i32
  }
  func.func @transform_5(%arg0: i32, %arg1: i32, %arg2: i32) -> (i32, i32, i32) {
    %c0_i32 = arith.constant 0 : i32
    %c0_i32_0 = arith.constant 0 : i32
    return %arg0, %c0_i32, %arg1 : i32, i32, i32
  }
}

module attributes {stable_mosaic.version = 11 : i64} {
  func.func @_gemm_kernel(%arg0: i32, %arg1: i32, %arg2: i32, %arg3: memref<32x256xbf16, #tpu.memory_space<vmem>>, %arg4: memref<256x128xbf16, #tpu.memory_space<vmem>>, %arg5: memref<1x128xf32, #tpu.memory_space<vmem>>, %arg6: memref<32x128xbf16, #tpu.memory_space<vmem>>, %arg7: memref<1x1x128xf32, #tpu.memory_space<vmem>>, %arg8: memref<1x1x128xf32, #tpu.memory_space<vmem>>, %arg9: memref<32x128xf32, #tpu.memory_space<vmem>>) attributes {dimension_semantics = [#tpu.dimension_semantics<parallel>, #tpu.dimension_semantics<parallel>, #tpu.dimension_semantics<arbitrary>], iteration_bounds = array<i64: 1, 1, 1>, scalar_prefetch = 0 : i64, scratch_operands = 1 : i64, tpu.core_type = #tpu.core_type<tc>, window_params = [{transform_indices = @transform_0, window_bounds = array<i64: 32, 256>}, {transform_indices = @transform_1, window_bounds = array<i64: 256, 128>}, {transform_indices = @transform_2, window_bounds = array<i64: 1, 128>}, {transform_indices = @transform_3, window_bounds = array<i64: 32, 128>}, {transform_indices = @transform_4, window_bounds = array<i64: 1, 1, 128>}, {transform_indices = @transform_5, window_bounds = array<i64: 1, 1, 128>}]} {
    %c0_i32 = arith.constant 0 : i32
    %0 = arith.cmpi eq, %arg2, %c0_i32 : i32
    %1 = arith.extui %0 : i1 to i32
    %c0_i32_0 = arith.constant 0 : i32
    %2 = arith.cmpi ne, %1, %c0_i32_0 : i32
    scf.if %2 {
      %cst_10 = arith.constant 0.000000e+00 : f32
      %12 = vector.broadcast %cst_10 : f32 to vector<32x128xf32>
      %c0_11 = arith.constant 0 : index
      %c0_12 = arith.constant 0 : index
      %13 = vector.load %arg9[%c0_11, %c0_12] : memref<32x128xf32, #tpu.memory_space<vmem>>, vector<32x128xf32>
      tpu.vector_store %arg9[%c0_11, %c0_12], %12 {strides = array<i32>} : memref<32x128xf32, #tpu.memory_space<vmem>>, vector<32x128xf32>,
    } else {
    }
    %c0 = arith.constant 0 : index
    %c0_1 = arith.constant 0 : index
    %3 = vector.load %arg9[%c0, %c0_1] : memref<32x128xf32, #tpu.memory_space<vmem>>, vector<32x128xf32>
    %c0_2 = arith.constant 0 : index
    %c0_3 = arith.constant 0 : index
    %4 = vector.load %arg3[%c0_2, %c0_3] : memref<32x256xbf16, #tpu.memory_space<vmem>>, vector<32x256xbf16>
    %c0_4 = arith.constant 0 : index
    %c0_5 = arith.constant 0 : index
    %5 = vector.load %arg4[%c0_4, %c0_5] : memref<256x128xbf16, #tpu.memory_space<vmem>>, vector<256x128xbf16>
    %cst = arith.constant dense<0.000000e+00> : vector<32x128xf32>
    %6 = tpu.matmul %4, %5, %cst {dimension_numbers = #tpu.dot_dimension_numbers<[1], [0], [0], [1], [0, 0, 1, 1], [], []>} : vector<32x256xbf16>, vector<256x128xbf16>, vector<32x128xf32> -> vector<32x128xf32>
    %7 = arith.addf %3, %6 : vector<32x128xf32>
    %c0_6 = arith.constant 0 : index
    %c0_7 = arith.constant 0 : index
    %8 = vector.load %arg9[%c0_6, %c0_7] : memref<32x128xf32, #tpu.memory_space<vmem>>, vector<32x128xf32>
    tpu.vector_store %arg9[%c0_6, %c0_7], %7 {strides = array<i32>} : memref<32x128xf32, #tpu.memory_space<vmem>>, vector<32x128xf32>,
    %c0_i32_8 = arith.constant 0 : i32
    %9 = arith.cmpi eq, %arg2, %c0_i32_8 : i32
    %10 = arith.extui %9 : i1 to i32
    %c0_i32_9 = arith.constant 0 : i32
    %11 = arith.cmpi ne, %10, %c0_i32_9 : i32
    scf.if %11 {
      %c0_10 = arith.constant 0 : index
      %c0_11 = arith.constant 0 : index
      %12 = vector.load %arg9[%c0_10, %c0_11] : memref<32x128xf32, #tpu.memory_space<vmem>>, vector<32x128xf32>
      %c0_12 = arith.constant 0 : index
      %c0_13 = arith.constant 0 : index
      %13 = vector.load %arg5[%c0_12, %c0_13] : memref<1x128xf32, #tpu.memory_space<vmem>>, vector<1x128xf32>
      %14 = vector.broadcast %13 : vector<1x128xf32> to vector<32x128xf32>
      %15 = arith.addf %12, %14 : vector<32x128xf32>
      %cst_14 = arith.constant dense<0.000000e+00> : vector<128xf32>
      %16 = vector.multi_reduction <add>, %15, %cst_14 [0] : vector<32x128xf32> to vector<128xf32>
      %17 = vector.shape_cast %16 : vector<128xf32> to vector<1x128xf32>
      %c0_15 = arith.constant 0 : index
      %c0_16 = arith.constant 0 : index
      %c0_17 = arith.constant 0 : index
      %18 = vector.load %arg7[%c0_15, %c0_16, %c0_17] : memref<1x1x128xf32, #tpu.memory_space<vmem>>, vector<1x1x128xf32>
      %19 = vector.shape_cast %18 : vector<1x1x128xf32> to vector<1x128xf32>
      %20 = vector.shape_cast %17 : vector<1x128xf32> to vector<1x1x128xf32>
      tpu.vector_store %arg7[%c0_15, %c0_16, %c0_17], %20 {strides = array<i32>} : memref<1x1x128xf32, #tpu.memory_space<vmem>>, vector<1x1x128xf32>,
      %21 = arith.mulf %15, %15 : vector<32x128xf32>
      %cst_18 = arith.constant dense<0.000000e+00> : vector<128xf32>
      %22 = vector.multi_reduction <add>, %21, %cst_18 [0] : vector<32x128xf32> to vector<128xf32>
      %23 = vector.shape_cast %22 : vector<128xf32> to vector<1x128xf32>
      %c0_19 = arith.constant 0 : index
      %c0_20 = arith.constant 0 : index
      %c0_21 = arith.constant 0 : index
      %24 = vector.load %arg8[%c0_19, %c0_20, %c0_21] : memref<1x1x128xf32, #tpu.memory_space<vmem>>, vector<1x1x128xf32>
      %25 = vector.shape_cast %24 : vector<1x1x128xf32> to vector<1x128xf32>
      %26 = vector.shape_cast %23 : vector<1x128xf32> to vector<1x1x128xf32>
      tpu.vector_store %arg8[%c0_19, %c0_20, %c0_21], %26 {strides = array<i32>} : memref<1x1x128xf32, #tpu.memory_space<vmem>>, vector<1x1x128xf32>,
      %27 = arith.truncf %15 : vector<32x128xf32> to vector<32x128xbf16>
      %c0_22 = arith.constant 0 : index
      %c0_23 = arith.constant 0 : index
      %28 = vector.load %arg6[%c0_22, %c0_23] : memref<32x128xbf16, #tpu.memory_space<vmem>>, vector<32x128xbf16>
      tpu.vector_store %arg6[%c0_22, %c0_23], %27 {strides = array<i32>} : memref<32x128xbf16, #tpu.memory_space<vmem>>, vector<32x128xbf16>,
    } else {
    }
    return
  }
  func.func @transform_0(%arg0: i32, %arg1: i32, %arg2: i32) -> (i32, i32) {
    %c0_i32 = arith.constant 0 : i32
    return %arg0, %arg2 : i32, i32
  }
  func.func @transform_1(%arg0: i32, %arg1: i32, %arg2: i32) -> (i32, i32) {
    %c0_i32 = arith.constant 0 : i32
    return %arg2, %arg1 : i32, i32
  }
  func.func @transform_2(%arg0: i32, %arg1: i32, %arg2: i32) -> (i32, i32) {
    %c0_i32 = arith.constant 0 : i32
    %c0_i32_0 = arith.constant 0 : i32
    return %c0_i32, %arg1 : i32, i32
  }
  func.func @transform_3(%arg0: i32, %arg1: i32, %arg2: i32) -> (i32, i32) {
    %c0_i32 = arith.constant 0 : i32
    return %arg0, %arg1 : i32, i32
  }
  func.func @transform_4(%arg0: i32, %arg1: i32, %arg2: i32) -> (i32, i32, i32) {
    %c0_i32 = arith.constant 0 : i32
    %c0_i32_0 = arith.constant 0 : i32
    return %arg0, %c0_i32, %arg1 : i32, i32, i32
  }
  func.func @transform_5(%arg0: i32, %arg1: i32, %arg2: i32) -> (i32, i32, i32) {
    %c0_i32 = arith.constant 0 : i32
    %c0_i32_0 = arith.constant 0 : i32
    return %arg0, %c0_i32, %arg1 : i32, i32, i32
  }
}

module attributes {stable_mosaic.version = 11 : i64} {
  func.func @_gemm_kernel(%arg0: i32, %arg1: i32, %arg2: i32, %arg3: memref<8x512xbf16, #tpu.memory_space<vmem>>, %arg4: memref<512x128xbf16, #tpu.memory_space<vmem>>, %arg5: memref<1x128xf32, #tpu.memory_space<vmem>>, %arg6: memref<8x128xbf16, #tpu.memory_space<vmem>>, %arg7: memref<1x1x128xf32, #tpu.memory_space<vmem>>, %arg8: memref<1x1x128xf32, #tpu.memory_space<vmem>>, %arg9: memref<8x128xf32, #tpu.memory_space<vmem>>) attributes {dimension_semantics = [#tpu.dimension_semantics<parallel>, #tpu.dimension_semantics<parallel>, #tpu.dimension_semantics<arbitrary>], iteration_bounds = array<i64: 1, 1, 1>, scalar_prefetch = 0 : i64, scratch_operands = 1 : i64, tpu.core_type = #tpu.core_type<tc>, window_params = [{transform_indices = @transform_0, window_bounds = array<i64: 8, 512>}, {transform_indices = @transform_1, window_bounds = array<i64: 512, 128>}, {transform_indices = @transform_2, window_bounds = array<i64: 1, 128>}, {transform_indices = @transform_3, window_bounds = array<i64: 8, 128>}, {transform_indices = @transform_4, window_bounds = array<i64: 1, 1, 128>}, {transform_indices = @transform_5, window_bounds = array<i64: 1, 1, 128>}]} {
    %c0_i32 = arith.constant 0 : i32
    %0 = arith.cmpi eq, %arg2, %c0_i32 : i32
    %1 = arith.extui %0 : i1 to i32
    %c0_i32_0 = arith.constant 0 : i32
    %2 = arith.cmpi ne, %1, %c0_i32_0 : i32
    scf.if %2 {
      %cst_10 = arith.constant 0.000000e+00 : f32
      %12 = vector.broadcast %cst_10 : f32 to vector<8x128xf32>
      %c0_11 = arith.constant 0 : index
      %c0_12 = arith.constant 0 : index
      %13 = vector.load %arg9[%c0_11, %c0_12] : memref<8x128xf32, #tpu.memory_space<vmem>>, vector<8x128xf32>
      tpu.vector_store %arg9[%c0_11, %c0_12], %12 {strides = array<i32>} : memref<8x128xf32, #tpu.memory_space<vmem>>, vector<8x128xf32>,
    } else {
    }
    %c0 = arith.constant 0 : index
    %c0_1 = arith.constant 0 : index
    %3 = vector.load %arg9[%c0, %c0_1] : memref<8x128xf32, #tpu.memory_space<vmem>>, vector<8x128xf32>
    %c0_2 = arith.constant 0 : index
    %c0_3 = arith.constant 0 : index
    %4 = vector.load %arg3[%c0_2, %c0_3] : memref<8x512xbf16, #tpu.memory_space<vmem>>, vector<8x512xbf16>
    %c0_4 = arith.constant 0 : index
    %c0_5 = arith.constant 0 : index
    %5 = vector.load %arg4[%c0_4, %c0_5] : memref<512x128xbf16, #tpu.memory_space<vmem>>, vector<512x128xbf16>
    %cst = arith.constant dense<0.000000e+00> : vector<8x128xf32>
    %6 = tpu.matmul %4, %5, %cst {dimension_numbers = #tpu.dot_dimension_numbers<[1], [0], [0], [1], [0, 0, 1, 1], [], []>} : vector<8x512xbf16>, vector<512x128xbf16>, vector<8x128xf32> -> vector<8x128xf32>
    %7 = arith.addf %3, %6 : vector<8x128xf32>
    %c0_6 = arith.constant 0 : index
    %c0_7 = arith.constant 0 : index
    %8 = vector.load %arg9[%c0_6, %c0_7] : memref<8x128xf32, #tpu.memory_space<vmem>>, vector<8x128xf32>
    tpu.vector_store %arg9[%c0_6, %c0_7], %7 {strides = array<i32>} : memref<8x128xf32, #tpu.memory_space<vmem>>, vector<8x128xf32>,
    %c0_i32_8 = arith.constant 0 : i32
    %9 = arith.cmpi eq, %arg2, %c0_i32_8 : i32
    %10 = arith.extui %9 : i1 to i32
    %c0_i32_9 = arith.constant 0 : i32
    %11 = arith.cmpi ne, %10, %c0_i32_9 : i32
    scf.if %11 {
      %c0_10 = arith.constant 0 : index
      %c0_11 = arith.constant 0 : index
      %12 = vector.load %arg9[%c0_10, %c0_11] : memref<8x128xf32, #tpu.memory_space<vmem>>, vector<8x128xf32>
      %c0_12 = arith.constant 0 : index
      %c0_13 = arith.constant 0 : index
      %13 = vector.load %arg5[%c0_12, %c0_13] : memref<1x128xf32, #tpu.memory_space<vmem>>, vector<1x128xf32>
      %14 = vector.broadcast %13 : vector<1x128xf32> to vector<8x128xf32>
      %15 = arith.addf %12, %14 : vector<8x128xf32>
      %cst_14 = arith.constant dense<0.000000e+00> : vector<128xf32>
      %16 = vector.multi_reduction <add>, %15, %cst_14 [0] : vector<8x128xf32> to vector<128xf32>
      %17 = vector.shape_cast %16 : vector<128xf32> to vector<1x128xf32>
      %c0_15 = arith.constant 0 : index
      %c0_16 = arith.constant 0 : index
      %c0_17 = arith.constant 0 : index
      %18 = vector.load %arg7[%c0_15, %c0_16, %c0_17] : memref<1x1x128xf32, #tpu.memory_space<vmem>>, vector<1x1x128xf32>
      %19 = vector.shape_cast %18 : vector<1x1x128xf32> to vector<1x128xf32>
      %20 = vector.shape_cast %17 : vector<1x128xf32> to vector<1x1x128xf32>
      tpu.vector_store %arg7[%c0_15, %c0_16, %c0_17], %20 {strides = array<i32>} : memref<1x1x128xf32, #tpu.memory_space<vmem>>, vector<1x1x128xf32>,
      %21 = arith.mulf %15, %15 : vector<8x128xf32>
      %cst_18 = arith.constant dense<0.000000e+00> : vector<128xf32>
      %22 = vector.multi_reduction <add>, %21, %cst_18 [0] : vector<8x128xf32> to vector<128xf32>
      %23 = vector.shape_cast %22 : vector<128xf32> to vector<1x128xf32>
      %c0_19 = arith.constant 0 : index
      %c0_20 = arith.constant 0 : index
      %c0_21 = arith.constant 0 : index
      %24 = vector.load %arg8[%c0_19, %c0_20, %c0_21] : memref<1x1x128xf32, #tpu.memory_space<vmem>>, vector<1x1x128xf32>
      %25 = vector.shape_cast %24 : vector<1x1x128xf32> to vector<1x128xf32>
      %26 = vector.shape_cast %23 : vector<1x128xf32> to vector<1x1x128xf32>
      tpu.vector_store %arg8[%c0_19, %c0_20, %c0_21], %26 {strides = array<i32>} : memref<1x1x128xf32, #tpu.memory_space<vmem>>, vector<1x1x128xf32>,
      %27 = arith.truncf %15 : vector<8x128xf32> to vector<8x128xbf16>
      %c0_22 = arith.constant 0 : index
      %c0_23 = arith.constant 0 : index
      %28 = vector.load %arg6[%c0_22, %c0_23] : memref<8x128xbf16, #tpu.memory_space<vmem>>, vector<8x128xbf16>
      tpu.vector_store %arg6[%c0_22, %c0_23], %27 {strides = array<i32>} : memref<8x128xbf16, #tpu.memory_space<vmem>>, vector<8x128xbf16>,
    } else {
    }
    return
  }
  func.func @transform_0(%arg0: i32, %arg1: i32, %arg2: i32) -> (i32, i32) {
    %c0_i32 = arith.constant 0 : i32
    return %arg0, %arg2 : i32, i32
  }
  func.func @transform_1(%arg0: i32, %arg1: i32, %arg2: i32) -> (i32, i32) {
    %c0_i32 = arith.constant 0 : i32
    return %arg2, %arg1 : i32, i32
  }
  func.func @transform_2(%arg0: i32, %arg1: i32, %arg2: i32) -> (i32, i32) {
    %c0_i32 = arith.constant 0 : i32
    %c0_i32_0 = arith.constant 0 : i32
    return %c0_i32, %arg1 : i32, i32
  }
  func.func @transform_3(%arg0: i32, %arg1: i32, %arg2: i32) -> (i32, i32) {
    %c0_i32 = arith.constant 0 : i32
    return %arg0, %arg1 : i32, i32
  }
  func.func @transform_4(%arg0: i32, %arg1: i32, %arg2: i32) -> (i32, i32, i32) {
    %c0_i32 = arith.constant 0 : i32
    %c0_i32_0 = arith.constant 0 : i32
    return %arg0, %c0_i32, %arg1 : i32, i32, i32
  }
  func.func @transform_5(%arg0: i32, %arg1: i32, %arg2: i32) -> (i32, i32, i32) {
    %c0_i32 = arith.constant 0 : i32
    %c0_i32_0 = arith.constant 0 : i32
    return %arg0, %c0_i32, %arg1 : i32, i32, i32
  }
}

module attributes {stable_mosaic.version = 11 : i64} {
  func.func @_gemm_kernel(%arg0: i32, %arg1: i32, %arg2: i32, %arg3: memref<8x1024xbf16, #tpu.memory_space<vmem>>, %arg4: memref<1024x128xbf16, #tpu.memory_space<vmem>>, %arg5: memref<1x128xf32, #tpu.memory_space<vmem>>, %arg6: memref<8x128xbf16, #tpu.memory_space<vmem>>, %arg7: memref<1x1x128xf32, #tpu.memory_space<vmem>>, %arg8: memref<1x1x128xf32, #tpu.memory_space<vmem>>, %arg9: memref<8x128xf32, #tpu.memory_space<vmem>>) attributes {dimension_semantics = [#tpu.dimension_semantics<parallel>, #tpu.dimension_semantics<parallel>, #tpu.dimension_semantics<arbitrary>], iteration_bounds = array<i64: 1, 1, 1>, scalar_prefetch = 0 : i64, scratch_operands = 1 : i64, tpu.core_type = #tpu.core_type<tc>, window_params = [{transform_indices = @transform_0, window_bounds = array<i64: 8, 1024>}, {transform_indices = @transform_1, window_bounds = array<i64: 1024, 128>}, {transform_indices = @transform_2, window_bounds = array<i64: 1, 128>}, {transform_indices = @transform_3, window_bounds = array<i64: 8, 128>}, {transform_indices = @transform_4, window_bounds = array<i64: 1, 1, 128>}, {transform_indices = @transform_5, window_bounds = array<i64: 1, 1, 128>}]} {
    %c0_i32 = arith.constant 0 : i32
    %0 = arith.cmpi eq, %arg2, %c0_i32 : i32
    %1 = arith.extui %0 : i1 to i32
    %c0_i32_0 = arith.constant 0 : i32
    %2 = arith.cmpi ne, %1, %c0_i32_0 : i32
    scf.if %2 {
      %cst_10 = arith.constant 0.000000e+00 : f32
      %12 = vector.broadcast %cst_10 : f32 to vector<8x128xf32>
      %c0_11 = arith.constant 0 : index
      %c0_12 = arith.constant 0 : index
      %13 = vector.load %arg9[%c0_11, %c0_12] : memref<8x128xf32, #tpu.memory_space<vmem>>, vector<8x128xf32>
      tpu.vector_store %arg9[%c0_11, %c0_12], %12 {strides = array<i32>} : memref<8x128xf32, #tpu.memory_space<vmem>>, vector<8x128xf32>,
    } else {
    }
    %c0 = arith.constant 0 : index
    %c0_1 = arith.constant 0 : index
    %3 = vector.load %arg9[%c0, %c0_1] : memref<8x128xf32, #tpu.memory_space<vmem>>, vector<8x128xf32>
    %c0_2 = arith.constant 0 : index
    %c0_3 = arith.constant 0 : index
    %4 = vector.load %arg3[%c0_2, %c0_3] : memref<8x1024xbf16, #tpu.memory_space<vmem>>, vector<8x1024xbf16>
    %c0_4 = arith.constant 0 : index
    %c0_5 = arith.constant 0 : index
    %5 = vector.load %arg4[%c0_4, %c0_5] : memref<1024x128xbf16, #tpu.memory_space<vmem>>, vector<1024x128xbf16>
    %cst = arith.constant dense<0.000000e+00> : vector<8x128xf32>
    %6 = tpu.matmul %4, %5, %cst {dimension_numbers = #tpu.dot_dimension_numbers<[1], [0], [0], [1], [0, 0, 1, 1], [], []>} : vector<8x1024xbf16>, vector<1024x128xbf16>, vector<8x128xf32> -> vector<8x128xf32>
    %7 = arith.addf %3, %6 : vector<8x128xf32>
    %c0_6 = arith.constant 0 : index
    %c0_7 = arith.constant 0 : index
    %8 = vector.load %arg9[%c0_6, %c0_7] : memref<8x128xf32, #tpu.memory_space<vmem>>, vector<8x128xf32>
    tpu.vector_store %arg9[%c0_6, %c0_7], %7 {strides = array<i32>} : memref<8x128xf32, #tpu.memory_space<vmem>>, vector<8x128xf32>,
    %c0_i32_8 = arith.constant 0 : i32
    %9 = arith.cmpi eq, %arg2, %c0_i32_8 : i32
    %10 = arith.extui %9 : i1 to i32
    %c0_i32_9 = arith.constant 0 : i32
    %11 = arith.cmpi ne, %10, %c0_i32_9 : i32
    scf.if %11 {
      %c0_10 = arith.constant 0 : index
      %c0_11 = arith.constant 0 : index
      %12 = vector.load %arg9[%c0_10, %c0_11] : memref<8x128xf32, #tpu.memory_space<vmem>>, vector<8x128xf32>
      %c0_12 = arith.constant 0 : index
      %c0_13 = arith.constant 0 : index
      %13 = vector.load %arg5[%c0_12, %c0_13] : memref<1x128xf32, #tpu.memory_space<vmem>>, vector<1x128xf32>
      %14 = vector.broadcast %13 : vector<1x128xf32> to vector<8x128xf32>
      %15 = arith.addf %12, %14 : vector<8x128xf32>
      %cst_14 = arith.constant dense<0.000000e+00> : vector<128xf32>
      %16 = vector.multi_reduction <add>, %15, %cst_14 [0] : vector<8x128xf32> to vector<128xf32>
      %17 = vector.shape_cast %16 : vector<128xf32> to vector<1x128xf32>
      %c0_15 = arith.constant 0 : index
      %c0_16 = arith.constant 0 : index
      %c0_17 = arith.constant 0 : index
      %18 = vector.load %arg7[%c0_15, %c0_16, %c0_17] : memref<1x1x128xf32, #tpu.memory_space<vmem>>, vector<1x1x128xf32>
      %19 = vector.shape_cast %18 : vector<1x1x128xf32> to vector<1x128xf32>
      %20 = vector.shape_cast %17 : vector<1x128xf32> to vector<1x1x128xf32>
      tpu.vector_store %arg7[%c0_15, %c0_16, %c0_17], %20 {strides = array<i32>} : memref<1x1x128xf32, #tpu.memory_space<vmem>>, vector<1x1x128xf32>,
      %21 = arith.mulf %15, %15 : vector<8x128xf32>
      %cst_18 = arith.constant dense<0.000000e+00> : vector<128xf32>
      %22 = vector.multi_reduction <add>, %21, %cst_18 [0] : vector<8x128xf32> to vector<128xf32>
      %23 = vector.shape_cast %22 : vector<128xf32> to vector<1x128xf32>
      %c0_19 = arith.constant 0 : index
      %c0_20 = arith.constant 0 : index
      %c0_21 = arith.constant 0 : index
      %24 = vector.load %arg8[%c0_19, %c0_20, %c0_21] : memref<1x1x128xf32, #tpu.memory_space<vmem>>, vector<1x1x128xf32>
      %25 = vector.shape_cast %24 : vector<1x1x128xf32> to vector<1x128xf32>
      %26 = vector.shape_cast %23 : vector<1x128xf32> to vector<1x1x128xf32>
      tpu.vector_store %arg8[%c0_19, %c0_20, %c0_21], %26 {strides = array<i32>} : memref<1x1x128xf32, #tpu.memory_space<vmem>>, vector<1x1x128xf32>,
      %27 = arith.truncf %15 : vector<8x128xf32> to vector<8x128xbf16>
      %c0_22 = arith.constant 0 : index
      %c0_23 = arith.constant 0 : index
      %28 = vector.load %arg6[%c0_22, %c0_23] : memref<8x128xbf16, #tpu.memory_space<vmem>>, vector<8x128xbf16>
      tpu.vector_store %arg6[%c0_22, %c0_23], %27 {strides = array<i32>} : memref<8x128xbf16, #tpu.memory_space<vmem>>, vector<8x128xbf16>,
    } else {
    }
    return
  }
  func.func @transform_0(%arg0: i32, %arg1: i32, %arg2: i32) -> (i32, i32) {
    %c0_i32 = arith.constant 0 : i32
    return %arg0, %arg2 : i32, i32
  }
  func.func @transform_1(%arg0: i32, %arg1: i32, %arg2: i32) -> (i32, i32) {
    %c0_i32 = arith.constant 0 : i32
    return %arg2, %arg1 : i32, i32
  }
  func.func @transform_2(%arg0: i32, %arg1: i32, %arg2: i32) -> (i32, i32) {
    %c0_i32 = arith.constant 0 : i32
    %c0_i32_0 = arith.constant 0 : i32
    return %c0_i32, %arg1 : i32, i32
  }
  func.func @transform_3(%arg0: i32, %arg1: i32, %arg2: i32) -> (i32, i32) {
    %c0_i32 = arith.constant 0 : i32
    return %arg0, %arg1 : i32, i32
  }
  func.func @transform_4(%arg0: i32, %arg1: i32, %arg2: i32) -> (i32, i32, i32) {
    %c0_i32 = arith.constant 0 : i32
    %c0_i32_0 = arith.constant 0 : i32
    return %arg0, %c0_i32, %arg1 : i32, i32, i32
  }
  func.func @transform_5(%arg0: i32, %arg1: i32, %arg2: i32) -> (i32, i32, i32) {
    %c0_i32 = arith.constant 0 : i32
    %c0_i32_0 = arith.constant 0 : i32
    return %arg0, %c0_i32, %arg1 : i32, i32, i32
  }
}

module attributes {stable_mosaic.version = 11 : i64} {
  func.func @_gemm_kernel(%arg0: i32, %arg1: i32, %arg2: i32, %arg3: memref<8x576xbf16, #tpu.memory_space<vmem>>, %arg4: memref<576x256xbf16, #tpu.memory_space<vmem>>, %arg5: memref<1x256xf32, #tpu.memory_space<vmem>>, %arg6: memref<8x256xbf16, #tpu.memory_space<vmem>>, %arg7: memref<1x1x256xf32, #tpu.memory_space<vmem>>, %arg8: memref<1x1x256xf32, #tpu.memory_space<vmem>>, %arg9: memref<8x256xf32, #tpu.memory_space<vmem>>) attributes {dimension_semantics = [#tpu.dimension_semantics<parallel>, #tpu.dimension_semantics<parallel>, #tpu.dimension_semantics<arbitrary>], iteration_bounds = array<i64: 1, 1, 1>, scalar_prefetch = 0 : i64, scratch_operands = 1 : i64, tpu.core_type = #tpu.core_type<tc>, window_params = [{transform_indices = @transform_0, window_bounds = array<i64: 8, 576>}, {transform_indices = @transform_1, window_bounds = array<i64: 576, 256>}, {transform_indices = @transform_2, window_bounds = array<i64: 1, 256>}, {transform_indices = @transform_3, window_bounds = array<i64: 8, 256>}, {transform_indices = @transform_4, window_bounds = array<i64: 1, 1, 256>}, {transform_indices = @transform_5, window_bounds = array<i64: 1, 1, 256>}]} {
    %c0_i32 = arith.constant 0 : i32
    %0 = arith.cmpi eq, %arg2, %c0_i32 : i32
    %1 = arith.extui %0 : i1 to i32
    %c0_i32_0 = arith.constant 0 : i32
    %2 = arith.cmpi ne, %1, %c0_i32_0 : i32
    scf.if %2 {
      %cst_10 = arith.constant 0.000000e+00 : f32
      %12 = vector.broadcast %cst_10 : f32 to vector<8x256xf32>
      %c0_11 = arith.constant 0 : index
      %c0_12 = arith.constant 0 : index
      %13 = vector.load %arg9[%c0_11, %c0_12] : memref<8x256xf32, #tpu.memory_space<vmem>>, vector<8x256xf32>
      tpu.vector_store %arg9[%c0_11, %c0_12], %12 {strides = array<i32>} : memref<8x256xf32, #tpu.memory_space<vmem>>, vector<8x256xf32>,
    } else {
    }
    %c0 = arith.constant 0 : index
    %c0_1 = arith.constant 0 : index
    %3 = vector.load %arg9[%c0, %c0_1] : memref<8x256xf32, #tpu.memory_space<vmem>>, vector<8x256xf32>
    %c0_2 = arith.constant 0 : index
    %c0_3 = arith.constant 0 : index
    %4 = vector.load %arg3[%c0_2, %c0_3] : memref<8x576xbf16, #tpu.memory_space<vmem>>, vector<8x576xbf16>
    %c0_4 = arith.constant 0 : index
    %c0_5 = arith.constant 0 : index
    %5 = vector.load %arg4[%c0_4, %c0_5] : memref<576x256xbf16, #tpu.memory_space<vmem>>, vector<576x256xbf16>
    %cst = arith.constant dense<0.000000e+00> : vector<8x256xf32>
    %6 = tpu.matmul %4, %5, %cst {dimension_numbers = #tpu.dot_dimension_numbers<[1], [0], [0], [1], [0, 0, 1, 1], [], []>} : vector<8x576xbf16>, vector<576x256xbf16>, vector<8x256xf32> -> vector<8x256xf32>
    %7 = arith.addf %3, %6 : vector<8x256xf32>
    %c0_6 = arith.constant 0 : index
    %c0_7 = arith.constant 0 : index
    %8 = vector.load %arg9[%c0_6, %c0_7] : memref<8x256xf32, #tpu.memory_space<vmem>>, vector<8x256xf32>
    tpu.vector_store %arg9[%c0_6, %c0_7], %7 {strides = array<i32>} : memref<8x256xf32, #tpu.memory_space<vmem>>, vector<8x256xf32>,
    %c0_i32_8 = arith.constant 0 : i32
    %9 = arith.cmpi eq, %arg2, %c0_i32_8 : i32
    %10 = arith.extui %9 : i1 to i32
    %c0_i32_9 = arith.constant 0 : i32
    %11 = arith.cmpi ne, %10, %c0_i32_9 : i32
    scf.if %11 {
      %c0_10 = arith.constant 0 : index
      %c0_11 = arith.constant 0 : index
      %12 = vector.load %arg9[%c0_10, %c0_11] : memref<8x256xf32, #tpu.memory_space<vmem>>, vector<8x256xf32>
      %c0_12 = arith.constant 0 : index
      %c0_13 = arith.constant 0 : index
      %13 = vector.load %arg5[%c0_12, %c0_13] : memref<1x256xf32, #tpu.memory_space<vmem>>, vector<1x256xf32>
      %14 = vector.broadcast %13 : vector<1x256xf32> to vector<8x256xf32>
      %15 = arith.addf %12, %14 : vector<8x256xf32>
      %cst_14 = arith.constant dense<0.000000e+00> : vector<256xf32>
      %16 = vector.multi_reduction <add>, %15, %cst_14 [0] : vector<8x256xf32> to vector<256xf32>
      %17 = vector.shape_cast %16 : vector<256xf32> to vector<1x256xf32>
      %c0_15 = arith.constant 0 : index
      %c0_16 = arith.constant 0 : index
      %c0_17 = arith.constant 0 : index
      %18 = vector.load %arg7[%c0_15, %c0_16, %c0_17] : memref<1x1x256xf32, #tpu.memory_space<vmem>>, vector<1x1x256xf32>
      %19 = vector.shape_cast %18 : vector<1x1x256xf32> to vector<1x256xf32>
      %20 = vector.shape_cast %17 : vector<1x256xf32> to vector<1x1x256xf32>
      tpu.vector_store %arg7[%c0_15, %c0_16, %c0_17], %20 {strides = array<i32>} : memref<1x1x256xf32, #tpu.memory_space<vmem>>, vector<1x1x256xf32>,
      %21 = arith.mulf %15, %15 : vector<8x256xf32>
      %cst_18 = arith.constant dense<0.000000e+00> : vector<256xf32>
      %22 = vector.multi_reduction <add>, %21, %cst_18 [0] : vector<8x256xf32> to vector<256xf32>
      %23 = vector.shape_cast %22 : vector<256xf32> to vector<1x256xf32>
      %c0_19 = arith.constant 0 : index
      %c0_20 = arith.constant 0 : index
      %c0_21 = arith.constant 0 : index
      %24 = vector.load %arg8[%c0_19, %c0_20, %c0_21] : memref<1x1x256xf32, #tpu.memory_space<vmem>>, vector<1x1x256xf32>
      %25 = vector.shape_cast %24 : vector<1x1x256xf32> to vector<1x256xf32>
      %26 = vector.shape_cast %23 : vector<1x256xf32> to vector<1x1x256xf32>
      tpu.vector_store %arg8[%c0_19, %c0_20, %c0_21], %26 {strides = array<i32>} : memref<1x1x256xf32, #tpu.memory_space<vmem>>, vector<1x1x256xf32>,
      %27 = arith.truncf %15 : vector<8x256xf32> to vector<8x256xbf16>
      %c0_22 = arith.constant 0 : index
      %c0_23 = arith.constant 0 : index
      %28 = vector.load %arg6[%c0_22, %c0_23] : memref<8x256xbf16, #tpu.memory_space<vmem>>, vector<8x256xbf16>
      tpu.vector_store %arg6[%c0_22, %c0_23], %27 {strides = array<i32>} : memref<8x256xbf16, #tpu.memory_space<vmem>>, vector<8x256xbf16>,
    } else {
    }
    return
  }
  func.func @transform_0(%arg0: i32, %arg1: i32, %arg2: i32) -> (i32, i32) {
    %c0_i32 = arith.constant 0 : i32
    return %arg0, %arg2 : i32, i32
  }
  func.func @transform_1(%arg0: i32, %arg1: i32, %arg2: i32) -> (i32, i32) {
    %c0_i32 = arith.constant 0 : i32
    return %arg2, %arg1 : i32, i32
  }
  func.func @transform_2(%arg0: i32, %arg1: i32, %arg2: i32) -> (i32, i32) {
    %c0_i32 = arith.constant 0 : i32
    %c0_i32_0 = arith.constant 0 : i32
    return %c0_i32, %arg1 : i32, i32
  }
  func.func @transform_3(%arg0: i32, %arg1: i32, %arg2: i32) -> (i32, i32) {
    %c0_i32 = arith.constant 0 : i32
    return %arg0, %arg1 : i32, i32
  }
  func.func @transform_4(%arg0: i32, %arg1: i32, %arg2: i32) -> (i32, i32, i32) {
    %c0_i32 = arith.constant 0 : i32
    %c0_i32_0 = arith.constant 0 : i32
    return %arg0, %c0_i32, %arg1 : i32, i32, i32
  }
  func.func @transform_5(%arg0: i32, %arg1: i32, %arg2: i32) -> (i32, i32, i32) {
    %c0_i32 = arith.constant 0 : i32
    %c0_i32_0 = arith.constant 0 : i32
    return %arg0, %c0_i32, %arg1 : i32, i32, i32
  }
}

module attributes {stable_mosaic.version = 11 : i64} {
  func.func @_gemm_kernel(%arg0: i32, %arg1: i32, %arg2: i32, %arg3: memref<8x384xbf16, #tpu.memory_space<vmem>>, %arg4: memref<384x128xbf16, #tpu.memory_space<vmem>>, %arg5: memref<1x128xf32, #tpu.memory_space<vmem>>, %arg6: memref<8x128xbf16, #tpu.memory_space<vmem>>, %arg7: memref<1x1x128xf32, #tpu.memory_space<vmem>>, %arg8: memref<1x1x128xf32, #tpu.memory_space<vmem>>, %arg9: memref<8x128xf32, #tpu.memory_space<vmem>>) attributes {dimension_semantics = [#tpu.dimension_semantics<parallel>, #tpu.dimension_semantics<parallel>, #tpu.dimension_semantics<arbitrary>], iteration_bounds = array<i64: 1, 1, 3>, scalar_prefetch = 0 : i64, scratch_operands = 1 : i64, tpu.core_type = #tpu.core_type<tc>, window_params = [{transform_indices = @transform_0, window_bounds = array<i64: 8, 384>}, {transform_indices = @transform_1, window_bounds = array<i64: 384, 128>}, {transform_indices = @transform_2, window_bounds = array<i64: 1, 128>}, {transform_indices = @transform_3, window_bounds = array<i64: 8, 128>}, {transform_indices = @transform_4, window_bounds = array<i64: 1, 1, 128>}, {transform_indices = @transform_5, window_bounds = array<i64: 1, 1, 128>}]} {
    %c0_i32 = arith.constant 0 : i32
    %0 = arith.cmpi eq, %arg2, %c0_i32 : i32
    %1 = arith.extui %0 : i1 to i32
    %c0_i32_0 = arith.constant 0 : i32
    %2 = arith.cmpi ne, %1, %c0_i32_0 : i32
    scf.if %2 {
      %cst_9 = arith.constant 0.000000e+00 : f32
      %12 = vector.broadcast %cst_9 : f32 to vector<8x128xf32>
      %c0_10 = arith.constant 0 : index
      %c0_11 = arith.constant 0 : index
      %13 = vector.load %arg9[%c0_10, %c0_11] : memref<8x128xf32, #tpu.memory_space<vmem>>, vector<8x128xf32>
      tpu.vector_store %arg9[%c0_10, %c0_11], %12 {strides = array<i32>} : memref<8x128xf32, #tpu.memory_space<vmem>>, vector<8x128xf32>,
    } else {
    }
    %c0 = arith.constant 0 : index
    %c0_1 = arith.constant 0 : index
    %3 = vector.load %arg9[%c0, %c0_1] : memref<8x128xf32, #tpu.memory_space<vmem>>, vector<8x128xf32>
    %c0_2 = arith.constant 0 : index
    %c0_3 = arith.constant 0 : index
    %4 = vector.load %arg3[%c0_2, %c0_3] : memref<8x384xbf16, #tpu.memory_space<vmem>>, vector<8x384xbf16>
    %c0_4 = arith.constant 0 : index
    %c0_5 = arith.constant 0 : index
    %5 = vector.load %arg4[%c0_4, %c0_5] : memref<384x128xbf16, #tpu.memory_space<vmem>>, vector<384x128xbf16>
    %cst = arith.constant dense<0.000000e+00> : vector<8x128xf32>
    %6 = tpu.matmul %4, %5, %cst {dimension_numbers = #tpu.dot_dimension_numbers<[1], [0], [0], [1], [0, 0, 1, 1], [], []>} : vector<8x384xbf16>, vector<384x128xbf16>, vector<8x128xf32> -> vector<8x128xf32>
    %7 = arith.addf %3, %6 : vector<8x128xf32>
    %c0_6 = arith.constant 0 : index
    %c0_7 = arith.constant 0 : index
    %8 = vector.load %arg9[%c0_6, %c0_7] : memref<8x128xf32, #tpu.memory_space<vmem>>, vector<8x128xf32>
    tpu.vector_store %arg9[%c0_6, %c0_7], %7 {strides = array<i32>} : memref<8x128xf32, #tpu.memory_space<vmem>>, vector<8x128xf32>,
    %c2_i32 = arith.constant 2 : i32
    %9 = arith.cmpi eq, %arg2, %c2_i32 : i32
    %10 = arith.extui %9 : i1 to i32
    %c0_i32_8 = arith.constant 0 : i32
    %11 = arith.cmpi ne, %10, %c0_i32_8 : i32
    scf.if %11 {
      %c0_9 = arith.constant 0 : index
      %c0_10 = arith.constant 0 : index
      %12 = vector.load %arg9[%c0_9, %c0_10] : memref<8x128xf32, #tpu.memory_space<vmem>>, vector<8x128xf32>
      %c0_11 = arith.constant 0 : index
      %c0_12 = arith.constant 0 : index
      %13 = vector.load %arg5[%c0_11, %c0_12] : memref<1x128xf32, #tpu.memory_space<vmem>>, vector<1x128xf32>
      %14 = vector.broadcast %13 : vector<1x128xf32> to vector<8x128xf32>
      %15 = arith.addf %12, %14 : vector<8x128xf32>
      %cst_13 = arith.constant dense<0.000000e+00> : vector<128xf32>
      %16 = vector.multi_reduction <add>, %15, %cst_13 [0] : vector<8x128xf32> to vector<128xf32>
      %17 = vector.shape_cast %16 : vector<128xf32> to vector<1x128xf32>
      %c0_14 = arith.constant 0 : index
      %c0_15 = arith.constant 0 : index
      %c0_16 = arith.constant 0 : index
      %18 = vector.load %arg7[%c0_14, %c0_15, %c0_16] : memref<1x1x128xf32, #tpu.memory_space<vmem>>, vector<1x1x128xf32>
      %19 = vector.shape_cast %18 : vector<1x1x128xf32> to vector<1x128xf32>
      %20 = vector.shape_cast %17 : vector<1x128xf32> to vector<1x1x128xf32>
      tpu.vector_store %arg7[%c0_14, %c0_15, %c0_16], %20 {strides = array<i32>} : memref<1x1x128xf32, #tpu.memory_space<vmem>>, vector<1x1x128xf32>,
      %21 = arith.mulf %15, %15 : vector<8x128xf32>
      %cst_17 = arith.constant dense<0.000000e+00> : vector<128xf32>
      %22 = vector.multi_reduction <add>, %21, %cst_17 [0] : vector<8x128xf32> to vector<128xf32>
      %23 = vector.shape_cast %22 : vector<128xf32> to vector<1x128xf32>
      %c0_18 = arith.constant 0 : index
      %c0_19 = arith.constant 0 : index
      %c0_20 = arith.constant 0 : index
      %24 = vector.load %arg8[%c0_18, %c0_19, %c0_20] : memref<1x1x128xf32, #tpu.memory_space<vmem>>, vector<1x1x128xf32>
      %25 = vector.shape_cast %24 : vector<1x1x128xf32> to vector<1x128xf32>
      %26 = vector.shape_cast %23 : vector<1x128xf32> to vector<1x1x128xf32>
      tpu.vector_store %arg8[%c0_18, %c0_19, %c0_20], %26 {strides = array<i32>} : memref<1x1x128xf32, #tpu.memory_space<vmem>>, vector<1x1x128xf32>,
      %27 = arith.truncf %15 : vector<8x128xf32> to vector<8x128xbf16>
      %c0_21 = arith.constant 0 : index
      %c0_22 = arith.constant 0 : index
      %28 = vector.load %arg6[%c0_21, %c0_22] : memref<8x128xbf16, #tpu.memory_space<vmem>>, vector<8x128xbf16>
      tpu.vector_store %arg6[%c0_21, %c0_22], %27 {strides = array<i32>} : memref<8x128xbf16, #tpu.memory_space<vmem>>, vector<8x128xbf16>,
    } else {
    }
    return
  }
  func.func @transform_0(%arg0: i32, %arg1: i32, %arg2: i32) -> (i32, i32) {
    %c0_i32 = arith.constant 0 : i32
    return %arg0, %arg2 : i32, i32
  }
  func.func @transform_1(%arg0: i32, %arg1: i32, %arg2: i32) -> (i32, i32) {
    %c0_i32 = arith.constant 0 : i32
    return %arg2, %arg1 : i32, i32
  }
  func.func @transform_2(%arg0: i32, %arg1: i32, %arg2: i32) -> (i32, i32) {
    %c0_i32 = arith.constant 0 : i32
    %c0_i32_0 = arith.constant 0 : i32
    return %c0_i32, %arg1 : i32, i32
  }
  func.func @transform_3(%arg0: i32, %arg1: i32, %arg2: i32) -> (i32, i32) {
    %c0_i32 = arith.constant 0 : i32
    return %arg0, %arg1 : i32, i32
  }
  func.func @transform_4(%arg0: i32, %arg1: i32, %arg2: i32) -> (i32, i32, i32) {
    %c0_i32 = arith.constant 0 : i32
    %c0_i32_0 = arith.constant 0 : i32
    return %arg0, %c0_i32, %arg1 : i32, i32, i32
  }
  func.func @transform_5(%arg0: i32, %arg1: i32, %arg2: i32) -> (i32, i32, i32) {
    %c0_i32 = arith.constant 0 : i32
    %c0_i32_0 = arith.constant 0 : i32
    return %arg0, %c0_i32, %arg1 : i32, i32, i32
  }
}

module attributes {stable_mosaic.version = 11 : i64} {
  func.func @_gemm_kernel(%arg0: i32, %arg1: i32, %arg2: i32, %arg3: memref<32x576xbf16, #tpu.memory_space<vmem>>, %arg4: memref<576x128xbf16, #tpu.memory_space<vmem>>, %arg5: memref<1x128xf32, #tpu.memory_space<vmem>>, %arg6: memref<32x128xbf16, #tpu.memory_space<vmem>>, %arg7: memref<1x1x128xf32, #tpu.memory_space<vmem>>, %arg8: memref<1x1x128xf32, #tpu.memory_space<vmem>>, %arg9: memref<32x128xf32, #tpu.memory_space<vmem>>) attributes {dimension_semantics = [#tpu.dimension_semantics<parallel>, #tpu.dimension_semantics<parallel>, #tpu.dimension_semantics<arbitrary>], iteration_bounds = array<i64: 1, 1, 1>, scalar_prefetch = 0 : i64, scratch_operands = 1 : i64, tpu.core_type = #tpu.core_type<tc>, window_params = [{transform_indices = @transform_0, window_bounds = array<i64: 32, 576>}, {transform_indices = @transform_1, window_bounds = array<i64: 576, 128>}, {transform_indices = @transform_2, window_bounds = array<i64: 1, 128>}, {transform_indices = @transform_3, window_bounds = array<i64: 32, 128>}, {transform_indices = @transform_4, window_bounds = array<i64: 1, 1, 128>}, {transform_indices = @transform_5, window_bounds = array<i64: 1, 1, 128>}]} {
    %c0_i32 = arith.constant 0 : i32
    %0 = arith.cmpi eq, %arg2, %c0_i32 : i32
    %1 = arith.extui %0 : i1 to i32
    %c0_i32_0 = arith.constant 0 : i32
    %2 = arith.cmpi ne, %1, %c0_i32_0 : i32
    scf.if %2 {
      %cst_10 = arith.constant 0.000000e+00 : f32
      %12 = vector.broadcast %cst_10 : f32 to vector<32x128xf32>
      %c0_11 = arith.constant 0 : index
      %c0_12 = arith.constant 0 : index
      %13 = vector.load %arg9[%c0_11, %c0_12] : memref<32x128xf32, #tpu.memory_space<vmem>>, vector<32x128xf32>
      tpu.vector_store %arg9[%c0_11, %c0_12], %12 {strides = array<i32>} : memref<32x128xf32, #tpu.memory_space<vmem>>, vector<32x128xf32>,
    } else {
    }
    %c0 = arith.constant 0 : index
    %c0_1 = arith.constant 0 : index
    %3 = vector.load %arg9[%c0, %c0_1] : memref<32x128xf32, #tpu.memory_space<vmem>>, vector<32x128xf32>
    %c0_2 = arith.constant 0 : index
    %c0_3 = arith.constant 0 : index
    %4 = vector.load %arg3[%c0_2, %c0_3] : memref<32x576xbf16, #tpu.memory_space<vmem>>, vector<32x576xbf16>
    %c0_4 = arith.constant 0 : index
    %c0_5 = arith.constant 0 : index
    %5 = vector.load %arg4[%c0_4, %c0_5] : memref<576x128xbf16, #tpu.memory_space<vmem>>, vector<576x128xbf16>
    %cst = arith.constant dense<0.000000e+00> : vector<32x128xf32>
    %6 = tpu.matmul %4, %5, %cst {dimension_numbers = #tpu.dot_dimension_numbers<[1], [0], [0], [1], [0, 0, 1, 1], [], []>} : vector<32x576xbf16>, vector<576x128xbf16>, vector<32x128xf32> -> vector<32x128xf32>
    %7 = arith.addf %3, %6 : vector<32x128xf32>
    %c0_6 = arith.constant 0 : index
    %c0_7 = arith.constant 0 : index
    %8 = vector.load %arg9[%c0_6, %c0_7] : memref<32x128xf32, #tpu.memory_space<vmem>>, vector<32x128xf32>
    tpu.vector_store %arg9[%c0_6, %c0_7], %7 {strides = array<i32>} : memref<32x128xf32, #tpu.memory_space<vmem>>, vector<32x128xf32>,
    %c0_i32_8 = arith.constant 0 : i32
    %9 = arith.cmpi eq, %arg2, %c0_i32_8 : i32
    %10 = arith.extui %9 : i1 to i32
    %c0_i32_9 = arith.constant 0 : i32
    %11 = arith.cmpi ne, %10, %c0_i32_9 : i32
    scf.if %11 {
      %c0_10 = arith.constant 0 : index
      %c0_11 = arith.constant 0 : index
      %12 = vector.load %arg9[%c0_10, %c0_11] : memref<32x128xf32, #tpu.memory_space<vmem>>, vector<32x128xf32>
      %c0_12 = arith.constant 0 : index
      %c0_13 = arith.constant 0 : index
      %13 = vector.load %arg5[%c0_12, %c0_13] : memref<1x128xf32, #tpu.memory_space<vmem>>, vector<1x128xf32>
      %14 = vector.broadcast %13 : vector<1x128xf32> to vector<32x128xf32>
      %15 = arith.addf %12, %14 : vector<32x128xf32>
      %cst_14 = arith.constant dense<0.000000e+00> : vector<128xf32>
      %16 = vector.multi_reduction <add>, %15, %cst_14 [0] : vector<32x128xf32> to vector<128xf32>
      %17 = vector.shape_cast %16 : vector<128xf32> to vector<1x128xf32>
      %c0_15 = arith.constant 0 : index
      %c0_16 = arith.constant 0 : index
      %c0_17 = arith.constant 0 : index
      %18 = vector.load %arg7[%c0_15, %c0_16, %c0_17] : memref<1x1x128xf32, #tpu.memory_space<vmem>>, vector<1x1x128xf32>
      %19 = vector.shape_cast %18 : vector<1x1x128xf32> to vector<1x128xf32>
      %20 = vector.shape_cast %17 : vector<1x128xf32> to vector<1x1x128xf32>
      tpu.vector_store %arg7[%c0_15, %c0_16, %c0_17], %20 {strides = array<i32>} : memref<1x1x128xf32, #tpu.memory_space<vmem>>, vector<1x1x128xf32>,
      %21 = arith.mulf %15, %15 : vector<32x128xf32>
      %cst_18 = arith.constant dense<0.000000e+00> : vector<128xf32>
      %22 = vector.multi_reduction <add>, %21, %cst_18 [0] : vector<32x128xf32> to vector<128xf32>
      %23 = vector.shape_cast %22 : vector<128xf32> to vector<1x128xf32>
      %c0_19 = arith.constant 0 : index
      %c0_20 = arith.constant 0 : index
      %c0_21 = arith.constant 0 : index
      %24 = vector.load %arg8[%c0_19, %c0_20, %c0_21] : memref<1x1x128xf32, #tpu.memory_space<vmem>>, vector<1x1x128xf32>
      %25 = vector.shape_cast %24 : vector<1x1x128xf32> to vector<1x128xf32>
      %26 = vector.shape_cast %23 : vector<1x128xf32> to vector<1x1x128xf32>
      tpu.vector_store %arg8[%c0_19, %c0_20, %c0_21], %26 {strides = array<i32>} : memref<1x1x128xf32, #tpu.memory_space<vmem>>, vector<1x1x128xf32>,
      %27 = arith.truncf %15 : vector<32x128xf32> to vector<32x128xbf16>
      %c0_22 = arith.constant 0 : index
      %c0_23 = arith.constant 0 : index
      %28 = vector.load %arg6[%c0_22, %c0_23] : memref<32x128xbf16, #tpu.memory_space<vmem>>, vector<32x128xbf16>
      tpu.vector_store %arg6[%c0_22, %c0_23], %27 {strides = array<i32>} : memref<32x128xbf16, #tpu.memory_space<vmem>>, vector<32x128xbf16>,
    } else {
    }
    return
  }
  func.func @transform_0(%arg0: i32, %arg1: i32, %arg2: i32) -> (i32, i32) {
    %c0_i32 = arith.constant 0 : i32
    return %arg0, %arg2 : i32, i32
  }
  func.func @transform_1(%arg0: i32, %arg1: i32, %arg2: i32) -> (i32, i32) {
    %c0_i32 = arith.constant 0 : i32
    return %arg2, %arg1 : i32, i32
  }
  func.func @transform_2(%arg0: i32, %arg1: i32, %arg2: i32) -> (i32, i32) {
    %c0_i32 = arith.constant 0 : i32
    %c0_i32_0 = arith.constant 0 : i32
    return %c0_i32, %arg1 : i32, i32
  }
  func.func @transform_3(%arg0: i32, %arg1: i32, %arg2: i32) -> (i32, i32) {
    %c0_i32 = arith.constant 0 : i32
    return %arg0, %arg1 : i32, i32
  }
  func.func @transform_4(%arg0: i32, %arg1: i32, %arg2: i32) -> (i32, i32, i32) {
    %c0_i32 = arith.constant 0 : i32
    %c0_i32_0 = arith.constant 0 : i32
    return %arg0, %c0_i32, %arg1 : i32, i32, i32
  }
  func.func @transform_5(%arg0: i32, %arg1: i32, %arg2: i32) -> (i32, i32, i32) {
    %c0_i32 = arith.constant 0 : i32
    %c0_i32_0 = arith.constant 0 : i32
    return %arg0, %c0_i32, %arg1 : i32, i32, i32
  }
}

module attributes {stable_mosaic.version = 11 : i64} {
  func.func @_gemm_kernel(%arg0: i32, %arg1: i32, %arg2: i32, %arg3: memref<128x288xbf16, #tpu.memory_space<vmem>>, %arg4: memref<288x128xbf16, #tpu.memory_space<vmem>>, %arg5: memref<1x128xf32, #tpu.memory_space<vmem>>, %arg6: memref<128x128xbf16, #tpu.memory_space<vmem>>, %arg7: memref<1x1x128xf32, #tpu.memory_space<vmem>>, %arg8: memref<1x1x128xf32, #tpu.memory_space<vmem>>, %arg9: memref<128x128xf32, #tpu.memory_space<vmem>>) attributes {dimension_semantics = [#tpu.dimension_semantics<parallel>, #tpu.dimension_semantics<parallel>, #tpu.dimension_semantics<arbitrary>], iteration_bounds = array<i64: 1, 1, 1>, scalar_prefetch = 0 : i64, scratch_operands = 1 : i64, tpu.core_type = #tpu.core_type<tc>, window_params = [{transform_indices = @transform_0, window_bounds = array<i64: 128, 288>}, {transform_indices = @transform_1, window_bounds = array<i64: 288, 128>}, {transform_indices = @transform_2, window_bounds = array<i64: 1, 128>}, {transform_indices = @transform_3, window_bounds = array<i64: 128, 128>}, {transform_indices = @transform_4, window_bounds = array<i64: 1, 1, 128>}, {transform_indices = @transform_5, window_bounds = array<i64: 1, 1, 128>}]} {
    %c0_i32 = arith.constant 0 : i32
    %0 = arith.cmpi eq, %arg2, %c0_i32 : i32
    %1 = arith.extui %0 : i1 to i32
    %c0_i32_0 = arith.constant 0 : i32
    %2 = arith.cmpi ne, %1, %c0_i32_0 : i32
    scf.if %2 {
      %cst_10 = arith.constant 0.000000e+00 : f32
      %12 = vector.broadcast %cst_10 : f32 to vector<128x128xf32>
      %c0_11 = arith.constant 0 : index
      %c0_12 = arith.constant 0 : index
      %13 = vector.load %arg9[%c0_11, %c0_12] : memref<128x128xf32, #tpu.memory_space<vmem>>, vector<128x128xf32>
      tpu.vector_store %arg9[%c0_11, %c0_12], %12 {strides = array<i32>} : memref<128x128xf32, #tpu.memory_space<vmem>>, vector<128x128xf32>,
    } else {
    }
    %c0 = arith.constant 0 : index
    %c0_1 = arith.constant 0 : index
    %3 = vector.load %arg9[%c0, %c0_1] : memref<128x128xf32, #tpu.memory_space<vmem>>, vector<128x128xf32>
    %c0_2 = arith.constant 0 : index
    %c0_3 = arith.constant 0 : index
    %4 = vector.load %arg3[%c0_2, %c0_3] : memref<128x288xbf16, #tpu.memory_space<vmem>>, vector<128x288xbf16>
    %c0_4 = arith.constant 0 : index
    %c0_5 = arith.constant 0 : index
    %5 = vector.load %arg4[%c0_4, %c0_5] : memref<288x128xbf16, #tpu.memory_space<vmem>>, vector<288x128xbf16>
    %cst = arith.constant dense<0.000000e+00> : vector<128x128xf32>
    %6 = tpu.matmul %4, %5, %cst {dimension_numbers = #tpu.dot_dimension_numbers<[1], [0], [0], [1], [0, 0, 1, 1], [], []>} : vector<128x288xbf16>, vector<288x128xbf16>, vector<128x128xf32> -> vector<128x128xf32>
    %7 = arith.addf %3, %6 : vector<128x128xf32>
    %c0_6 = arith.constant 0 : index
    %c0_7 = arith.constant 0 : index
    %8 = vector.load %arg9[%c0_6, %c0_7] : memref<128x128xf32, #tpu.memory_space<vmem>>, vector<128x128xf32>
    tpu.vector_store %arg9[%c0_6, %c0_7], %7 {strides = array<i32>} : memref<128x128xf32, #tpu.memory_space<vmem>>, vector<128x128xf32>,
    %c0_i32_8 = arith.constant 0 : i32
    %9 = arith.cmpi eq, %arg2, %c0_i32_8 : i32
    %10 = arith.extui %9 : i1 to i32
    %c0_i32_9 = arith.constant 0 : i32
    %11 = arith.cmpi ne, %10, %c0_i32_9 : i32
    scf.if %11 {
      %c0_10 = arith.constant 0 : index
      %c0_11 = arith.constant 0 : index
      %12 = vector.load %arg9[%c0_10, %c0_11] : memref<128x128xf32, #tpu.memory_space<vmem>>, vector<128x128xf32>
      %c0_12 = arith.constant 0 : index
      %c0_13 = arith.constant 0 : index
      %13 = vector.load %arg5[%c0_12, %c0_13] : memref<1x128xf32, #tpu.memory_space<vmem>>, vector<1x128xf32>
      %14 = vector.broadcast %13 : vector<1x128xf32> to vector<128x128xf32>
      %15 = arith.addf %12, %14 : vector<128x128xf32>
      %cst_14 = arith.constant dense<0.000000e+00> : vector<128xf32>
      %16 = vector.multi_reduction <add>, %15, %cst_14 [0] : vector<128x128xf32> to vector<128xf32>
      %17 = vector.shape_cast %16 : vector<128xf32> to vector<1x128xf32>
      %c0_15 = arith.constant 0 : index
      %c0_16 = arith.constant 0 : index
      %c0_17 = arith.constant 0 : index
      %18 = vector.load %arg7[%c0_15, %c0_16, %c0_17] : memref<1x1x128xf32, #tpu.memory_space<vmem>>, vector<1x1x128xf32>
      %19 = vector.shape_cast %18 : vector<1x1x128xf32> to vector<1x128xf32>
      %20 = vector.shape_cast %17 : vector<1x128xf32> to vector<1x1x128xf32>
      tpu.vector_store %arg7[%c0_15, %c0_16, %c0_17], %20 {strides = array<i32>} : memref<1x1x128xf32, #tpu.memory_space<vmem>>, vector<1x1x128xf32>,
      %21 = arith.mulf %15, %15 : vector<128x128xf32>
      %cst_18 = arith.constant dense<0.000000e+00> : vector<128xf32>
      %22 = vector.multi_reduction <add>, %21, %cst_18 [0] : vector<128x128xf32> to vector<128xf32>
      %23 = vector.shape_cast %22 : vector<128xf32> to vector<1x128xf32>
      %c0_19 = arith.constant 0 : index
      %c0_20 = arith.constant 0 : index
      %c0_21 = arith.constant 0 : index
      %24 = vector.load %arg8[%c0_19, %c0_20, %c0_21] : memref<1x1x128xf32, #tpu.memory_space<vmem>>, vector<1x1x128xf32>
      %25 = vector.shape_cast %24 : vector<1x1x128xf32> to vector<1x128xf32>
      %26 = vector.shape_cast %23 : vector<1x128xf32> to vector<1x1x128xf32>
      tpu.vector_store %arg8[%c0_19, %c0_20, %c0_21], %26 {strides = array<i32>} : memref<1x1x128xf32, #tpu.memory_space<vmem>>, vector<1x1x128xf32>,
      %27 = arith.truncf %15 : vector<128x128xf32> to vector<128x128xbf16>
      %c0_22 = arith.constant 0 : index
      %c0_23 = arith.constant 0 : index
      %28 = vector.load %arg6[%c0_22, %c0_23] : memref<128x128xbf16, #tpu.memory_space<vmem>>, vector<128x128xbf16>
      tpu.vector_store %arg6[%c0_22, %c0_23], %27 {strides = array<i32>} : memref<128x128xbf16, #tpu.memory_space<vmem>>, vector<128x128xbf16>,
    } else {
    }
    return
  }
  func.func @transform_0(%arg0: i32, %arg1: i32, %arg2: i32) -> (i32, i32) {
    %c0_i32 = arith.constant 0 : i32
    return %arg0, %arg2 : i32, i32
  }
  func.func @transform_1(%arg0: i32, %arg1: i32, %arg2: i32) -> (i32, i32) {
    %c0_i32 = arith.constant 0 : i32
    return %arg2, %arg1 : i32, i32
  }
  func.func @transform_2(%arg0: i32, %arg1: i32, %arg2: i32) -> (i32, i32) {
    %c0_i32 = arith.constant 0 : i32
    %c0_i32_0 = arith.constant 0 : i32
    return %c0_i32, %arg1 : i32, i32
  }
  func.func @transform_3(%arg0: i32, %arg1: i32, %arg2: i32) -> (i32, i32) {
    %c0_i32 = arith.constant 0 : i32
    return %arg0, %arg1 : i32, i32
  }
  func.func @transform_4(%arg0: i32, %arg1: i32, %arg2: i32) -> (i32, i32, i32) {
    %c0_i32 = arith.constant 0 : i32
    %c0_i32_0 = arith.constant 0 : i32
    return %arg0, %c0_i32, %arg1 : i32, i32, i32
  }
  func.func @transform_5(%arg0: i32, %arg1: i32, %arg2: i32) -> (i32, i32, i32) {
    %c0_i32 = arith.constant 0 : i32
    %c0_i32_0 = arith.constant 0 : i32
    return %arg0, %c0_i32, %arg1 : i32, i32, i32
  }
}

module attributes {stable_mosaic.version = 11 : i64} {
  func.func @_gemm_kernel(%arg0: i32, %arg1: i32, %arg2: i32, %arg3: memref<512x144xbf16, #tpu.memory_space<vmem>>, %arg4: memref<144x128xbf16, #tpu.memory_space<vmem>>, %arg5: memref<1x128xf32, #tpu.memory_space<vmem>>, %arg6: memref<512x128xf32, #tpu.memory_space<vmem>>, %arg7: memref<1x1x128xf32, #tpu.memory_space<vmem>>, %arg8: memref<1x1x128xf32, #tpu.memory_space<vmem>>, %arg9: memref<512x128xf32, #tpu.memory_space<vmem>>) attributes {dimension_semantics = [#tpu.dimension_semantics<parallel>, #tpu.dimension_semantics<parallel>, #tpu.dimension_semantics<arbitrary>], iteration_bounds = array<i64: 1, 1, 1>, scalar_prefetch = 0 : i64, scratch_operands = 1 : i64, tpu.core_type = #tpu.core_type<tc>, window_params = [{transform_indices = @transform_0, window_bounds = array<i64: 512, 144>}, {transform_indices = @transform_1, window_bounds = array<i64: 144, 128>}, {transform_indices = @transform_2, window_bounds = array<i64: 1, 128>}, {transform_indices = @transform_3, window_bounds = array<i64: 512, 128>}, {transform_indices = @transform_4, window_bounds = array<i64: 1, 1, 128>}, {transform_indices = @transform_5, window_bounds = array<i64: 1, 1, 128>}]} {
    %c0_i32 = arith.constant 0 : i32
    %0 = arith.cmpi eq, %arg2, %c0_i32 : i32
    %1 = arith.extui %0 : i1 to i32
    %c0_i32_0 = arith.constant 0 : i32
    %2 = arith.cmpi ne, %1, %c0_i32_0 : i32
    scf.if %2 {
      %cst_10 = arith.constant 0.000000e+00 : f32
      %12 = vector.broadcast %cst_10 : f32 to vector<512x128xf32>
      %c0_11 = arith.constant 0 : index
      %c0_12 = arith.constant 0 : index
      %13 = vector.load %arg9[%c0_11, %c0_12] : memref<512x128xf32, #tpu.memory_space<vmem>>, vector<512x128xf32>
      tpu.vector_store %arg9[%c0_11, %c0_12], %12 {strides = array<i32>} : memref<512x128xf32, #tpu.memory_space<vmem>>, vector<512x128xf32>,
    } else {
    }
    %c0 = arith.constant 0 : index
    %c0_1 = arith.constant 0 : index
    %3 = vector.load %arg9[%c0, %c0_1] : memref<512x128xf32, #tpu.memory_space<vmem>>, vector<512x128xf32>
    %c0_2 = arith.constant 0 : index
    %c0_3 = arith.constant 0 : index
    %4 = vector.load %arg3[%c0_2, %c0_3] : memref<512x144xbf16, #tpu.memory_space<vmem>>, vector<512x144xbf16>
    %c0_4 = arith.constant 0 : index
    %c0_5 = arith.constant 0 : index
    %5 = vector.load %arg4[%c0_4, %c0_5] : memref<144x128xbf16, #tpu.memory_space<vmem>>, vector<144x128xbf16>
    %cst = arith.constant dense<0.000000e+00> : vector<512x128xf32>
    %6 = tpu.matmul %4, %5, %cst {dimension_numbers = #tpu.dot_dimension_numbers<[1], [0], [0], [1], [0, 0, 1, 1], [], []>} : vector<512x144xbf16>, vector<144x128xbf16>, vector<512x128xf32> -> vector<512x128xf32>
    %7 = arith.addf %3, %6 : vector<512x128xf32>
    %c0_6 = arith.constant 0 : index
    %c0_7 = arith.constant 0 : index
    %8 = vector.load %arg9[%c0_6, %c0_7] : memref<512x128xf32, #tpu.memory_space<vmem>>, vector<512x128xf32>
    tpu.vector_store %arg9[%c0_6, %c0_7], %7 {strides = array<i32>} : memref<512x128xf32, #tpu.memory_space<vmem>>, vector<512x128xf32>,
    %c0_i32_8 = arith.constant 0 : i32
    %9 = arith.cmpi eq, %arg2, %c0_i32_8 : i32
    %10 = arith.extui %9 : i1 to i32
    %c0_i32_9 = arith.constant 0 : i32
    %11 = arith.cmpi ne, %10, %c0_i32_9 : i32
    scf.if %11 {
      %c0_10 = arith.constant 0 : index
      %c0_11 = arith.constant 0 : index
      %12 = vector.load %arg9[%c0_10, %c0_11] : memref<512x128xf32, #tpu.memory_space<vmem>>, vector<512x128xf32>
      %c0_12 = arith.constant 0 : index
      %c0_13 = arith.constant 0 : index
      %13 = vector.load %arg5[%c0_12, %c0_13] : memref<1x128xf32, #tpu.memory_space<vmem>>, vector<1x128xf32>
      %14 = vector.broadcast %13 : vector<1x128xf32> to vector<512x128xf32>
      %15 = arith.addf %12, %14 : vector<512x128xf32>
      %cst_14 = arith.constant dense<0.000000e+00> : vector<128xf32>
      %16 = vector.multi_reduction <add>, %15, %cst_14 [0] : vector<512x128xf32> to vector<128xf32>
      %17 = vector.shape_cast %16 : vector<128xf32> to vector<1x128xf32>
      %c0_15 = arith.constant 0 : index
      %c0_16 = arith.constant 0 : index
      %c0_17 = arith.constant 0 : index
      %18 = vector.load %arg7[%c0_15, %c0_16, %c0_17] : memref<1x1x128xf32, #tpu.memory_space<vmem>>, vector<1x1x128xf32>
      %19 = vector.shape_cast %18 : vector<1x1x128xf32> to vector<1x128xf32>
      %20 = vector.shape_cast %17 : vector<1x128xf32> to vector<1x1x128xf32>
      tpu.vector_store %arg7[%c0_15, %c0_16, %c0_17], %20 {strides = array<i32>} : memref<1x1x128xf32, #tpu.memory_space<vmem>>, vector<1x1x128xf32>,
      %21 = arith.mulf %15, %15 : vector<512x128xf32>
      %cst_18 = arith.constant dense<0.000000e+00> : vector<128xf32>
      %22 = vector.multi_reduction <add>, %21, %cst_18 [0] : vector<512x128xf32> to vector<128xf32>
      %23 = vector.shape_cast %22 : vector<128xf32> to vector<1x128xf32>
      %c0_19 = arith.constant 0 : index
      %c0_20 = arith.constant 0 : index
      %c0_21 = arith.constant 0 : index
      %24 = vector.load %arg8[%c0_19, %c0_20, %c0_21] : memref<1x1x128xf32, #tpu.memory_space<vmem>>, vector<1x1x128xf32>
      %25 = vector.shape_cast %24 : vector<1x1x128xf32> to vector<1x128xf32>
      %26 = vector.shape_cast %23 : vector<1x128xf32> to vector<1x1x128xf32>
      tpu.vector_store %arg8[%c0_19, %c0_20, %c0_21], %26 {strides = array<i32>} : memref<1x1x128xf32, #tpu.memory_space<vmem>>, vector<1x1x128xf32>,
      %27 = math.tanh %15 : vector<512x128xf32>
      %c0_22 = arith.constant 0 : index
      %c0_23 = arith.constant 0 : index
      %28 = vector.load %arg6[%c0_22, %c0_23] : memref<512x128xf32, #tpu.memory_space<vmem>>, vector<512x128xf32>
      tpu.vector_store %arg6[%c0_22, %c0_23], %27 {strides = array<i32>} : memref<512x128xf32, #tpu.memory_space<vmem>>, vector<512x128xf32>,
    } else {
    }
    return
  }
  func.func @transform_0(%arg0: i32, %arg1: i32, %arg2: i32) -> (i32, i32) {
    %c0_i32 = arith.constant 0 : i32
    return %arg0, %arg2 : i32, i32
  }
  func.func @transform_1(%arg0: i32, %arg1: i32, %arg2: i32) -> (i32, i32) {
    %c0_i32 = arith.constant 0 : i32
    return %arg2, %arg1 : i32, i32
  }
  func.func @transform_2(%arg0: i32, %arg1: i32, %arg2: i32) -> (i32, i32) {
    %c0_i32 = arith.constant 0 : i32
    %c0_i32_0 = arith.constant 0 : i32
    return %c0_i32, %arg1 : i32, i32
  }
  func.func @transform_3(%arg0: i32, %arg1: i32, %arg2: i32) -> (i32, i32) {
    %c0_i32 = arith.constant 0 : i32
    return %arg0, %arg1 : i32, i32
  }
  func.func @transform_4(%arg0: i32, %arg1: i32, %arg2: i32) -> (i32, i32, i32) {
    %c0_i32 = arith.constant 0 : i32
    %c0_i32_0 = arith.constant 0 : i32
    return %arg0, %c0_i32, %arg1 : i32, i32, i32
  }
  func.func @transform_5(%arg0: i32, %arg1: i32, %arg2: i32) -> (i32, i32, i32) {
    %c0_i32 = arith.constant 0 : i32
    %c0_i32_0 = arith.constant 0 : i32
    return %arg0, %c0_i32, %arg1 : i32, i32, i32
  }
}

</mosaic_0001>

<bundles_post_ra>
// kernel: tile.6
= control target key start
LH: loop header
LB: loop body
LE: loop exit
PB: predicated region body
PF: predicated region fallthrough
CT: control target
= control target key end

     0   :  { %2 = vsyncpa [#allocation1], 0  ;;  %s44_s6 = smov [#allocation0]   ;;  %s70_s0 = inlined_call_operand.hbm [shape: f32[3], index: 0, kind: input, shape index: {}]   ;;  %s71_s1 = inlined_call_operand.vmem [shape: f32[4,3], index: 1, kind: output, shape index: {}]  }
   0x1   :  { %s9_s7 = sshll.u32 %s44_s6, 4  ;;  %s20_s10 = scalar_lea.hbm %s70_s0, 16  ;;  %s10_s7 = int_to_ptr.vmem [resolvable:$true] %s9_s7 }
   0x2   :  { %p21_p0 = scmp.ne.s32.totalorder %s70_s0, %s20_s10  ;;  %p24_p1 = scmp.lt.u32.totalorder %s20_s10, %s70_s0 }
   0x4   :  { %p26_p2 = pnand %p24_p1, %p21_p0 }
   0x6   :  { %29 = shalt.err (!%p26_p2)
}
   0x7   :  { %s30_s15 = scalar_lea.vmem %s10_s7, 16  ;;  %s34_s16 = scalar_lea.vmem %s10_s7, 32 }
   0x8   :  { %p31_p3 = scmp.ne.s32.totalorder %s10_s7, %s30_s15  ;;  %p35_p4 = scmp.lt.s32.totalorder %s10_s7, %s10_s7 }
   0x9   :  { %p36_p5 = scmp.lt.s32.totalorder %s34_s16, %s30_s15 }
   0xb   :  { %p37_p6 = por %p36_p5, %p35_p4 }
   0xd   :  { %p38_p7 = pnand %p37_p6, %p31_p3 }
   0xf   :  { %41 = shalt.err (!%p38_p7)
}
  0x10   :  { %12 = dma.hbm_to_vmem [thread:$0]  %s70_s0, 16, %s10_s7, [#allocation1]  }
  0x11   :  { %42 = dma.done.wait [#allocation1], 16  }
  0x12   :  { %43 = vsyncadd [#allocation1], 4294967280  ;;  %v16_v0 = vld [vmem:[#allocation0] ss:$0 sm:$0xff] }
  0x13   :  { %17 = vst [vmem:[%s71_s1] sm:$0xf] %v16_v0 }
  0x14   :  { %18 = vsyncpa [#allocation1], 1 }

// kernel: tile.7
= control target key start
LH: loop header
LB: loop body
LE: loop exit
PB: predicated region body
PF: predicated region fallthrough
CT: control target
= control target key end

     0   :  { %vm7_vm0 = vcmask 23552   ;;  %s37_s8 = smov 3   ;;  %s38_s9 = smov 6   ;;  %vm13_vm1 = vcmask 97352   ;;  %vm19_vm2 = vcmask 72752   ;;  %vm25_vm3 = vcmask 48152   ;;  %s55_s0 = inlined_call_operand.vmem [shape: f32[4,3], index: 0, kind: input, shape index: {}]   ;;  %s56_s1 = inlined_call_operand.vmem [shape: f32[1,12], index: 1, kind: output, shape index: {}]  }
   0x1   :  { %v4_v0 = vld [vmem:[%s55_s0] sm:$0xf]  ;;  %s36_s0 = smov 9  }
   0x2   :  { %5 = vst [vmem:[#allocation1] sm:$0xf] %v4_v0 }
   0x9   :  { %v10_v1 = vld [vmem:[#allocation1 + $0x3] sm:$0x1]   ;;  %v22_v2 = vld [vmem:[#allocation1 + $0x1] sm:$0x1]   ;;  %v6_v3 = vld [vmem:[#allocation1] sm:$0x1]  }
   0xa   :  { %11 = vrot.lane.b32.xlu0 %v10_v1, %s36_s0  ;;  %23 = vrot.lane.b32.xlu1 %v22_v2, %s37_s8  ;;  %v16_v4 = vld [vmem:[#allocation1 + $0x2] sm:$0x1]   ;;  %8 = vst.msk [vmem:[#allocation0] sm:$0x1] %vm7_vm0, %v6_v3  }
   0xe   :  { %17 = vrot.lane.b32.xlu0 %v16_v4, %s38_s9 }
  0x7c   :  { %v12_v5 = vpop.permute.xlu0 %11   ;;  %v24_v6 = vpop.permute.xlu1 %23  }
  0x7d   :  { %14 = vst.msk [vmem:[#allocation0] sm:$0x1] %vm13_vm1, %v12_v5  }
  0x80   :  { %v18_v7 = vpop.permute.xlu0 %17  }
  0x81   :  { %20 = vst.msk [vmem:[#allocation0] sm:$0x1] %vm19_vm2, %v18_v7  }
  0x82   :  { %26 = vst.msk [vmem:[#allocation0] sm:$0x1] %vm25_vm3, %v24_v6  }
  0x89   :  { %v30_v8 = vld [vmem:[#allocation0] sm:$0x1] }
  0x8a   :  { %32 = vst [vmem:[%s56_s1] sm:$0x1] %v30_v8 }

// kernel: unet_generator_forward.11
= control target key start
LH: loop header
LB: loop body
LE: loop exit
PB: predicated region body
PF: predicated region fallthrough
CT: control target
= control target key end

     0   :  { %s804_s1 = inlined_call_operand.vmem [shape: bf16[128,128], index: 1, kind: input, shape index: {}]   ;;  %s805_s0 = inlined_call_operand.vmem [shape: bf16[128,128], index: 0, kind: input, shape index: {}]   ;;  %s806_s2 = inlined_call_operand.vmem [shape: f32[1,128], index: 2, kind: input, shape index: {}]   ;;  %s807_s3 = inlined_call_operand.vmem [shape: bf16[128,128], index: 3, kind: output, shape index: {0}]   ;;  %s808_s4 = inlined_call_operand.vmem [shape: f32[1,1,128], index: 4, kind: output, shape index: {1}]   ;;  %s809_s5 = inlined_call_operand.vmem [shape: f32[1,1,128], index: 5, kind: output, shape index: {2}]  }
   0x1   :  { %v665_v0 = vld [vmem:[%s804_s1] sm:$0xff]   ;;  %v666_v1 = vld [vmem:[%s804_s1 + $0x8] sm:$0xff]   ;;  %v667_v2 = vld [vmem:[%s804_s1 + $0x10] sm:$0xff]  }
   0x2   :  { %617 = vmatprep.subr.bf16.mxu0 %v665_v0  ;;  %649 = vmatprep.subr.bf16.mxu1 %v665_v0  ;;  %v668_v3 = vld [vmem:[%s804_s1 + $0x18] sm:$0xff]   ;;  %v673_v4 = vld [vmem:[%s805_s0] sm:$0xff]   ;;  %v670_v7 = vld [vmem:[%s804_s1 + $0x28] sm:$0xff]  }
   0x3   :  { %618 = vmatpush3.bf16.msra.mxu0 %v665_v0  ;;  %657 = vmatpush3.bf16.msra.mxu1 %v665_v0  ;;  %v669_v5 = vld [vmem:[%s804_s1 + $0x20] sm:$0xff]   ;;  %v671_v8 = vld [vmem:[%s804_s1 + $0x30] sm:$0xff]   ;;  %v672_v9 = vld [vmem:[%s804_s1 + $0x38] sm:$0xff]  }
   0x4   :  { %619 = vmatprep.subr.bf16.mxu0 %v666_v1  ;;  %650 = vmatprep.subr.bf16.mxu1 %v666_v1  ;;  %v677_v6 = vld [vmem:[%s805_s0 + $0x20] sm:$0xff]   ;;  %v674_v10 = vld [vmem:[%s805_s0 + $0x8] sm:$0xff]   ;;  %v675_v12 = vld [vmem:[%s805_s0 + $0x10] sm:$0xff]  }
   0x5   :  { %633 = vmatprep.mubr.bf16.mxu0 %v673_v4  ;;  %641 = vmatprep.mubr.bf16.mxu1 %v677_v6  ;;  %v678_v11 = vld [vmem:[%s805_s0 + $0x28] sm:$0xff]   ;;  %v679_v13 = vld [vmem:[%s805_s0 + $0x30] sm:$0xff]   ;;  %v676_v14 = vld [vmem:[%s805_s0 + $0x18] sm:$0xff]  }
   0x6   :  { %v680_v15 = vld [vmem:[%s805_s0 + $0x38] sm:$0xff]   ;;  %v521_v16 = vld [vmem:[%s806_s2] ss:$0 sm:$0xff] }
   0x7   :  { %620 = vmatpush3.bf16.msra.mxu0 %v666_v1  ;;  %658 = vmatpush3.bf16.msra.mxu1 %v666_v1 }
   0x8   :  { %621 = vmatprep.subr.bf16.mxu0 %v667_v2  ;;  %651 = vmatprep.subr.bf16.mxu1 %v667_v2 }
   0xb   :  { %622 = vmatpush3.bf16.msra.mxu0 %v667_v2  ;;  %659 = vmatpush3.bf16.msra.mxu1 %v667_v2 }
   0xc   :  { %623 = vmatprep.subr.bf16.mxu0 %v668_v3  ;;  %652 = vmatprep.subr.bf16.mxu1 %v668_v3 }
   0xf   :  { %624 = vmatpush3.bf16.msra.mxu0 %v668_v3  ;;  %660 = vmatpush3.bf16.msra.mxu1 %v668_v3 }
  0x10   :  { %625 = vmatprep.subr.bf16.mxu0 %v669_v5  ;;  %653 = vmatprep.subr.bf16.mxu1 %v669_v5 }
  0x13   :  { %626 = vmatpush3.bf16.msra.mxu0 %v669_v5  ;;  %661 = vmatpush3.bf16.msra.mxu1 %v669_v5 }
  0x14   :  { %627 = vmatprep.subr.bf16.mxu0 %v670_v7  ;;  %654 = vmatprep.subr.bf16.mxu1 %v670_v7 }
  0x17   :  { %628 = vmatpush3.bf16.msra.mxu0 %v670_v7  ;;  %662 = vmatpush3.bf16.msra.mxu1 %v670_v7 }
  0x18   :  { %629 = vmatprep.subr.bf16.mxu0 %v671_v8  ;;  %655 = vmatprep.subr.bf16.mxu1 %v671_v8 }
  0x1b   :  { %630 = vmatpush3.bf16.msra.mxu0 %v671_v8  ;;  %663 = vmatpush3.bf16.msra.mxu1 %v671_v8 }
  0x1c   :  { %631 = vmatprep.subr.bf16.mxu0 %v672_v9  ;;  %656 = vmatprep.subr.bf16.mxu1 %v672_v9 }
  0x1f   :  { %632 = vmatpush3.bf16.msra.mxu0 %v672_v9  ;;  %664 = vmatpush3.bf16.msra.mxu1 %v672_v9 }
  0x22   :  { %634 = vmatmul.mubr.bf16.vlgmr.msra.gmra.mrb[0].mxu0 %v674_v10  ;;  %642 = vmatmul.mubr.bf16.vlgmr.msra.gmra.mrb[0].mxu1 %v678_v11 }
  0x23   :  { %637 = vmatprep.mubr.bf16.mxu0 %v675_v12  ;;  %645 = vmatprep.mubr.bf16.mxu1 %v679_v13 }
  0x2a   :  { %638 = vmatmul.mubr.bf16.gmra.mrb[4].mxu0 %v676_v14  ;;  %646 = vmatmul.mubr.bf16.gmra.mrb[4].mxu1 %v680_v15 }
  0xf5   :  { %v635_v17 = vpop.f32.mrb[0].mxu0  ;;  %v643_v18 = vpop.f32.mrb[0].mxu1 }
  0xf6   :  { %v216_v19 = vpop.f32.mrb[1].mxu0  ;;  %v762_v20 = vadd.f32 %v643_v18, %v521_v16  ;;  %v248_v21 = vpop.f32.mrb[1].mxu1  ;;  %v339_v25 = vadd.f32 %v635_v17, %v521_v16 }
  0xf7   :  { %v337_v22 = vadd.f32 %v521_v16, %v216_v19  ;;  %v636_v23 = vpop.f32.mrb[2].mxu0  ;;  %v644_v24 = vpop.f32.mrb[2].mxu1  ;;  %v345_v28 = vadd.f32 %v521_v16, %v248_v21 }
  0xf8   :  { %v340_v26 = vadd.f32 %v636_v23, %v521_v16  ;;  %v219_v27 = vpop.f32.mrb[3].mxu0  ;;  %v764_v29 = vadd.f32 %v644_v24, %v521_v16  ;;  %v251_v30 = vpop.f32.mrb[3].mxu1  ;;  %v377_v40 = vmul.f32 %v339_v25, %v339_v25  ;;  %v385_v21 = vmul.f32 %v762_v20, %v762_v20 }
  0xf9   :  { %v338_v31 = vadd.f32 %v521_v16, %v219_v27  ;;  %v346_v32 = vadd.f32 %v521_v16, %v251_v30  ;;  %v375_v35 = vmul.f32 %v337_v22, %v337_v22  ;;  %v383_v14 = vmul.f32 %v345_v28, %v345_v28 }
  0xfa   :  { %v562_v33 = vpack.c.bf16 %v340_v26, %v339_v25  ;;  %v582_v34 = vpack.c.bf16 %v764_v29, %v762_v20  ;;  %v378_v47 = vmul.f32 %v340_v26, %v340_v26  ;;  %v386_v24 = vmul.f32 %v764_v29, %v764_v29 }
  0xfb   :  { %v353_v36 = vadd.f32 %v338_v31, %v337_v22  ;;  %v376_v37 = vmul.f32 %v338_v31, %v338_v31  ;;  %v557_v38 = vpack.c.bf16 %v338_v31, %v337_v22  ;;  %v577_v39 = vpack.c.bf16 %v346_v32, %v345_v28 }
  0xfc   :  { %594 = vst [vmem:[%s807_s3 + $0x8] sm:$0xff] %v562_v33   ;;  %598 = vst [vmem:[%s807_s3 + $0x28] sm:$0xff] %v582_v34   ;;  %v384_v19 = vmul.f32 %v346_v32, %v346_v32 }
  0xfd   :  { %v354_v41 = vadd.f32 %v353_v36, %v339_v25  ;;  %v391_v42 = vadd.f32 %v376_v37, %v375_v35  ;;  %558 = vst [vmem:[%s807_s3] sm:$0xff] %v557_v38   ;;  %v639_v43 = vpop.f32.mrb[4].mxu0  ;;  %v647_v44 = vpop.f32.mrb[4].mxu1  ;;  %597 = vst [vmem:[%s807_s3 + $0x20] sm:$0xff] %v577_v39  }
  0xfe   :  { %v232_v45 = vpop.f32.mrb[5].mxu0  ;;  %v264_v46 = vpop.f32.mrb[5].mxu1  ;;  %v343_v53 = vadd.f32 %v639_v43, %v521_v16  ;;  %v351_v56 = vadd.f32 %v647_v44, %v521_v16 }
  0xff   :  { %v392_v48 = vadd.f32 %v391_v42, %v377_v40  ;;  %v341_v49 = vadd.f32 %v521_v16, %v232_v45  ;;  %v355_v50 = vadd.f32 %v354_v41, %v340_v26  ;;  %v640_v51 = vpop.f32.mrb[6].mxu0  ;;  %v648_v52 = vpop.f32.mrb[6].mxu1  ;;  %v349_v0 = vadd.f32 %v521_v16, %v264_v46 }
 0x100   :  { %v344_v54 = vadd.f32 %v640_v51, %v521_v16  ;;  %v235_v55 = vpop.f32.mrb[7].mxu0  ;;  %v352_v57 = vadd.f32 %v648_v52, %v521_v16  ;;  %v267_v58 = vpop.f32.mrb[7].mxu1  ;;  %v381_v7 = vmul.f32 %v343_v53, %v343_v53  ;;  %v389_v35 = vmul.f32 %v351_v56, %v351_v56 }
 0x101   :  { %v356_v59 = vadd.f32 %v355_v50, %v341_v49  ;;  %v379_v60 = vmul.f32 %v341_v49, %v341_v49  ;;  %v393_v61 = vadd.f32 %v392_v48, %v378_v47  ;;  %v342_v62 = vadd.f32 %v521_v16, %v235_v55 }
 0x102   :  { %v572_v63 = vpack.c.bf16 %v344_v54, %v343_v53  ;;  %v592_v5 = vpack.c.bf16 %v352_v57, %v351_v56  ;;  %v350_v6 = vadd.f32 %v521_v16, %v267_v58  ;;  %v382_v11 = vmul.f32 %v344_v54, %v344_v54 }
 0x103   :  { %v394_v1 = vadd.f32 %v393_v61, %v379_v60  ;;  %v357_v2 = vadd.f32 %v356_v59, %v342_v62  ;;  %v380_v3 = vmul.f32 %v342_v62, %v342_v62  ;;  %v567_v4 = vpack.c.bf16 %v342_v62, %v341_v49 }
 0x104   :  { %596 = vst [vmem:[%s807_s3 + $0x18] sm:$0xff] %v572_v63   ;;  %600 = vst [vmem:[%s807_s3 + $0x38] sm:$0xff] %v592_v5   ;;  %v587_v10 = vpack.c.bf16 %v350_v6, %v349_v0  ;;  %v387_v27 = vmul.f32 %v349_v0, %v349_v0  ;;  %v388_v34 = vmul.f32 %v350_v6, %v350_v6 }
 0x105   :  { %v358_v8 = vadd.f32 %v357_v2, %v343_v53  ;;  %v395_v9 = vadd.f32 %v394_v1, %v380_v3  ;;  %595 = vst [vmem:[%s807_s3 + $0x10] sm:$0xff] %v567_v4   ;;  %v390_v37 = vmul.f32 %v352_v57, %v352_v57 }
 0x106   :  { %599 = vst [vmem:[%s807_s3 + $0x30] sm:$0xff] %v587_v10  }
 0x107   :  { %v396_v12 = vadd.f32 %v395_v9, %v381_v7  ;;  %v359_v13 = vadd.f32 %v358_v8, %v344_v54 }
 0x109   :  { %v360_v15 = vadd.f32 %v359_v13, %v345_v28  ;;  %v397_v16 = vadd.f32 %v396_v12, %v382_v11 }
 0x10b   :  { %v398_v17 = vadd.f32 %v397_v16, %v383_v14  ;;  %v361_v18 = vadd.f32 %v360_v15, %v346_v32 }
 0x10d   :  { %v362_v22 = vadd.f32 %v361_v18, %v762_v20  ;;  %v399_v23 = vadd.f32 %v398_v17, %v384_v19 }
 0x10f   :  { %v400_v25 = vadd.f32 %v399_v23, %v385_v21  ;;  %v363_v26 = vadd.f32 %v362_v22, %v764_v29 }
 0x111   :  { %v364_v30 = vadd.f32 %v363_v26, %v349_v0  ;;  %v401_v31 = vadd.f32 %v400_v25, %v386_v24 }
 0x113   :  { %v402_v28 = vadd.f32 %v401_v31, %v387_v27  ;;  %v365_v33 = vadd.f32 %v364_v30, %v350_v6 }
 0x115   :  { %v366_v32 = vadd.f32 %v365_v33, %v351_v56  ;;  %v403_v36 = vadd.f32 %v402_v28, %v388_v34 }
 0x117   :  { %v367_v38 = vadd.f32 %v366_v32, %v352_v57  ;;  %v404_v39 = vadd.f32 %v403_v36, %v389_v35 }
 0x119   :  { %v368_v20 = vrot.slane %v367_v38, 4  ;;  %v405_v40 = vadd.f32 %v404_v39, %v390_v37 }
 0x11b   :  { %v369_v41 = vadd.f32 %v368_v20, %v367_v38  ;;  %v406_v42 = vrot.slane %v405_v40, 4 }
 0x11d   :  { %v370_v43 = vrot.slane %v369_v41, 2  ;;  %v407_v44 = vadd.f32 %v406_v42, %v405_v40 }
 0x11f   :  { %v371_v45 = vadd.f32 %v370_v43, %v369_v41  ;;  %v408_v29 = vrot.slane %v407_v44, 2 }
 0x121   :  { %v372_v46 = vrot.slane %v371_v45, 1  ;;  %v409_v47 = vadd.f32 %v408_v29, %v407_v44 }
 0x123   :  { %v373_v48 = vadd.f32 %v372_v46, %v371_v45  ;;  %v410_v49 = vrot.slane %v409_v47, 1 }
 0x125   :  { %374 = vst [vmem:[%s808_s4] sm:$0x1] %v373_v48  ;;  %v411_v50 = vadd.f32 %v410_v49, %v409_v47 }
 0x127   :  { %412 = vst [vmem:[%s809_s5] sm:$0x1] %v411_v50 }

// kernel: unet_generator_forward.10
= control target key start
LH: loop header
LB: loop body
LE: loop exit
PB: predicated region body
PF: predicated region fallthrough
CT: control target
= control target key end

     0   :  { %11 = vsyncpa [#allocation4], 0  ;;  %vm400_vm0 = vcmask 392192   ;;  %s2749_s0 = inlined_call_operand.vmem [shape: bf16[512,48], index: 0, kind: input, shape index: {}]   ;;  %s2750_s1 = inlined_call_operand.vmem [shape: bf16[48,128], index: 1, kind: input, shape index: {}]   ;;  %s2751_s2 = inlined_call_operand.vmem [shape: f32[1,128], index: 2, kind: input, shape index: {}]   ;;  %s2752_s3 = inlined_call_operand.vmem [shape: bf16[512,128], index: 3, kind: output, shape index: {0}]   ;;  %s2753_s4 = inlined_call_operand.hbm [shape: f32[1,1,128], index: 4, kind: output, shape index: {1}]   ;;  %s2754_s5 = inlined_call_operand.hbm [shape: f32[1,1,128], index: 5, kind: output, shape index: {2}]  }
   0x1   :  { %v2108_v0 = vld [vmem:[%s2750_s1] sm:$0xff]   ;;  %v2109_v1 = vld [vmem:[%s2750_s1 + $0x8] sm:$0xff]   ;;  %v2110_v3 = vld [vmem:[%s2750_s1 + $0x10] sm:$0xff]  }
   0x2   :  { %2030 = vmatprep.subr.bf16.mxu0 %v2108_v0  ;;  %2100 = vmatprep.subr.bf16.mxu1 %v2108_v0  ;;  %v2111_v2 = vld [vmem:[%s2749_s0] sm:$0xff]   ;;  %v2112_v4 = vld [vmem:[%s2749_s0 + $0x8] sm:$0xff]   ;;  %v2113_v5 = vld [vmem:[%s2749_s0 + $0x10] sm:$0xff]  }
   0x3   :  { %2031 = vmatpush3.bf16.msra.mxu0 %v2108_v0  ;;  %2103 = vmatpush3.bf16.msra.mxu1 %v2108_v0  ;;  %v2114_v6 = vld [vmem:[%s2749_s0 + $0x18] sm:$0xff]   ;;  %v2115_v7 = vld [vmem:[%s2749_s0 + $0x20] sm:$0xff]   ;;  %v2128_v9 = vld [vmem:[%s2749_s0 + $0x88] sm:$0xff]  }
   0x4   :  { %2032 = vmatprep.subr.bf16.mxu0 %v2109_v1  ;;  %2101 = vmatprep.subr.bf16.mxu1 %v2109_v1  ;;  %v2127_v8 = vld [vmem:[%s2749_s0 + $0x80] sm:$0xff]   ;;  %v2129_v10 = vld [vmem:[%s2749_s0 + $0x90] sm:$0xff]   ;;  %v2116_v11 = vld [vmem:[%s2749_s0 + $0x28] sm:$0xff]  }
   0x5   :  { %2036 = vmatprep.mubr.msk.bf16.mxu0 %vm400_vm0, %v2111_v2  ;;  %2068 = vmatprep.mubr.msk.bf16.mxu1 %vm400_vm0, %v2127_v8  ;;  %v2117_v12 = vld [vmem:[%s2749_s0 + $0x30] sm:$0xff]   ;;  %v2130_v13 = vld [vmem:[%s2749_s0 + $0x98] sm:$0xff]   ;;  %v2131_v14 = vld [vmem:[%s2749_s0 + $0xa0] sm:$0xff]  }
   0x6   :  { %v2118_v15 = vld [vmem:[%s2749_s0 + $0x38] sm:$0xff]   ;;  %v2132_v16 = vld [vmem:[%s2749_s0 + $0xa8] sm:$0xff]   ;;  %v2119_v17 = vld [vmem:[%s2749_s0 + $0x40] sm:$0xff]  }
   0x7   :  { %2033 = vmatpush3.bf16.msra.mxu0 %v2109_v1  ;;  %2104 = vmatpush3.bf16.msra.mxu1 %v2109_v1  ;;  %v2133_v18 = vld [vmem:[%s2749_s0 + $0xb0] sm:$0xff]  }
   0x8   :  { %2034 = vmatprep.subr.bf16.mxu0 %v2110_v3  ;;  %2102 = vmatprep.subr.bf16.mxu1 %v2110_v3 }
   0xb   :  { %2035 = vmatpush3.bf16.msra.mxu0 %v2110_v3  ;;  %2105 = vmatpush3.bf16.msra.mxu1 %v2110_v3 }
   0xe   :  { %2037 = vmatmul.mubr.msk.bf16.vlgmr.msra.gmra.mrb[0].mxu0 %vm400_vm0, %v2112_v4  ;;  %2069 = vmatmul.mubr.msk.bf16.vlgmr.msra.gmra.mrb[0].mxu1 %vm400_vm0, %v2128_v9 }
   0xf   :  { %2040 = vmatprep.mubr.msk.bf16.mxu0 %vm400_vm0, %v2113_v5  ;;  %2072 = vmatprep.mubr.msk.bf16.mxu1 %vm400_vm0, %v2129_v10 }
  0x16   :  { %2041 = vmatmul.mubr.msk.bf16.gmra.mrb[4].mxu0 %vm400_vm0, %v2114_v6  ;;  %2073 = vmatmul.mubr.msk.bf16.gmra.mrb[4].mxu1 %vm400_vm0, %v2130_v13 }
  0x17   :  { %2044 = vmatprep.mubr.msk.bf16.mxu0 %vm400_vm0, %v2115_v7  ;;  %2076 = vmatprep.mubr.msk.bf16.mxu1 %vm400_vm0, %v2131_v14 }
  0x1e   :  { %2045 = vmatmul.mubr.msk.bf16.gmra.mrb[8].mxu0 %vm400_vm0, %v2116_v11 }
  0x1f   :  { %2048 = vmatprep.mubr.msk.bf16.mxu0 %vm400_vm0, %v2117_v12 }
  0x20   :  { %12 = vsyncpa [#allocation6], 0  ;;  %2077 = vmatmul.mubr.msk.bf16.gmra.mrb[8].mxu1 %vm400_vm0, %v2132_v16  ;;  %v2120_v19 = vld [vmem:[%s2749_s0 + $0x48] sm:$0xff]   ;;  %v2134_v20 = vld [vmem:[%s2749_s0 + $0xb8] sm:$0xff]   ;;  %s2192_s19 = smov [#allocation5]  }
  0x21   :  { %2080 = vmatprep.mubr.msk.bf16.mxu1 %vm400_vm0, %v2133_v18  ;;  %v2121_v21 = vld [vmem:[%s2749_s0 + $0x50] sm:$0xff]   ;;  %v2135_v22 = vld [vmem:[%s2749_s0 + $0xc0] sm:$0xff]   ;;  %v2122_v23 = vld [vmem:[%s2749_s0 + $0x58] sm:$0xff]   ;;  %s1594_s20 = sshll.u32 %s2192_s19, 4  ;;  %s2717_s20 = int_to_ptr.vmem [resolvable:$true] %s1594_s20 }
  0x22   :  { %v2136_v24 = vld [vmem:[%s2749_s0 + $0xc8] sm:$0xff]   ;;  %v2123_v25 = vld [vmem:[%s2749_s0 + $0x60] sm:$0xff]   ;;  %v2137_v26 = vld [vmem:[%s2749_s0 + $0xd0] sm:$0xff]  }
  0x23   :  { %v2124_v27 = vld [vmem:[%s2749_s0 + $0x68] sm:$0xff]   ;;  %v2138_v28 = vld [vmem:[%s2749_s0 + $0xd8] sm:$0xff]   ;;  %v2125_v29 = vld [vmem:[%s2749_s0 + $0x70] sm:$0xff]  }
  0x24   :  { %v2139_v30 = vld [vmem:[%s2749_s0 + $0xe0] sm:$0xff]   ;;  %v2126_v31 = vld [vmem:[%s2749_s0 + $0x78] sm:$0xff]   ;;  %v2140_v32 = vld [vmem:[%s2749_s0 + $0xe8] sm:$0xff]  }
  0x25   :  { %v2141_v33 = vld [vmem:[%s2749_s0 + $0xf0] sm:$0xff]   ;;  %v2142_v34 = vld [vmem:[%s2749_s0 + $0xf8] sm:$0xff]   ;;  %v2363_v35 = vld [vmem:[%s2751_s2] ss:$0 sm:$0xff] }
  0x26   :  { %2049 = vmatmul.mubr.msk.bf16.gmra.mrb[12].mxu0 %vm400_vm0, %v2118_v15 }
  0x27   :  { %2052 = vmatprep.mubr.msk.bf16.mxu0 %vm400_vm0, %v2119_v17 }
  0x28   :  { %2081 = vmatmul.mubr.msk.bf16.gmra.mrb[12].mxu1 %vm400_vm0, %v2134_v20 }
  0x29   :  { %2084 = vmatprep.mubr.msk.bf16.mxu1 %vm400_vm0, %v2135_v22 }
  0x2e   :  { %2053 = vmatmul.mubr.msk.bf16.gmra.mrb[16].mxu0 %vm400_vm0, %v2120_v19 }
  0x2f   :  { %2056 = vmatprep.mubr.msk.bf16.mxu0 %vm400_vm0, %v2121_v21 }
  0x30   :  { %2085 = vmatmul.mubr.msk.bf16.gmra.mrb[16].mxu1 %vm400_vm0, %v2136_v24 }
  0x31   :  { %2088 = vmatprep.mubr.msk.bf16.mxu1 %vm400_vm0, %v2137_v26 }
  0x36   :  { %2057 = vmatmul.mubr.msk.bf16.gmra.mrb[20].mxu0 %vm400_vm0, %v2122_v23 }
  0x37   :  { %2060 = vmatprep.mubr.msk.bf16.mxu0 %vm400_vm0, %v2123_v25 }
  0x38   :  { %2089 = vmatmul.mubr.msk.bf16.gmra.mrb[20].mxu1 %vm400_vm0, %v2138_v28 }
  0x39   :  { %2092 = vmatprep.mubr.msk.bf16.mxu1 %vm400_vm0, %v2139_v30 }
  0x3e   :  { %2061 = vmatmul.mubr.msk.bf16.gmra.mrb[24].mxu0 %vm400_vm0, %v2124_v27 }
  0x3f   :  { %2064 = vmatprep.mubr.msk.bf16.mxu0 %vm400_vm0, %v2125_v29 }
  0x40   :  { %2093 = vmatmul.mubr.msk.bf16.gmra.mrb[24].mxu1 %vm400_vm0, %v2140_v32 }
  0x41   :  { %2096 = vmatprep.mubr.msk.bf16.mxu1 %vm400_vm0, %v2141_v33 }
  0x46   :  { %2065 = vmatmul.mubr.msk.bf16.gmra.mrb[28].mxu0 %vm400_vm0, %v2126_v31 }
  0x48   :  { %2097 = vmatmul.mubr.msk.bf16.gmra.mrb[28].mxu1 %vm400_vm0, %v2142_v34 }
  0xe1   :  { %v2038_v36 = vpop.f32.mrb[0].mxu0  ;;  %v2070_v53 = vpop.f32.mrb[0].mxu1 }
  0xe2   :  { %v531_v37 = vpop.f32.mrb[1].mxu0  ;;  %v990_v40 = vadd.f32 %v2038_v36, %v2363_v35  ;;  %v659_v55 = vpop.f32.mrb[1].mxu1  ;;  %v2379_v1 = vadd.f32 %v2070_v53, %v2363_v35 }
  0xe3   :  { %v988_v38 = vadd.f32 %v2363_v35, %v531_v37  ;;  %v2039_v39 = vpop.f32.mrb[2].mxu0  ;;  %v2071_v61 = vpop.f32.mrb[2].mxu1  ;;  %v2386_v9 = vadd.f32 %v2363_v35, %v659_v55 }
  0xe4   :  { %v991_v41 = vadd.f32 %v2039_v39, %v2363_v35  ;;  %v534_v42 = vpop.f32.mrb[3].mxu0  ;;  %v1124_v49 = vmul.f32 %v990_v40, %v990_v40  ;;  %v2382_v2 = vadd.f32 %v2071_v61, %v2363_v35  ;;  %v662_v3 = vpop.f32.mrb[3].mxu1 }
  0xe5   :  { %v989_v43 = vadd.f32 %v2363_v35, %v534_v42  ;;  %v1122_v45 = vmul.f32 %v988_v38, %v988_v38  ;;  %v2394_v15 = vadd.f32 %v2363_v35, %v662_v3 }
  0xe6   :  { %v1812_v44 = vpack.c.bf16 %v991_v41, %v990_v40  ;;  %v1125_v56 = vmul.f32 %v991_v41, %v991_v41  ;;  %v1892_v14 = vpack.c.bf16 %v2382_v2, %v2379_v1 }
  0xe7   :  { %v1052_v46 = vadd.f32 %v989_v43, %v988_v38  ;;  %v1123_v47 = vmul.f32 %v989_v43, %v989_v43  ;;  %v1807_v48 = vpack.c.bf16 %v989_v43, %v988_v38  ;;  %v1887_v22 = vpack.c.bf16 %v2394_v15, %v2386_v9 }
  0xe8   :  { %1964 = vst [vmem:[%s2752_s3 + $0x8] sm:$0xff] %v1812_v44   ;;  %1980 = vst [vmem:[%s2752_s3 + $0x88] sm:$0xff] %v1892_v14  }
  0xe9   :  { %v1053_v50 = vadd.f32 %v1052_v46, %v990_v40  ;;  %v1186_v51 = vadd.f32 %v1123_v47, %v1122_v45  ;;  %1808 = vst [vmem:[%s2752_s3] sm:$0xff] %v1807_v48   ;;  %v2042_v52 = vpop.f32.mrb[4].mxu0  ;;  %v2074_v20 = vpop.f32.mrb[4].mxu1  ;;  %1979 = vst [vmem:[%s2752_s3 + $0x80] sm:$0xff] %v1887_v22  }
  0xea   :  { %v547_v54 = vpop.f32.mrb[5].mxu0  ;;  %v994_v62 = vadd.f32 %v2042_v52, %v2363_v35  ;;  %v675_v23 = vpop.f32.mrb[5].mxu1  ;;  %v2411_v33 = vadd.f32 %v2074_v20, %v2363_v35 }
  0xeb   :  { %v1187_v57 = vadd.f32 %v1186_v51, %v1124_v49  ;;  %v992_v58 = vadd.f32 %v2363_v35, %v547_v54  ;;  %v1054_v59 = vadd.f32 %v1053_v50, %v991_v41  ;;  %v2043_v60 = vpop.f32.mrb[6].mxu0  ;;  %v2075_v29 = vpop.f32.mrb[6].mxu1  ;;  %v2418_v42 = vadd.f32 %v2363_v35, %v675_v23 }
  0xec   :  { %v995_v63 = vadd.f32 %v2043_v60, %v2363_v35  ;;  %v550_v0 = vpop.f32.mrb[7].mxu0  ;;  %v1128_v16 = vmul.f32 %v994_v62, %v994_v62  ;;  %v2414_v34 = vadd.f32 %v2075_v29, %v2363_v35  ;;  %v678_v36 = vpop.f32.mrb[7].mxu1 }
  0xed   :  { %v1055_v4 = vadd.f32 %v1054_v59, %v992_v58  ;;  %v1126_v5 = vmul.f32 %v992_v58, %v992_v58  ;;  %v1188_v6 = vadd.f32 %v1187_v57, %v1125_v56  ;;  %v993_v7 = vadd.f32 %v2363_v35, %v550_v0 }
  0xee   :  { %v1822_v8 = vpack.c.bf16 %v995_v63, %v994_v62  ;;  %v1129_v24 = vmul.f32 %v995_v63, %v995_v63  ;;  %v1902_v47 = vpack.c.bf16 %v2414_v34, %v2411_v33  ;;  %v2426_v48 = vadd.f32 %v2363_v35, %v678_v36 }
  0xef   :  { %v1189_v10 = vadd.f32 %v1188_v6, %v1126_v5  ;;  %v1056_v11 = vadd.f32 %v1055_v4, %v993_v7  ;;  %v1127_v12 = vmul.f32 %v993_v7, %v993_v7  ;;  %v1817_v13 = vpack.c.bf16 %v993_v7, %v992_v58 }
  0xf0   :  { %1966 = vst [vmem:[%s2752_s3 + $0x18] sm:$0xff] %v1822_v8   ;;  %1982 = vst [vmem:[%s2752_s3 + $0x98] sm:$0xff] %v1902_v47   ;;  %v1897_v55 = vpack.c.bf16 %v2426_v48, %v2418_v42 }
  0xf1   :  { %v1057_v17 = vadd.f32 %v1056_v11, %v994_v62  ;;  %v1190_v18 = vadd.f32 %v1189_v10, %v1127_v12  ;;  %1965 = vst [vmem:[%s2752_s3 + $0x10] sm:$0xff] %v1817_v13   ;;  %v2046_v19 = vpop.f32.mrb[8].mxu0 }
  0xf2   :  { %v563_v21 = vpop.f32.mrb[9].mxu0  ;;  %v998_v30 = vadd.f32 %v2046_v19, %v2363_v35  ;;  %1981 = vst [vmem:[%s2752_s3 + $0x90] sm:$0xff] %v1897_v55  }
  0xf3   :  { %v1191_v25 = vadd.f32 %v1190_v18, %v1128_v16  ;;  %v996_v26 = vadd.f32 %v2363_v35, %v563_v21  ;;  %v1058_v27 = vadd.f32 %v1057_v17, %v995_v63  ;;  %v2047_v28 = vpop.f32.mrb[10].mxu0  ;;  %v2078_v53 = vpop.f32.mrb[8].mxu1 }
  0xf4   :  { %v999_v31 = vadd.f32 %v2047_v28, %v2363_v35  ;;  %v566_v32 = vpop.f32.mrb[11].mxu0  ;;  %v1132_v49 = vmul.f32 %v998_v30, %v998_v30  ;;  %v691_v56 = vpop.f32.mrb[9].mxu1  ;;  %v2443_v4 = vadd.f32 %v2078_v53, %v2363_v35 }
  0xf5   :  { %v1059_v37 = vadd.f32 %v1058_v27, %v996_v26  ;;  %v1130_v38 = vmul.f32 %v996_v26, %v996_v26  ;;  %v1192_v39 = vadd.f32 %v1191_v25, %v1129_v24  ;;  %v997_v40 = vadd.f32 %v2363_v35, %v566_v32  ;;  %v2079_v62 = vpop.f32.mrb[10].mxu1 }
  0xf6   :  { %v1832_v41 = vpack.c.bf16 %v999_v31, %v998_v30  ;;  %v1133_v57 = vmul.f32 %v999_v31, %v999_v31  ;;  %v2446_v5 = vadd.f32 %v2079_v62, %v2363_v35  ;;  %v694_v6 = vpop.f32.mrb[11].mxu1  ;;  %v2450_v13 = vadd.f32 %v2363_v35, %v691_v56 }
  0xf7   :  { %v1193_v43 = vadd.f32 %v1192_v39, %v1130_v38  ;;  %v1060_v44 = vadd.f32 %v1059_v37, %v997_v40  ;;  %v1131_v45 = vmul.f32 %v997_v40, %v997_v40  ;;  %v1827_v46 = vpack.c.bf16 %v997_v40, %v996_v26 }
  0xf8   :  { %1968 = vst [vmem:[%s2752_s3 + $0x28] sm:$0xff] %v1832_v41   ;;  %v1912_v19 = vpack.c.bf16 %v2446_v5, %v2443_v4  ;;  %v2458_v20 = vadd.f32 %v2363_v35, %v694_v6 }
  0xf9   :  { %v1061_v50 = vadd.f32 %v1060_v44, %v998_v30  ;;  %v1194_v51 = vadd.f32 %v1193_v43, %v1131_v45  ;;  %1967 = vst [vmem:[%s2752_s3 + $0x20] sm:$0xff] %v1827_v46   ;;  %v2050_v52 = vpop.f32.mrb[12].mxu0 }
  0xfa   :  { %v579_v54 = vpop.f32.mrb[13].mxu0  ;;  %v1002_v63 = vadd.f32 %v2050_v52, %v2363_v35  ;;  %1984 = vst [vmem:[%s2752_s3 + $0xa8] sm:$0xff] %v1912_v19   ;;  %v1907_v27 = vpack.c.bf16 %v2458_v20, %v2450_v13 }
  0xfb   :  { %v1195_v58 = vadd.f32 %v1194_v51, %v1132_v49  ;;  %v1000_v59 = vadd.f32 %v2363_v35, %v579_v54  ;;  %v1062_v60 = vadd.f32 %v1061_v50, %v999_v31  ;;  %v2051_v61 = vpop.f32.mrb[14].mxu0  ;;  %v2082_v25 = vpop.f32.mrb[12].mxu1 }
  0xfc   :  { %v1003_v0 = vadd.f32 %v2051_v61, %v2363_v35  ;;  %v582_v3 = vpop.f32.mrb[15].mxu0  ;;  %v1136_v21 = vmul.f32 %v1002_v63, %v1002_v63  ;;  %v707_v28 = vpop.f32.mrb[13].mxu1  ;;  %1983 = vst [vmem:[%s2752_s3 + $0xa0] sm:$0xff] %v1907_v27   ;;  %v2475_v41 = vadd.f32 %v2082_v25, %v2363_v35 }
  0xfd   :  { %v1063_v7 = vadd.f32 %v1062_v60, %v1000_v59  ;;  %v1134_v8 = vmul.f32 %v1000_v59, %v1000_v59  ;;  %v1196_v10 = vadd.f32 %v1195_v58, %v1133_v57  ;;  %v1001_v11 = vadd.f32 %v2363_v35, %v582_v3  ;;  %v2083_v37 = vpop.f32.mrb[14].mxu1 }
  0xfe   :  { %v1842_v12 = vpack.c.bf16 %v1003_v0, %v1002_v63  ;;  %v1137_v29 = vmul.f32 %v1003_v0, %v1003_v0  ;;  %v2478_v43 = vadd.f32 %v2083_v37, %v2363_v35  ;;  %v710_v44 = vpop.f32.mrb[15].mxu1  ;;  %v2482_v51 = vadd.f32 %v2363_v35, %v707_v28 }
  0xff   :  { %v1197_v14 = vadd.f32 %v1196_v10, %v1134_v8  ;;  %v1064_v16 = vadd.f32 %v1063_v7, %v1001_v11  ;;  %v1135_v17 = vmul.f32 %v1001_v11, %v1001_v11  ;;  %v1837_v18 = vpack.c.bf16 %v1001_v11, %v1000_v59 }
 0x100   :  { %1970 = vst [vmem:[%s2752_s3 + $0x38] sm:$0xff] %v1842_v12   ;;  %v1922_v56 = vpack.c.bf16 %v2478_v43, %v2475_v41  ;;  %v2490_v57 = vadd.f32 %v2363_v35, %v710_v44 }
 0x101   :  { %v1065_v22 = vadd.f32 %v1064_v16, %v1002_v63  ;;  %v1198_v23 = vadd.f32 %v1197_v14, %v1135_v17  ;;  %1969 = vst [vmem:[%s2752_s3 + $0x30] sm:$0xff] %v1837_v18   ;;  %v2054_v24 = vpop.f32.mrb[16].mxu0 }
 0x102   :  { %v595_v26 = vpop.f32.mrb[17].mxu0  ;;  %v1006_v38 = vadd.f32 %v2054_v24, %v2363_v35  ;;  %1986 = vst [vmem:[%s2752_s3 + $0xb8] sm:$0xff] %v1922_v56  }
 0x103   :  { %v1199_v30 = vadd.f32 %v1198_v23, %v1136_v21  ;;  %v1004_v31 = vadd.f32 %v2363_v35, %v595_v26  ;;  %v1066_v32 = vadd.f32 %v1065_v22, %v1003_v0  ;;  %v2055_v36 = vpop.f32.mrb[18].mxu0  ;;  %v2086_v62 = vpop.f32.mrb[16].mxu1  ;;  %v1917_v0 = vpack.c.bf16 %v2490_v57, %v2482_v51 }
 0x104   :  { %v1007_v39 = vadd.f32 %v2055_v36, %v2363_v35  ;;  %v598_v40 = vpop.f32.mrb[19].mxu0  ;;  %v1140_v58 = vmul.f32 %v1006_v38, %v1006_v38  ;;  %v723_v3 = vpop.f32.mrb[17].mxu1  ;;  %v2507_v18 = vadd.f32 %v2086_v62, %v2363_v35 }
 0x105   :  { %v1067_v45 = vadd.f32 %v1066_v32, %v1004_v31  ;;  %v1138_v46 = vmul.f32 %v1004_v31, %v1004_v31  ;;  %v1200_v47 = vadd.f32 %v1199_v30, %v1137_v29  ;;  %v1005_v49 = vadd.f32 %v2363_v35, %v598_v40  ;;  %v2087_v12 = vpop.f32.mrb[18].mxu1  ;;  %1985 = vst [vmem:[%s2752_s3 + $0xb0] sm:$0xff] %v1917_v0  }
 0x106   :  { %v1852_v50 = vpack.c.bf16 %v1007_v39, %v1006_v38  ;;  %v1141_v6 = vmul.f32 %v1007_v39, %v1007_v39  ;;  %v2510_v19 = vadd.f32 %v2087_v12, %v2363_v35  ;;  %v726_v21 = vpop.f32.mrb[19].mxu1  ;;  %v2514_v27 = vadd.f32 %v2363_v35, %v723_v3 }
 0x107   :  { %v1201_v52 = vadd.f32 %v1200_v47, %v1138_v46  ;;  %v1068_v53 = vadd.f32 %v1067_v45, %v1005_v49  ;;  %v1139_v54 = vmul.f32 %v1005_v49, %v1005_v49  ;;  %v1847_v55 = vpack.c.bf16 %v1005_v49, %v1004_v31 }
 0x108   :  { %1972 = vst [vmem:[%s2752_s3 + $0x48] sm:$0xff] %v1852_v50   ;;  %v1932_v32 = vpack.c.bf16 %v2510_v19, %v2507_v18  ;;  %v2522_v36 = vadd.f32 %v2363_v35, %v726_v21 }
 0x109   :  { %v1069_v59 = vadd.f32 %v1068_v53, %v1006_v38  ;;  %v1202_v60 = vadd.f32 %v1201_v52, %v1139_v54  ;;  %1971 = vst [vmem:[%s2752_s3 + $0x40] sm:$0xff] %v1847_v55   ;;  %v2058_v61 = vpop.f32.mrb[20].mxu0 }
 0x10a   :  { %v611_v63 = vpop.f32.mrb[21].mxu0  ;;  %v1010_v14 = vadd.f32 %v2058_v61, %v2363_v35  ;;  %1988 = vst [vmem:[%s2752_s3 + $0xc8] sm:$0xff] %v1932_v32   ;;  %v1927_v46 = vpack.c.bf16 %v2522_v36, %v2514_v27 }
 0x10b   :  { %v1203_v7 = vadd.f32 %v1202_v60, %v1140_v58  ;;  %v1008_v8 = vadd.f32 %v2363_v35, %v611_v63  ;;  %v1070_v10 = vadd.f32 %v1069_v59, %v1007_v39  ;;  %v2059_v11 = vpop.f32.mrb[22].mxu0  ;;  %v2090_v44 = vpop.f32.mrb[20].mxu1 }
 0x10c   :  { %v1011_v16 = vadd.f32 %v2059_v11, %v2363_v35  ;;  %v614_v17 = vpop.f32.mrb[23].mxu0  ;;  %v1144_v37 = vmul.f32 %v1010_v14, %v1010_v14  ;;  %v739_v47 = vpop.f32.mrb[21].mxu1  ;;  %1987 = vst [vmem:[%s2752_s3 + $0xc0] sm:$0xff] %v1927_v46   ;;  %v2539_v60 = vadd.f32 %v2090_v44, %v2363_v35 }
 0x10d   :  { %v1071_v22 = vadd.f32 %v1070_v10, %v1008_v8  ;;  %v1142_v23 = vmul.f32 %v1008_v8, %v1008_v8  ;;  %v1204_v24 = vadd.f32 %v1203_v7, %v1141_v6  ;;  %v1009_v25 = vadd.f32 %v2363_v35, %v614_v17  ;;  %v2091_v55 = vpop.f32.mrb[22].mxu1 }
 0x10e   :  { %v1862_v26 = vpack.c.bf16 %v1011_v16, %v1010_v14  ;;  %v1145_v49 = vmul.f32 %v1011_v16, %v1011_v16  ;;  %v2542_v61 = vadd.f32 %v2091_v55, %v2363_v35  ;;  %v742_v62 = vpop.f32.mrb[23].mxu1 }
 0x10f   :  { %v1205_v28 = vadd.f32 %v1204_v24, %v1142_v23  ;;  %v1072_v29 = vadd.f32 %v1071_v22, %v1009_v25  ;;  %v1143_v30 = vmul.f32 %v1009_v25, %v1009_v25  ;;  %v1857_v31 = vpack.c.bf16 %v1009_v25, %v1008_v8 }
 0x110   :  { %1974 = vst [vmem:[%s2752_s3 + $0x58] sm:$0xff] %v1862_v26   ;;  %v2546_v8 = vadd.f32 %v2363_v35, %v739_v47  ;;  %v2554_v17 = vadd.f32 %v2363_v35, %v742_v62 }
 0x111   :  { %v1073_v38 = vadd.f32 %v1072_v29, %v1010_v14  ;;  %v1206_v39 = vadd.f32 %v1205_v28, %v1143_v30  ;;  %1973 = vst [vmem:[%s2752_s3 + $0x50] sm:$0xff] %v1857_v31   ;;  %v2062_v40 = vpop.f32.mrb[24].mxu0 }
 0x112   :  { %v627_v45 = vpop.f32.mrb[25].mxu0  ;;  %v1014_v56 = vadd.f32 %v2062_v40, %v2363_v35  ;;  %v1937_v28 = vpack.c.bf16 %v2554_v17, %v2546_v8 }
 0x113   :  { %v1207_v50 = vadd.f32 %v1206_v39, %v1144_v37  ;;  %v1012_v52 = vadd.f32 %v2363_v35, %v627_v45  ;;  %v1074_v53 = vadd.f32 %v1073_v38, %v1011_v16  ;;  %v2063_v54 = vpop.f32.mrb[26].mxu0  ;;  %v1942_v16 = vpack.c.bf16 %v2542_v61, %v2539_v60  ;;  %v2094_v25 = vpop.f32.mrb[24].mxu1 }
 0x114   :  { %v1015_v58 = vadd.f32 %v2063_v54, %v2363_v35  ;;  %v630_v59 = vpop.f32.mrb[27].mxu0  ;;  %v1148_v21 = vmul.f32 %v1014_v56, %v1014_v56  ;;  %v755_v29 = vpop.f32.mrb[25].mxu1  ;;  %1989 = vst [vmem:[%s2752_s3 + $0xd0] sm:$0xff] %v1937_v28   ;;  %v2571_v46 = vadd.f32 %v2094_v25, %v2363_v35 }
 0x115   :  { %v1075_v63 = vadd.f32 %v1074_v53, %v1012_v52  ;;  %v1146_v0 = vmul.f32 %v1012_v52, %v1012_v52  ;;  %v1208_v3 = vadd.f32 %v1207_v50, %v1145_v49  ;;  %v1013_v6 = vadd.f32 %v2363_v35, %v630_v59  ;;  %1990 = vst [vmem:[%s2752_s3 + $0xd8] sm:$0xff] %v1942_v16   ;;  %v2095_v39 = vpop.f32.mrb[26].mxu1 }
 0x116   :  { %v1872_v7 = vpack.c.bf16 %v1015_v58, %v1014_v56  ;;  %v1149_v30 = vmul.f32 %v1015_v58, %v1015_v58  ;;  %v2574_v47 = vadd.f32 %v2095_v39, %v2363_v35  ;;  %v758_v49 = vpop.f32.mrb[27].mxu1 }
 0x117   :  { %v1209_v10 = vadd.f32 %v1208_v3, %v1146_v0  ;;  %v1076_v11 = vadd.f32 %v1075_v63, %v1013_v6  ;;  %v1147_v12 = vmul.f32 %v1013_v6, %v1013_v6  ;;  %v1867_v14 = vpack.c.bf16 %v1013_v6, %v1012_v52 }
 0x118   :  { %1976 = vst [vmem:[%s2752_s3 + $0x68] sm:$0xff] %v1872_v7   ;;  %v1952_v0 = vpack.c.bf16 %v2574_v47, %v2571_v46  ;;  %v2586_v3 = vadd.f32 %v2363_v35, %v758_v49 }
 0x119   :  { %v1077_v22 = vadd.f32 %v1076_v11, %v1014_v56  ;;  %v1210_v23 = vadd.f32 %v1209_v10, %v1147_v12  ;;  %1975 = vst [vmem:[%s2752_s3 + $0x60] sm:$0xff] %v1867_v14   ;;  %v2066_v24 = vpop.f32.mrb[28].mxu0  ;;  %v2578_v56 = vadd.f32 %v2363_v35, %v755_v29  ;;  %v1154_v12 = vmul.f32 %v2386_v9, %v2386_v9 }
 0x11a   :  { %v643_v26 = vpop.f32.mrb[29].mxu0  ;;  %v1018_v40 = vadd.f32 %v2066_v24, %v2363_v35  ;;  %1992 = vst [vmem:[%s2752_s3 + $0xe8] sm:$0xff] %v1952_v0  }
 0x11b   :  { %v1211_v31 = vadd.f32 %v1210_v23, %v1148_v21  ;;  %v1016_v32 = vadd.f32 %v2363_v35, %v643_v26  ;;  %v1078_v37 = vadd.f32 %v1077_v22, %v1015_v58  ;;  %v2067_v38 = vpop.f32.mrb[30].mxu0  ;;  %v2098_v11 = vpop.f32.mrb[28].mxu1  ;;  %v1947_v14 = vpack.c.bf16 %v2586_v3, %v2578_v56 }
 0x11c   :  { %v1019_v44 = vadd.f32 %v2067_v38, %v2363_v35  ;;  %v646_v45 = vpop.f32.mrb[31].mxu0  ;;  %v1152_v6 = vmul.f32 %v1018_v40, %v1018_v40  ;;  %v2599_v16 = vadd.f32 %v2098_v11, %v2363_v35  ;;  %v771_v21 = vpop.f32.mrb[29].mxu1 }
 0x11d   :  { %v1079_v50 = vadd.f32 %v1078_v37, %v1016_v32  ;;  %v1150_v52 = vmul.f32 %v1016_v32, %v1016_v32  ;;  %v1212_v53 = vadd.f32 %v1211_v31, %v1149_v30  ;;  %v1017_v54 = vadd.f32 %v2363_v35, %v646_v45  ;;  %v2099_v26 = vpop.f32.mrb[30].mxu1  ;;  %1991 = vst [vmem:[%s2752_s3 + $0xe0] sm:$0xff] %v1947_v14  }
 0x11e   :  { %v1882_v55 = vpack.c.bf16 %v1019_v44, %v1018_v40  ;;  %v1153_v22 = vmul.f32 %v1019_v44, %v1019_v44  ;;  %v2602_v25 = vadd.f32 %v2363_v35, %v771_v21  ;;  %v2608_v28 = vadd.f32 %v2099_v26, %v2363_v35  ;;  %v774_v29 = vpop.f32.mrb[31].mxu1 }
 0x11f   :  { %v1213_v58 = vadd.f32 %v1212_v53, %v1150_v52  ;;  %v1080_v59 = vadd.f32 %v1079_v50, %v1017_v54  ;;  %v1151_v62 = vmul.f32 %v1017_v54, %v1017_v54  ;;  %v1877_v63 = vpack.c.bf16 %v1017_v54, %v1016_v32 }
 0x120   :  { %1978 = vst [vmem:[%s2752_s3 + $0x78] sm:$0xff] %v1882_v55   ;;  %v2612_v32 = vadd.f32 %v2363_v35, %v774_v29  ;;  %v1962_v37 = vpack.c.bf16 %v2608_v28, %v2599_v16  ;;  %v1156_v35 = vmul.f32 %v2379_v1, %v2379_v1  ;;  %v1158_v52 = vmul.f32 %v2418_v42, %v2418_v42 }
 0x121   :  { %v1081_v7 = vadd.f32 %v1080_v59, %v1018_v40  ;;  %v1214_v10 = vadd.f32 %v1213_v58, %v1151_v62  ;;  %1977 = vst [vmem:[%s2752_s3 + $0x70] sm:$0xff] %v1877_v63   ;;  %v1155_v40 = vmul.f32 %v2394_v15, %v2394_v15  ;;  %v1159_v58 = vmul.f32 %v2426_v48, %v2426_v48 }
 0x122   :  { %1994 = vst [vmem:[%s2752_s3 + $0xf8] sm:$0xff] %v1962_v37   ;;  %v1160_v59 = vmul.f32 %v2411_v33, %v2411_v33 }
 0x123   :  { %v1215_v23 = vadd.f32 %v1214_v10, %v1152_v6  ;;  %v1082_v24 = vadd.f32 %v1081_v7, %v1019_v44  ;;  %v1957_v44 = vpack.c.bf16 %v2612_v32, %v2602_v25 }
 0x125   :  { %v1083_v30 = vadd.f32 %v1082_v24, %v2386_v9  ;;  %v1216_v31 = vadd.f32 %v1215_v23, %v1153_v22  ;;  %1993 = vst [vmem:[%s2752_s3 + $0xf0] sm:$0xff] %v1957_v44   ;;  %s2191_s3 = smov [#allocation3]  }
 0x126   :  { %s1584_s18 = sshll.u32 %s2191_s3, 4  ;;  %s1585_s18 = int_to_ptr.vmem [resolvable:$true] %s1584_s18 }
 0x127   :  { %v1217_v38 = vadd.f32 %v1216_v31, %v1154_v12  ;;  %v1084_v39 = vadd.f32 %v1083_v30, %v2394_v15  ;;  %v1157_v15 = vmul.f32 %v2382_v2, %v2382_v2  ;;  %v1163_v12 = vmul.f32 %v2458_v20, %v2458_v20  ;;  %s2143_s21 = scalar_lea.vmem %s1585_s18, 16  ;;  %s2147_s22 = scalar_lea.vmem %s1585_s18, 32 }
 0x128   :  { %v1167_v30 = vmul.f32 %v2490_v57, %v2490_v57  ;;  %p2144_p0 = scmp.ne.s32.totalorder %s1585_s18, %s2143_s21  ;;  %p2148_p1 = scmp.lt.s32.totalorder %s1585_s18, %s1585_s18 }
 0x129   :  { %v1085_v9 = vadd.f32 %v1084_v39, %v2379_v1  ;;  %v1218_v45 = vadd.f32 %v1217_v38, %v1155_v40  ;;  %p2149_p2 = scmp.lt.s32.totalorder %s2147_s22, %s2143_s21 }
 0x12b   :  { %v1219_v49 = vadd.f32 %v1218_v45, %v1156_v35  ;;  %v1086_v50 = vadd.f32 %v1085_v9, %v2382_v2  ;;  %v1161_v2 = vmul.f32 %v2414_v34, %v2414_v34  ;;  %v1171_v9 = vmul.f32 %v2522_v36, %v2522_v36  ;;  %p2150_p3 = por %p2149_p2, %p2148_p1 }
 0x12d   :  { %v1087_v53 = vadd.f32 %v1086_v50, %v2418_v42  ;;  %v1220_v54 = vadd.f32 %v1219_v49, %v1157_v15  ;;  %v1162_v42 = vmul.f32 %v2450_v13, %v2450_v13  ;;  %p2151_p4 = pnand %p2150_p3, %p2144_p0 }
 0x12f   :  { %v1221_v55 = vadd.f32 %v1220_v54, %v1158_v52  ;;  %v1088_v1 = vadd.f32 %v1087_v53, %v2426_v48 }
 0x131   :  { %v1089_v62 = vadd.f32 %v1088_v1, %v2411_v33  ;;  %v1222_v63 = vadd.f32 %v1221_v55, %v1159_v58  ;;  %v1164_v33 = vmul.f32 %v2443_v4, %v2443_v4  ;;  %v1175_v55 = vmul.f32 %v2554_v17, %v2554_v17 }
 0x133   :  { %v1223_v0 = vadd.f32 %v1222_v63, %v1160_v59  ;;  %v1090_v6 = vadd.f32 %v1089_v62, %v2414_v34  ;;  %v1165_v34 = vmul.f32 %v2446_v5, %v2446_v5 }
 0x135   :  { %v1091_v7 = vadd.f32 %v1090_v6, %v2450_v13  ;;  %v1224_v10 = vadd.f32 %v1223_v0, %v1161_v2  ;;  %v1166_v13 = vmul.f32 %v2482_v51, %v2482_v51  ;;  %v1179_v6 = vmul.f32 %v2586_v3, %v2586_v3 }
 0x137   :  { %v1225_v11 = vadd.f32 %v1224_v10, %v1162_v42  ;;  %v1092_v48 = vadd.f32 %v1091_v7, %v2458_v20 }
 0x139   :  { %v1093_v14 = vadd.f32 %v1092_v48, %v2443_v4  ;;  %v1226_v21 = vadd.f32 %v1225_v11, %v1163_v12  ;;  %v1168_v4 = vmul.f32 %v2475_v41, %v2475_v41 }
 0x13b   :  { %v1227_v22 = vadd.f32 %v1226_v21, %v1164_v33  ;;  %v1094_v23 = vadd.f32 %v1093_v14, %v2446_v5  ;;  %v1169_v5 = vmul.f32 %v2478_v43, %v2478_v43  ;;  %v1183_v14 = vmul.f32 %v2612_v32, %v2612_v32 }
 0x13d   :  { %v1095_v24 = vadd.f32 %v1094_v23, %v2482_v51  ;;  %v1228_v26 = vadd.f32 %v1227_v22, %v1165_v34  ;;  %v1170_v51 = vmul.f32 %v2514_v27, %v2514_v27 }
 0x13f   :  { %v1229_v29 = vadd.f32 %v1228_v26, %v1166_v13  ;;  %v1096_v20 = vadd.f32 %v1095_v24, %v2490_v57 }
 0x141   :  { %v1097_v31 = vadd.f32 %v1096_v20, %v2475_v41  ;;  %v1230_v37 = vadd.f32 %v1229_v29, %v1167_v30  ;;  %v1172_v41 = vmul.f32 %v2507_v18, %v2507_v18 }
 0x143   :  { %v1231_v38 = vadd.f32 %v1230_v37, %v1168_v4  ;;  %v1098_v39 = vadd.f32 %v1097_v31, %v2478_v43  ;;  %v1173_v43 = vmul.f32 %v2510_v19, %v2510_v19 }
 0x145   :  { %v1099_v40 = vadd.f32 %v1098_v39, %v2514_v27  ;;  %v1232_v44 = vadd.f32 %v1231_v38, %v1169_v5  ;;  %v1174_v27 = vmul.f32 %v2546_v8, %v2546_v8 }
 0x147   :  { %v1233_v35 = vadd.f32 %v1232_v44, %v1170_v51  ;;  %v1100_v57 = vadd.f32 %v1099_v40, %v2522_v36 }
 0x149   :  { %v1101_v45 = vadd.f32 %v1100_v57, %v2507_v18  ;;  %v1234_v15 = vadd.f32 %v1233_v35, %v1171_v9  ;;  %v1176_v18 = vmul.f32 %v2539_v60, %v2539_v60 }
 0x14b   :  { %v1235_v49 = vadd.f32 %v1234_v15, %v1172_v41  ;;  %v1102_v50 = vadd.f32 %v1101_v45, %v2510_v19  ;;  %v1177_v19 = vmul.f32 %v2542_v61, %v2542_v61 }
 0x14d   :  { %v1103_v52 = vadd.f32 %v1102_v50, %v2546_v8  ;;  %v1236_v53 = vadd.f32 %v1235_v49, %v1173_v43  ;;  %v1178_v8 = vmul.f32 %v2578_v56, %v2578_v56 }
 0x14f   :  { %v1237_v54 = vadd.f32 %v1236_v53, %v1174_v27  ;;  %v1104_v36 = vadd.f32 %v1103_v52, %v2554_v17 }
 0x151   :  { %v1105_v1 = vadd.f32 %v1104_v36, %v2539_v60  ;;  %v1238_v58 = vadd.f32 %v1237_v54, %v1175_v55  ;;  %v1180_v60 = vmul.f32 %v2571_v46, %v2571_v46 }
 0x153   :  { %v1239_v59 = vadd.f32 %v1238_v58, %v1176_v18  ;;  %v1106_v62 = vadd.f32 %v1105_v1, %v2542_v61  ;;  %v1181_v61 = vmul.f32 %v2574_v47, %v2574_v47 }
 0x155   :  { %v1107_v63 = vadd.f32 %v1106_v62, %v2578_v56  ;;  %v1240_v2 = vadd.f32 %v1239_v59, %v1177_v19  ;;  %v1182_v56 = vmul.f32 %v2602_v25, %v2602_v25 }
 0x157   :  { %v1241_v0 = vadd.f32 %v1240_v2, %v1178_v8  ;;  %v1108_v17 = vadd.f32 %v1107_v63, %v2586_v3 }
 0x159   :  { %v1109_v42 = vadd.f32 %v1108_v17, %v2571_v46  ;;  %v1242_v7 = vadd.f32 %v1241_v0, %v1179_v6  ;;  %v1184_v46 = vmul.f32 %v2599_v16, %v2599_v16 }
 0x15b   :  { %v1243_v10 = vadd.f32 %v1242_v7, %v1180_v60  ;;  %v1110_v11 = vadd.f32 %v1109_v42, %v2574_v47  ;;  %v1185_v47 = vmul.f32 %v2608_v28, %v2608_v28 }
 0x15d   :  { %v1111_v48 = vadd.f32 %v1110_v11, %v2602_v25  ;;  %v1244_v12 = vadd.f32 %v1243_v10, %v1181_v61 }
 0x15f   :  { %v1245_v33 = vadd.f32 %v1244_v12, %v1182_v56  ;;  %v1112_v3 = vadd.f32 %v1111_v48, %v2612_v32 }
 0x161   :  { %v1113_v21 = vadd.f32 %v1112_v3, %v2599_v16  ;;  %v1246_v34 = vadd.f32 %v1245_v33, %v1183_v14 }
 0x163   :  { %v1247_v22 = vadd.f32 %v1246_v34, %v1184_v46  ;;  %v1114_v23 = vadd.f32 %v1113_v21, %v2608_v28 }
 0x165   :  { %v1115_v25 = vrot.slane %v1114_v23, 4  ;;  %v1248_v13 = vadd.f32 %v1247_v22, %v1185_v47 }
 0x167   :  { %v1116_v24 = vadd.f32 %v1115_v25, %v1114_v23  ;;  %v1249_v26 = vrot.slane %v1248_v13, 4 }
 0x169   :  { %v1117_v29 = vrot.slane %v1116_v24, 2  ;;  %v1250_v20 = vadd.f32 %v1249_v26, %v1248_v13 }
 0x16b   :  { %v1118_v30 = vadd.f32 %v1117_v29, %v1116_v24  ;;  %v1251_v32 = vrot.slane %v1250_v20, 2 }
 0x16d   :  { %v1119_v4 = vrot.slane %v1118_v30, 1  ;;  %v1252_v31 = vadd.f32 %v1251_v32, %v1250_v20 }
 0x16f   :  { %v1120_v16 = vadd.f32 %v1119_v4, %v1118_v30  ;;  %v1253_v37 = vrot.slane %v1252_v31, 1 }
 0x171   :  { %1121 = vst [vmem:[#allocation3] sm:$0x1] %v1120_v16  ;;  %v1254_v5 = vadd.f32 %v1253_v37, %v1252_v31 }
 0x172   :  { %2154 = shalt.err (!%p2151_p4)
}
 0x173   :  { %s2155_s25 = scalar_lea.hbm %s2753_s4, 16 }
 0x174   :  { %p2156_p5 = scmp.ne.s32.totalorder %s2753_s4, %s2155_s25  ;;  %p2159_p6 = scmp.lt.u32.totalorder %s2155_s25, %s2753_s4 }
 0x176   :  { %p2161_p7 = pnand %p2159_p6, %p2156_p5 }
 0x178   :  { %2164 = shalt.err (!%p2161_p7)
}
 0x179   :  { %1587 = dma.vmem_to_hbm [thread:$0]  %s1585_s18, 16, %s2753_s4, [#allocation4]   ;;  %1255 = vst [vmem:[#allocation5] sm:$0x1] %v1254_v5 }
 0x17a   :  { %s2165_s6 = scalar_lea.vmem %s2717_s20, 16  ;;  %s2169_s7 = scalar_lea.vmem %s2717_s20, 32 }
 0x17b   :  { %p2166_p8 = scmp.ne.s32.totalorder %s2717_s20, %s2165_s6  ;;  %p2170_p9 = scmp.lt.s32.totalorder %s2717_s20, %s2717_s20 }
 0x17c   :  { %p2171_p10 = scmp.lt.s32.totalorder %s2169_s7, %s2165_s6 }
 0x17e   :  { %p2172_p11 = por %p2171_p10, %p2170_p9 }
 0x180   :  { %p2173_p12 = pnand %p2172_p11, %p2166_p8 }
 0x182   :  { %2176 = shalt.err (!%p2173_p12)
}
 0x183   :  { %s2177_s10 = scalar_lea.hbm %s2754_s5, 16 }
 0x184   :  { %p2178_p13 = scmp.ne.s32.totalorder %s2754_s5, %s2177_s10  ;;  %p2181_p0 = scmp.lt.u32.totalorder %s2177_s10, %s2754_s5 }
 0x186   :  { %p2183_p1 = pnand %p2181_p0, %p2178_p13 }
 0x188   :  { %2186 = shalt.err (!%p2183_p1)
}
 0x189   :  { %1597 = dma.vmem_to_hbm [thread:$0]  %s2717_s20, 16, %s2754_s5, [#allocation6]  }
 0x18a   :  { %2187 = dma.done.wait [#allocation4], 16  }
 0x18b   :  { %2188 = vsyncadd [#allocation4], 4294967280 }
 0x18c   :  { %2189 = dma.done.wait [#allocation6], 16  }
 0x18d   :  { %2190 = vsyncadd [#allocation6], 4294967280 }
 0x18e   :  { %1606 = vsyncpa [#allocation4], 1 }
 0x18f   :  { %1607 = vsyncpa [#allocation6], 1 }

// kernel: unet_generator_forward.12
= control target key start
LH: loop header
LB: loop body
LE: loop exit
PB: predicated region body
PF: predicated region fallthrough
CT: control target
= control target key end

     0   :  { %s524_s1 = inlined_call_operand.vmem [shape: bf16[256,128], index: 1, kind: input, shape index: {}]   ;;  %s525_s0 = inlined_call_operand.vmem [shape: bf16[32,256], index: 0, kind: input, shape index: {}]   ;;  %s526_s2 = inlined_call_operand.vmem [shape: f32[1,128], index: 2, kind: input, shape index: {}]   ;;  %s527_s3 = inlined_call_operand.vmem [shape: bf16[32,128], index: 3, kind: output, shape index: {0}]   ;;  %s528_s4 = inlined_call_operand.vmem [shape: f32[1,1,128], index: 4, kind: output, shape index: {1}]   ;;  %s529_s5 = inlined_call_operand.vmem [shape: f32[1,1,128], index: 5, kind: output, shape index: {2}]  }
   0x1   :  { %v397_v0 = vld [vmem:[%s524_s1 + $0x40] sm:$0xff]   ;;  %v399_v2 = vld [vmem:[%s524_s1 + $0x48] sm:$0xff]   ;;  %v401_v4 = vld [vmem:[%s524_s1 + $0x50] sm:$0xff]  }
   0x2   :  { %v398_v1 = vld [vmem:[%s524_s1] sm:$0xff]   ;;  %353 = vmatprep.subr.bf16.mxu0 %v397_v0  ;;  %381 = vmatprep.subr.bf16.mxu1 %v397_v0  ;;  %v400_v3 = vld [vmem:[%s524_s1 + $0x8] sm:$0xff]   ;;  %v402_v5 = vld [vmem:[%s524_s1 + $0x10] sm:$0xff]  }
   0x3   :  { %354 = vmatpush3.bf16.msra.mxu0 %v398_v1  ;;  %389 = vmatpush3.bf16.msra.mxu1 %v398_v1  ;;  %v403_v6 = vld [vmem:[%s524_s1 + $0x58] sm:$0xff]   ;;  %v405_v8 = vld [vmem:[%s524_s1 + $0x60] sm:$0xff]   ;;  %v407_v10 = vld [vmem:[%s524_s1 + $0x68] sm:$0xff]  }
   0x4   :  { %355 = vmatprep.subr.bf16.mxu0 %v399_v2  ;;  %382 = vmatprep.subr.bf16.mxu1 %v399_v2  ;;  %v404_v7 = vld [vmem:[%s524_s1 + $0x18] sm:$0xff]   ;;  %v406_v9 = vld [vmem:[%s524_s1 + $0x20] sm:$0xff]   ;;  %v408_v13 = vld [vmem:[%s524_s1 + $0x28] sm:$0xff]  }
   0x5   :  { %v415_v11 = vld [vmem:[%s525_s0 + $0x4] ss:$8 sps:$4 sm:$0xff]   ;;  %v418_v12 = vld [vmem:[%s525_s0 + $0x14] ss:$8 sps:$4 sm:$0xff]   ;;  %v413_v18 = vld [vmem:[%s525_s0] ss:$8 sps:$4 sm:$0xff]  }
   0x6   :  { %v409_v14 = vld [vmem:[%s524_s1 + $0x70] sm:$0xff]   ;;  %214 = vmatprep.mubr.bf16.mxu0 %v415_v11  ;;  %222 = vmatprep.mubr.bf16.mxu1 %v418_v12  ;;  %v411_v16 = vld [vmem:[%s524_s1 + $0x78] sm:$0xff]   ;;  %v333_v23 = vld [vmem:[%s526_s2] ss:$0 sm:$0xff] }
   0x7   :  { %356 = vmatpush3.bf16.msra.mxu0 %v400_v3  ;;  %390 = vmatpush3.bf16.msra.mxu1 %v400_v3  ;;  %v410_v15 = vld [vmem:[%s524_s1 + $0x30] sm:$0xff]   ;;  %v412_v17 = vld [vmem:[%s524_s1 + $0x38] sm:$0xff]  }
   0x8   :  { %357 = vmatprep.subr.bf16.mxu0 %v401_v4  ;;  %383 = vmatprep.subr.bf16.mxu1 %v401_v4  ;;  %v416_v19 = vld [vmem:[%s525_s0 + $0x10] ss:$8 sps:$4 sm:$0xff]  }
   0xb   :  { %358 = vmatpush3.bf16.msra.mxu0 %v402_v5  ;;  %391 = vmatpush3.bf16.msra.mxu1 %v402_v5 }
   0xc   :  { %359 = vmatprep.subr.bf16.mxu0 %v403_v6  ;;  %384 = vmatprep.subr.bf16.mxu1 %v403_v6 }
   0xf   :  { %360 = vmatpush3.bf16.msra.mxu0 %v404_v7  ;;  %392 = vmatpush3.bf16.msra.mxu1 %v404_v7 }
  0x10   :  { %361 = vmatprep.subr.bf16.mxu0 %v405_v8  ;;  %385 = vmatprep.subr.bf16.mxu1 %v405_v8 }
  0x13   :  { %362 = vmatpush3.bf16.msra.mxu0 %v406_v9  ;;  %393 = vmatpush3.bf16.msra.mxu1 %v406_v9 }
  0x14   :  { %363 = vmatprep.subr.bf16.mxu0 %v407_v10  ;;  %386 = vmatprep.subr.bf16.mxu1 %v407_v10 }
  0x17   :  { %364 = vmatpush3.bf16.msra.mxu0 %v408_v13  ;;  %394 = vmatpush3.bf16.msra.mxu1 %v408_v13 }
  0x18   :  { %365 = vmatprep.subr.bf16.mxu0 %v409_v14  ;;  %387 = vmatprep.subr.bf16.mxu1 %v409_v14 }
  0x1b   :  { %366 = vmatpush3.bf16.msra.mxu0 %v410_v15  ;;  %395 = vmatpush3.bf16.msra.mxu1 %v410_v15 }
  0x1c   :  { %367 = vmatprep.subr.bf16.mxu0 %v411_v16  ;;  %388 = vmatprep.subr.bf16.mxu1 %v411_v16 }
  0x1f   :  { %368 = vmatpush3.bf16.msra.mxu0 %v412_v17  ;;  %396 = vmatpush3.bf16.msra.mxu1 %v412_v17 }
  0x22   :  { %215 = vmatmul.mubr.bf16.vlgmr.msra.gmra.mrb[0].mxu0 %v413_v18  ;;  %223 = vmatmul.mubr.bf16.vlgmr.msra.gmra.mrb[0].mxu1 %v416_v19 }
  0xf5   :  { %v369_v20 = vpop.f32.mrb[0].mxu0  ;;  %v375_v21 = vpop.f32.mrb[0].mxu1 }
  0xf6   :  { %v370_v22 = vpop.f32.mrb[1].mxu0  ;;  %v376_v24 = vpop.f32.mrb[1].mxu1 }
  0xf7   :  { %v371_v25 = vadd.f32 %v370_v22, %v369_v20  ;;  %v372_v26 = vpop.f32.mrb[2].mxu0  ;;  %v377_v27 = vadd.f32 %v376_v24, %v375_v21  ;;  %v378_v28 = vpop.f32.mrb[2].mxu1 }
  0xf8   :  { %v373_v29 = vpop.f32.mrb[3].mxu0  ;;  %v379_v30 = vpop.f32.mrb[3].mxu1 }
  0xf9   :  { %v253_v31 = vadd.f32 %v371_v25, %v333_v23  ;;  %v255_v32 = vadd.f32 %v377_v27, %v333_v23  ;;  %v374_v33 = vadd.f32 %v373_v29, %v372_v26  ;;  %v380_v34 = vadd.f32 %v379_v30, %v378_v28 }
  0xfb   :  { %v254_v35 = vadd.f32 %v374_v33, %v333_v23  ;;  %v256_v36 = vadd.f32 %v380_v34, %v333_v23  ;;  %v267_v37 = vmul.f32 %v253_v31, %v253_v31  ;;  %v269_v38 = vmul.f32 %v255_v32, %v255_v32 }
  0xfd   :  { %v257_v39 = vadd.f32 %v254_v35, %v253_v31  ;;  %v268_v40 = vmul.f32 %v254_v35, %v254_v35  ;;  %v345_v41 = vpack.c.bf16 %v254_v35, %v253_v31  ;;  %v350_v42 = vpack.c.bf16 %v256_v36, %v255_v32 }
  0xfe   :  { %v270_v46 = vmul.f32 %v256_v36, %v256_v36 }
  0xff   :  { %v271_v43 = vadd.f32 %v268_v40, %v267_v37  ;;  %346 = vst [vmem:[%s527_s3] sm:$0xff] %v345_v41   ;;  %v258_v44 = vadd.f32 %v257_v39, %v255_v32  ;;  %352 = vst [vmem:[%s527_s3 + $0x8] sm:$0xff] %v350_v42  }
 0x101   :  { %v259_v45 = vadd.f32 %v258_v44, %v256_v36  ;;  %v272_v47 = vadd.f32 %v271_v43, %v269_v38 }
 0x103   :  { %v260_v48 = vrot.slane %v259_v45, 4  ;;  %v273_v49 = vadd.f32 %v272_v47, %v270_v46 }
 0x105   :  { %v261_v50 = vadd.f32 %v260_v48, %v259_v45  ;;  %v274_v51 = vrot.slane %v273_v49, 4 }
 0x107   :  { %v262_v52 = vrot.slane %v261_v50, 2  ;;  %v275_v53 = vadd.f32 %v274_v51, %v273_v49 }
 0x109   :  { %v263_v54 = vadd.f32 %v262_v52, %v261_v50  ;;  %v276_v55 = vrot.slane %v275_v53, 2 }
 0x10b   :  { %v264_v56 = vrot.slane %v263_v54, 1  ;;  %v277_v57 = vadd.f32 %v276_v55, %v275_v53 }
 0x10d   :  { %v265_v58 = vadd.f32 %v264_v56, %v263_v54  ;;  %v278_v59 = vrot.slane %v277_v57, 1 }
 0x10f   :  { %266 = vst [vmem:[%s528_s4] sm:$0x1] %v265_v58  ;;  %v279_v60 = vadd.f32 %v278_v59, %v277_v57 }
 0x111   :  { %280 = vst [vmem:[%s529_s5] sm:$0x1] %v279_v60 }

// kernel: unet_generator_forward.13
= control target key start
LH: loop header
LB: loop body
LE: loop exit
PB: predicated region body
PF: predicated region fallthrough
CT: control target
= control target key end

     0   :  { %s680_s1 = inlined_call_operand.vmem [shape: bf16[512,128], index: 1, kind: input, shape index: {}]   ;;  %s681_s0 = inlined_call_operand.vmem [shape: bf16[8,512], index: 0, kind: input, shape index: {}]   ;;  %s682_s2 = inlined_call_operand.vmem [shape: f32[1,128], index: 2, kind: input, shape index: {}]   ;;  %s683_s3 = inlined_call_operand.vmem [shape: bf16[8,128], index: 3, kind: output, shape index: {0}]   ;;  %s684_s4 = inlined_call_operand.vmem [shape: f32[1,1,128], index: 4, kind: output, shape index: {1}]   ;;  %s685_s5 = inlined_call_operand.vmem [shape: f32[1,1,128], index: 5, kind: output, shape index: {2}]  }
   0x1   :  { %v500_v0 = vld [vmem:[%s680_s1 + $0x40] sm:$0xff]   ;;  %v504_v4 = vld [vmem:[%s680_s1 + $0x48] sm:$0xff]   ;;  %v508_v8 = vld [vmem:[%s680_s1 + $0x50] sm:$0xff]  }
   0x2   :  { %v501_v1 = vld [vmem:[%s680_s1 + $0xc0] sm:$0xff]   ;;  %456 = vmatprep.subr.bf16.mxu0 %v500_v0  ;;  %v505_v5 = vld [vmem:[%s680_s1 + $0xc8] sm:$0xff]   ;;  %v509_v9 = vld [vmem:[%s680_s1 + $0xd0] sm:$0xff]  }
   0x3   :  { %v502_v2 = vld [vmem:[%s680_s1] sm:$0xff]   ;;  %478 = vmatprep.subr.bf16.mxu1 %v501_v1  ;;  %v506_v6 = vld [vmem:[%s680_s1 + $0x8] sm:$0xff]   ;;  %v510_v10 = vld [vmem:[%s680_s1 + $0x10] sm:$0xff]  }
   0x4   :  { %v503_v3 = vld [vmem:[%s680_s1 + $0x80] sm:$0xff]   ;;  %457 = vmatpush3.bf16.msra.mxu0 %v502_v2  ;;  %v507_v7 = vld [vmem:[%s680_s1 + $0x88] sm:$0xff]   ;;  %v511_v11 = vld [vmem:[%s680_s1 + $0x90] sm:$0xff]  }
   0x5   :  { %479 = vmatpush3.bf16.msra.mxu1 %v503_v3  ;;  %458 = vmatprep.subr.bf16.mxu0 %v504_v4  ;;  %v512_v12 = vld [vmem:[%s680_s1 + $0x58] sm:$0xff]   ;;  %v516_v16 = vld [vmem:[%s680_s1 + $0x60] sm:$0xff]   ;;  %v520_v20 = vld [vmem:[%s680_s1 + $0x68] sm:$0xff]  }
   0x6   :  { %480 = vmatprep.subr.bf16.mxu1 %v505_v5  ;;  %v513_v13 = vld [vmem:[%s680_s1 + $0xd8] sm:$0xff]   ;;  %v517_v17 = vld [vmem:[%s680_s1 + $0xe0] sm:$0xff]   ;;  %v521_v21 = vld [vmem:[%s680_s1 + $0xe8] sm:$0xff]  }
   0x7   :  { %v514_v14 = vld [vmem:[%s680_s1 + $0x18] sm:$0xff]   ;;  %v518_v18 = vld [vmem:[%s680_s1 + $0x20] sm:$0xff]   ;;  %v522_v22 = vld [vmem:[%s680_s1 + $0x28] sm:$0xff]  }
   0x8   :  { %459 = vmatpush3.bf16.msra.mxu0 %v506_v6  ;;  %v515_v15 = vld [vmem:[%s680_s1 + $0x98] sm:$0xff]   ;;  %v519_v19 = vld [vmem:[%s680_s1 + $0xa0] sm:$0xff]   ;;  %v523_v23 = vld [vmem:[%s680_s1 + $0xa8] sm:$0xff]  }
   0x9   :  { %481 = vmatpush3.bf16.msra.mxu1 %v507_v7  ;;  %460 = vmatprep.subr.bf16.mxu0 %v508_v8  ;;  %v524_v24 = vld [vmem:[%s680_s1 + $0x70] sm:$0xff]   ;;  %v528_v28 = vld [vmem:[%s680_s1 + $0x78] sm:$0xff]   ;;  %v24_v32 = vld [vmem:[%s681_s0] sm:$0xff] }
   0xa   :  { %482 = vmatprep.subr.bf16.mxu1 %v509_v9  ;;  %v525_v25 = vld [vmem:[%s680_s1 + $0xf0] sm:$0xff]   ;;  %v529_v29 = vld [vmem:[%s680_s1 + $0xf8] sm:$0xff]   ;;  %v25_v33 = vld [vmem:[%s681_s0 + $0x8] sm:$0xff]  ;;  %v419_v34 = vcombine.low %v24_v32, %v24_v32  ;;  %v420_v35 = vcombine.high %v24_v32, %v24_v32 }
   0xb   :  { %v526_v26 = vld [vmem:[%s680_s1 + $0x30] sm:$0xff]   ;;  %v530_v30 = vld [vmem:[%s680_s1 + $0x38] sm:$0xff]   ;;  %v421_v36 = vcombine.low %v25_v33, %v25_v33  ;;  %v422_v37 = vcombine.high %v25_v33, %v25_v33  ;;  %v455_v46 = vld [vmem:[%s682_s2] ss:$0 sm:$0xff] }
   0xc   :  { %461 = vmatpush3.bf16.msra.mxu0 %v510_v10  ;;  %v527_v27 = vld [vmem:[%s680_s1 + $0xb0] sm:$0xff]   ;;  %v531_v31 = vld [vmem:[%s680_s1 + $0xb8] sm:$0xff]   ;;  %328 = vmatprep.mubr.bf16.mxu0 %v420_v35 }
   0xd   :  { %483 = vmatpush3.bf16.msra.mxu1 %v511_v11  ;;  %462 = vmatprep.subr.bf16.mxu0 %v512_v12 }
   0xe   :  { %484 = vmatprep.subr.bf16.mxu1 %v513_v13  ;;  %368 = vmatprep.mubr.bf16.mxu1 %v422_v37 }
  0x10   :  { %463 = vmatpush3.bf16.msra.mxu0 %v514_v14 }
  0x11   :  { %485 = vmatpush3.bf16.msra.mxu1 %v515_v15  ;;  %464 = vmatprep.subr.bf16.mxu0 %v516_v16 }
  0x12   :  { %486 = vmatprep.subr.bf16.mxu1 %v517_v17 }
  0x14   :  { %465 = vmatpush3.bf16.msra.mxu0 %v518_v18 }
  0x15   :  { %487 = vmatpush3.bf16.msra.mxu1 %v519_v19  ;;  %466 = vmatprep.subr.bf16.mxu0 %v520_v20 }
  0x16   :  { %488 = vmatprep.subr.bf16.mxu1 %v521_v21 }
  0x18   :  { %467 = vmatpush3.bf16.msra.mxu0 %v522_v22 }
  0x19   :  { %489 = vmatpush3.bf16.msra.mxu1 %v523_v23  ;;  %468 = vmatprep.subr.bf16.mxu0 %v524_v24 }
  0x1a   :  { %490 = vmatprep.subr.bf16.mxu1 %v525_v25 }
  0x1c   :  { %469 = vmatpush3.bf16.msra.mxu0 %v526_v26 }
  0x1d   :  { %491 = vmatpush3.bf16.msra.mxu1 %v527_v27  ;;  %470 = vmatprep.subr.bf16.mxu0 %v528_v28 }
  0x1e   :  { %492 = vmatprep.subr.bf16.mxu1 %v529_v29 }
  0x20   :  { %471 = vmatpush3.bf16.msra.mxu0 %v530_v30 }
  0x21   :  { %493 = vmatpush3.bf16.msra.mxu1 %v531_v31 }
  0x23   :  { %329 = vmatmul.mubr.bf16.vlgmr.msra.gmra.mrb[0].mxu0 %v419_v34 }
  0x24   :  { %369 = vmatmul.mubr.bf16.vlgmr.msra.gmra.mrb[0].mxu1 %v421_v36 }
  0xf6   :  { %v472_v38 = vpop.f32.mrb[0].mxu0 }
  0xf7   :  { %v494_v39 = vpop.f32.mrb[0].mxu1  ;;  %v473_v40 = vpop.f32.mrb[1].mxu0 }
  0xf8   :  { %v495_v41 = vpop.f32.mrb[1].mxu1  ;;  %v474_v42 = vadd.f32 %v473_v40, %v472_v38  ;;  %v475_v44 = vpop.f32.mrb[2].mxu0 }
  0xf9   :  { %v496_v43 = vadd.f32 %v495_v41, %v494_v39  ;;  %v497_v45 = vpop.f32.mrb[2].mxu1  ;;  %v476_v47 = vpop.f32.mrb[3].mxu0 }
  0xfa   :  { %v498_v48 = vpop.f32.mrb[3].mxu1 }
  0xfb   :  { %v371_v49 = vadd.f32 %v496_v43, %v474_v42 }
  0xfd   :  { %v389_v50 = vadd.f32 %v455_v46, %v371_v49 }
  0xff   :  { %v390_v51 = vrot.slane %v389_v50, 4  ;;  %v397_v52 = vmul.f32 %v389_v50, %v389_v50  ;;  %v405_v53 = vpack.c.bf16 %v389_v50, %v389_v50 }
 0x101   :  { %v391_v54 = vadd.f32 %v390_v51, %v389_v50  ;;  %v398_v55 = vrot.slane %v397_v52, 4  ;;  %406 = vst [vmem:[%s683_s3] sm:$0xf] %v405_v53 }
 0x103   :  { %v392_v56 = vrot.slane %v391_v54, 2  ;;  %v399_v57 = vadd.f32 %v398_v55, %v397_v52 }
 0x105   :  { %v393_v58 = vadd.f32 %v392_v56, %v391_v54  ;;  %v400_v59 = vrot.slane %v399_v57, 2 }
 0x107   :  { %v394_v60 = vrot.slane %v393_v58, 1  ;;  %v401_v61 = vadd.f32 %v400_v59, %v399_v57 }
 0x109   :  { %v395_v62 = vadd.f32 %v394_v60, %v393_v58  ;;  %v402_v63 = vrot.slane %v401_v61, 1 }
 0x10b   :  { %396 = vst [vmem:[%s684_s4] sm:$0x1] %v395_v62  ;;  %v403_v0 = vadd.f32 %v402_v63, %v401_v61 }
 0x10d   :  { %404 = vst [vmem:[%s685_s5] sm:$0x1] %v403_v0 }

// kernel: squeeze.21
= control target key start
LH: loop header
LB: loop body
LE: loop exit
PB: predicated region body
PF: predicated region fallthrough
CT: control target
= control target key end

     0   :  { %vm7_vm0 = vcmask 523264   ;;  %s39_s0 = inlined_call_operand.vmem [shape: f32[256], index: 0, kind: input, shape index: {}]   ;;  %s40_s1 = inlined_call_operand.vmem [shape: f32[4,64], index: 1, kind: output, shape index: {}]  }
   0x1   :  { %v4_v0 = vld [vmem:[%s39_s0] sm:$0x3]  ;;  %s22_s0 = smov 64  }
   0x2   :  { %5 = vst [vmem:[#allocation1] sm:$0x3] %v4_v0 }
   0x9   :  { %v9_v1 = vld [vmem:[#allocation1] sm:$0x3]  }
   0xa   :  { %v6_v2 = vld [vmem:[#allocation1] sm:$0x3]   ;;  %10 = vrot.lane.b32.xlu0 %v9_v1, %s22_s0 }
   0xb   :  { %8 = vst.msk [vmem:[#allocation0] ss:$2 sm:$0x3] %vm7_vm0, %v6_v2  }
  0x7c   :  { %v11_v3 = vpop.permute.xlu0 %10  }
  0x7d   :  { %14 = vst.msk [vmem:[#allocation0 + $0x1] ss:$2 sm:$0x3] %vm7_vm0, %v11_v3  }
  0x84   :  { %v18_v4 = vld [vmem:[#allocation0] sm:$0xf] }
  0x85   :  { %20 = vst [vmem:[%s40_s1] sm:$0xf] %v18_v4 }

// kernel: unet_generator_forward.14
= control target key start
LH: loop header
LB: loop body
LE: loop exit
PB: predicated region body
PF: predicated region fallthrough
CT: control target
= control target key end

     0   :  { %11 = vsyncpa [#allocation4], 0  ;;  %s1350_s0 = inlined_call_operand.vmem [shape: bf16[8,1024], index: 0, kind: input, shape index: {}]   ;;  %s1351_s1 = inlined_call_operand.vmem [shape: bf16[1024,128], index: 1, kind: input, shape index: {}]   ;;  %s1352_s2 = inlined_call_operand.vmem [shape: f32[1,128], index: 2, kind: input, shape index: {}]   ;;  %s1353_s3 = inlined_call_operand.vmem [shape: bf16[8,128], index: 3, kind: output, shape index: {0}]   ;;  %s1354_s4 = inlined_call_operand.hbm [shape: f32[1,1,128], index: 4, kind: output, shape index: {1}]   ;;  %s1355_s5 = inlined_call_operand.hbm [shape: f32[1,1,128], index: 5, kind: output, shape index: {2}]  }
   0x1   :  { %v956_v0 = vld [vmem:[%s1351_s1 + $0x40] sm:$0xff]   ;;  %v960_v4 = vld [vmem:[%s1351_s1 + $0x48] sm:$0xff]   ;;  %v964_v8 = vld [vmem:[%s1351_s1 + $0x50] sm:$0xff]  }
   0x2   :  { %v957_v1 = vld [vmem:[%s1351_s1 + $0xc0] sm:$0xff]   ;;  %866 = vmatprep.subr.bf16.mxu0 %v956_v0  ;;  %v961_v5 = vld [vmem:[%s1351_s1 + $0xc8] sm:$0xff]   ;;  %v965_v9 = vld [vmem:[%s1351_s1 + $0xd0] sm:$0xff]  }
   0x3   :  { %v958_v2 = vld [vmem:[%s1351_s1] sm:$0xff]   ;;  %888 = vmatprep.subr.bf16.mxu1 %v957_v1  ;;  %v962_v6 = vld [vmem:[%s1351_s1 + $0x8] sm:$0xff]   ;;  %v966_v10 = vld [vmem:[%s1351_s1 + $0x10] sm:$0xff]  }
   0x4   :  { %v959_v3 = vld [vmem:[%s1351_s1 + $0x80] sm:$0xff]   ;;  %867 = vmatpush3.bf16.msra.mxu0 %v958_v2  ;;  %v963_v7 = vld [vmem:[%s1351_s1 + $0x88] sm:$0xff]   ;;  %v967_v11 = vld [vmem:[%s1351_s1 + $0x90] sm:$0xff]  }
   0x5   :  { %889 = vmatpush3.bf16.msra.mxu1 %v959_v3  ;;  %868 = vmatprep.subr.bf16.mxu0 %v960_v4  ;;  %v968_v12 = vld [vmem:[%s1351_s1 + $0x58] sm:$0xff]   ;;  %v972_v16 = vld [vmem:[%s1351_s1 + $0x60] sm:$0xff]   ;;  %v976_v20 = vld [vmem:[%s1351_s1 + $0x68] sm:$0xff]  }
   0x6   :  { %890 = vmatprep.subr.bf16.mxu1 %v961_v5  ;;  %v969_v13 = vld [vmem:[%s1351_s1 + $0xd8] sm:$0xff]   ;;  %v973_v17 = vld [vmem:[%s1351_s1 + $0xe0] sm:$0xff]   ;;  %v977_v21 = vld [vmem:[%s1351_s1 + $0xe8] sm:$0xff]  }
   0x7   :  { %v970_v14 = vld [vmem:[%s1351_s1 + $0x18] sm:$0xff]   ;;  %v974_v18 = vld [vmem:[%s1351_s1 + $0x20] sm:$0xff]   ;;  %v978_v22 = vld [vmem:[%s1351_s1 + $0x28] sm:$0xff]  }
   0x8   :  { %869 = vmatpush3.bf16.msra.mxu0 %v962_v6  ;;  %v971_v15 = vld [vmem:[%s1351_s1 + $0x98] sm:$0xff]   ;;  %v975_v19 = vld [vmem:[%s1351_s1 + $0xa0] sm:$0xff]   ;;  %v979_v23 = vld [vmem:[%s1351_s1 + $0xa8] sm:$0xff]  }
   0x9   :  { %891 = vmatpush3.bf16.msra.mxu1 %v963_v7  ;;  %870 = vmatprep.subr.bf16.mxu0 %v964_v8  ;;  %v980_v24 = vld [vmem:[%s1351_s1 + $0x70] sm:$0xff]   ;;  %v984_v28 = vld [vmem:[%s1351_s1 + $0x78] sm:$0xff]   ;;  %v26_v32 = vld [vmem:[%s1350_s0] sm:$0xff] }
   0xa   :  { %892 = vmatprep.subr.bf16.mxu1 %v965_v9  ;;  %v981_v25 = vld [vmem:[%s1351_s1 + $0xf0] sm:$0xff]   ;;  %v985_v29 = vld [vmem:[%s1351_s1 + $0xf8] sm:$0xff]   ;;  %v27_v33 = vld [vmem:[%s1350_s0 + $0x8] sm:$0xff]  ;;  %v793_v34 = vcombine.low %v26_v32, %v26_v32  ;;  %v794_v35 = vcombine.high %v26_v32, %v26_v32 }
   0xb   :  { %v982_v26 = vld [vmem:[%s1351_s1 + $0x30] sm:$0xff]   ;;  %v986_v30 = vld [vmem:[%s1351_s1 + $0x38] sm:$0xff]   ;;  %v795_v36 = vcombine.low %v27_v33, %v27_v33  ;;  %v796_v37 = vcombine.high %v27_v33, %v27_v33  ;;  %v992_v38 = vld [vmem:[%s1351_s1 + $0x140] sm:$0xff]  }
   0xc   :  { %871 = vmatpush3.bf16.msra.mxu0 %v966_v10  ;;  %v983_v27 = vld [vmem:[%s1351_s1 + $0xb0] sm:$0xff]   ;;  %v987_v31 = vld [vmem:[%s1351_s1 + $0xb8] sm:$0xff]   ;;  %v993_v39 = vld [vmem:[%s1351_s1 + $0x1c0] sm:$0xff]   ;;  %602 = vmatprep.mubr.bf16.mxu0 %v794_v35 }
   0xd   :  { %893 = vmatpush3.bf16.msra.mxu1 %v967_v11  ;;  %872 = vmatprep.subr.bf16.mxu0 %v968_v12  ;;  %v994_v40 = vld [vmem:[%s1351_s1 + $0x100] sm:$0xff]   ;;  %v996_v42 = vld [vmem:[%s1351_s1 + $0x148] sm:$0xff]   ;;  %v1000_v46 = vld [vmem:[%s1351_s1 + $0x150] sm:$0xff]  }
   0xe   :  { %894 = vmatprep.subr.bf16.mxu1 %v969_v13  ;;  %642 = vmatprep.mubr.bf16.mxu1 %v796_v37  ;;  %v995_v41 = vld [vmem:[%s1351_s1 + $0x180] sm:$0xff]   ;;  %v997_v43 = vld [vmem:[%s1351_s1 + $0x1c8] sm:$0xff]   ;;  %v1001_v47 = vld [vmem:[%s1351_s1 + $0x1d0] sm:$0xff]  }
   0xf   :  { %v998_v44 = vld [vmem:[%s1351_s1 + $0x108] sm:$0xff]   ;;  %v1002_v48 = vld [vmem:[%s1351_s1 + $0x110] sm:$0xff]   ;;  %v1004_v50 = vld [vmem:[%s1351_s1 + $0x158] sm:$0xff]  }
  0x10   :  { %873 = vmatpush3.bf16.msra.mxu0 %v970_v14  ;;  %v999_v45 = vld [vmem:[%s1351_s1 + $0x188] sm:$0xff]   ;;  %v1003_v49 = vld [vmem:[%s1351_s1 + $0x190] sm:$0xff]   ;;  %v1005_v51 = vld [vmem:[%s1351_s1 + $0x1d8] sm:$0xff]  }
  0x11   :  { %895 = vmatpush3.bf16.msra.mxu1 %v971_v15  ;;  %874 = vmatprep.subr.bf16.mxu0 %v972_v16  ;;  %v1006_v52 = vld [vmem:[%s1351_s1 + $0x118] sm:$0xff]   ;;  %v1008_v54 = vld [vmem:[%s1351_s1 + $0x160] sm:$0xff]   ;;  %v1012_v58 = vld [vmem:[%s1351_s1 + $0x168] sm:$0xff]  }
  0x12   :  { %896 = vmatprep.subr.bf16.mxu1 %v973_v17  ;;  %v1007_v53 = vld [vmem:[%s1351_s1 + $0x198] sm:$0xff]   ;;  %v1009_v55 = vld [vmem:[%s1351_s1 + $0x1e0] sm:$0xff]   ;;  %v1013_v59 = vld [vmem:[%s1351_s1 + $0x1e8] sm:$0xff]  }
  0x13   :  { %v1010_v56 = vld [vmem:[%s1351_s1 + $0x120] sm:$0xff]   ;;  %v1014_v60 = vld [vmem:[%s1351_s1 + $0x128] sm:$0xff]   ;;  %v1016_v62 = vld [vmem:[%s1351_s1 + $0x170] sm:$0xff]  }
  0x14   :  { %875 = vmatpush3.bf16.msra.mxu0 %v974_v18  ;;  %v1011_v57 = vld [vmem:[%s1351_s1 + $0x1a0] sm:$0xff]   ;;  %v1015_v61 = vld [vmem:[%s1351_s1 + $0x1a8] sm:$0xff]   ;;  %v1017_v63 = vld [vmem:[%s1351_s1 + $0x1f0] sm:$0xff]  }
  0x15   :  { %897 = vmatpush3.bf16.msra.mxu1 %v975_v19  ;;  %876 = vmatprep.subr.bf16.mxu0 %v976_v20  ;;  %v1018_v0 = vld [vmem:[%s1351_s1 + $0x130] sm:$0xff]   ;;  %v1020_v2 = vld [vmem:[%s1351_s1 + $0x178] sm:$0xff]  }
  0x16   :  { %898 = vmatprep.subr.bf16.mxu1 %v977_v21  ;;  %v1019_v1 = vld [vmem:[%s1351_s1 + $0x1b0] sm:$0xff]   ;;  %v1021_v3 = vld [vmem:[%s1351_s1 + $0x1f8] sm:$0xff]  }
  0x17   :  { %v1022_v4 = vld [vmem:[%s1351_s1 + $0x138] sm:$0xff]   ;;  %v28_v6 = vld [vmem:[%s1350_s0 + $0x10] sm:$0xff] }
  0x18   :  { %877 = vmatpush3.bf16.msra.mxu0 %v978_v22  ;;  %v1023_v5 = vld [vmem:[%s1351_s1 + $0x1b8] sm:$0xff]   ;;  %v797_v7 = vcombine.low %v28_v6, %v28_v6  ;;  %v798_v8 = vcombine.high %v28_v6, %v28_v6 }
  0x19   :  { %899 = vmatpush3.bf16.msra.mxu1 %v979_v23  ;;  %878 = vmatprep.subr.bf16.mxu0 %v980_v24  ;;  %v29_v9 = vld [vmem:[%s1350_s0 + $0x18] sm:$0xff] }
  0x1a   :  { %900 = vmatprep.subr.bf16.mxu1 %v981_v25 }
  0x1c   :  { %879 = vmatpush3.bf16.msra.mxu0 %v982_v26 }
  0x1d   :  { %901 = vmatpush3.bf16.msra.mxu1 %v983_v27  ;;  %880 = vmatprep.subr.bf16.mxu0 %v984_v28 }
  0x1e   :  { %902 = vmatprep.subr.bf16.mxu1 %v985_v29 }
  0x20   :  { %881 = vmatpush3.bf16.msra.mxu0 %v986_v30 }
  0x21   :  { %903 = vmatpush3.bf16.msra.mxu1 %v987_v31  ;;  %910 = vmatprep.subr.bf16.mxu0 %v992_v38 }
  0x22   :  { %932 = vmatprep.subr.bf16.mxu1 %v993_v39 }
  0x23   :  { %603 = vmatmul.mubr.bf16.vlgmr.msra.gmra.mrb[0].mxu0 %v793_v34 }
  0x24   :  { %643 = vmatmul.mubr.bf16.vlgmr.msra.gmra.mrb[0].mxu1 %v795_v36  ;;  %911 = vmatpush3.bf16.msra.mxu0 %v994_v40 }
  0x25   :  { %933 = vmatpush3.bf16.msra.mxu1 %v995_v41  ;;  %912 = vmatprep.subr.bf16.mxu0 %v996_v42 }
  0x26   :  { %934 = vmatprep.subr.bf16.mxu1 %v997_v43 }
  0x28   :  { %913 = vmatpush3.bf16.msra.mxu0 %v998_v44 }
  0x29   :  { %935 = vmatpush3.bf16.msra.mxu1 %v999_v45  ;;  %914 = vmatprep.subr.bf16.mxu0 %v1000_v46 }
  0x2a   :  { %936 = vmatprep.subr.bf16.mxu1 %v1001_v47 }
  0x2c   :  { %915 = vmatpush3.bf16.msra.mxu0 %v1002_v48 }
  0x2d   :  { %937 = vmatpush3.bf16.msra.mxu1 %v1003_v49  ;;  %916 = vmatprep.subr.bf16.mxu0 %v1004_v50 }
  0x2e   :  { %938 = vmatprep.subr.bf16.mxu1 %v1005_v51 }
  0x30   :  { %917 = vmatpush3.bf16.msra.mxu0 %v1006_v52 }
  0x31   :  { %939 = vmatpush3.bf16.msra.mxu1 %v1007_v53  ;;  %918 = vmatprep.subr.bf16.mxu0 %v1008_v54 }
  0x32   :  { %940 = vmatprep.subr.bf16.mxu1 %v1009_v55 }
  0x34   :  { %919 = vmatpush3.bf16.msra.mxu0 %v1010_v56 }
  0x35   :  { %941 = vmatpush3.bf16.msra.mxu1 %v1011_v57  ;;  %920 = vmatprep.subr.bf16.mxu0 %v1012_v58 }
  0x36   :  { %942 = vmatprep.subr.bf16.mxu1 %v1013_v59 }
  0x38   :  { %921 = vmatpush3.bf16.msra.mxu0 %v1014_v60 }
  0x39   :  { %943 = vmatpush3.bf16.msra.mxu1 %v1015_v61  ;;  %922 = vmatprep.subr.bf16.mxu0 %v1016_v62 }
  0x3a   :  { %944 = vmatprep.subr.bf16.mxu1 %v1017_v63 }
  0x3c   :  { %923 = vmatpush3.bf16.msra.mxu0 %v1018_v0 }
  0x3d   :  { %945 = vmatpush3.bf16.msra.mxu1 %v1019_v1  ;;  %924 = vmatprep.subr.bf16.mxu0 %v1020_v2 }
  0x3e   :  { %946 = vmatprep.subr.bf16.mxu1 %v1021_v3 }
  0x3f   :  { %12 = vsyncpa [#allocation6], 0  ;;  %v799_v10 = vcombine.low %v29_v9, %v29_v9  ;;  %v800_v11 = vcombine.high %v29_v9, %v29_v9  ;;  %682 = vmatprep.mubr.bf16.mxu0 %v798_v8  ;;  %v865_v34 = vld [vmem:[%s1352_s2] ss:$0 sm:$0xff]  ;;  %s1076_s6 = smov [#allocation3]   ;;  %s1077_s2 = smov [#allocation5]  }
  0x40   :  { %925 = vmatpush3.bf16.msra.mxu0 %v1022_v4  ;;  %s769_s7 = sshll.u32 %s1076_s6, 4  ;;  %s779_s8 = sshll.u32 %s1077_s2, 4  ;;  %s770_s7 = int_to_ptr.vmem [resolvable:$true] %s769_s7  ;;  %s1318_s8 = int_to_ptr.vmem [resolvable:$true] %s779_s8 }
  0x41   :  { %947 = vmatpush3.bf16.msra.mxu1 %v1023_v5  ;;  %722 = vmatprep.mubr.bf16.mxu1 %v800_v11  ;;  %s1032_s9 = scalar_lea.vmem %s770_s7, 32  ;;  %p1033_p1 = scmp.lt.s32.totalorder %s770_s7, %s770_s7 }
  0x43   :  { %683 = vmatmul.mubr.bf16.vlgmr.msra.gmra.mrb[4].mxu0 %v797_v7 }
  0x44   :  { %723 = vmatmul.mubr.bf16.vlgmr.msra.gmra.mrb[4].mxu1 %v799_v10 }
  0xf6   :  { %v882_v12 = vpop.f32.mrb[0].mxu0 }
  0xf7   :  { %v904_v13 = vpop.f32.mrb[0].mxu1  ;;  %v883_v14 = vpop.f32.mrb[1].mxu0 }
  0xf8   :  { %v905_v15 = vpop.f32.mrb[1].mxu1  ;;  %v884_v16 = vadd.f32 %v883_v14, %v882_v12  ;;  %v885_v18 = vpop.f32.mrb[2].mxu0 }
  0xf9   :  { %v906_v17 = vadd.f32 %v905_v15, %v904_v13  ;;  %v907_v19 = vpop.f32.mrb[2].mxu1  ;;  %v886_v20 = vpop.f32.mrb[3].mxu0 }
  0xfa   :  { %v908_v21 = vpop.f32.mrb[3].mxu1 }
  0xfb   :  { %v645_v22 = vadd.f32 %v906_v17, %v884_v16 }
 0x116   :  { %v926_v23 = vpop.f32.mrb[4].mxu0 }
 0x117   :  { %v948_v24 = vpop.f32.mrb[4].mxu1  ;;  %v927_v25 = vpop.f32.mrb[5].mxu0 }
 0x118   :  { %v949_v26 = vpop.f32.mrb[5].mxu1  ;;  %v928_v27 = vadd.f32 %v927_v25, %v926_v23  ;;  %v929_v29 = vpop.f32.mrb[6].mxu0 }
 0x119   :  { %v950_v28 = vadd.f32 %v949_v26, %v948_v24  ;;  %v951_v30 = vpop.f32.mrb[6].mxu1  ;;  %v930_v31 = vpop.f32.mrb[7].mxu0 }
 0x11a   :  { %v952_v32 = vpop.f32.mrb[7].mxu1  ;;  %v685_v33 = vadd.f32 %v928_v27, %v645_v22 }
 0x11c   :  { %v725_v35 = vadd.f32 %v950_v28, %v685_v33 }
 0x11e   :  { %v743_v36 = vadd.f32 %v865_v34, %v725_v35 }
 0x120   :  { %v759_v37 = vpack.c.bf16 %v743_v36, %v743_v36  ;;  %v744_v38 = vrot.slane %v743_v36, 4  ;;  %v751_v39 = vmul.f32 %v743_v36, %v743_v36 }
 0x122   :  { %760 = vst [vmem:[%s1353_s3] sm:$0xf] %v759_v37  ;;  %v745_v40 = vadd.f32 %v744_v38, %v743_v36  ;;  %v752_v41 = vrot.slane %v751_v39, 4  ;;  %s1028_s3 = scalar_lea.vmem %s770_s7, 16 }
 0x123   :  { %p1029_p0 = scmp.ne.s32.totalorder %s770_s7, %s1028_s3  ;;  %p1034_p2 = scmp.lt.s32.totalorder %s1032_s9, %s1028_s3 }
 0x124   :  { %v746_v42 = vrot.slane %v745_v40, 2  ;;  %v753_v43 = vadd.f32 %v752_v41, %v751_v39 }
 0x125   :  { %p1035_p3 = por %p1034_p2, %p1033_p1 }
 0x126   :  { %v747_v44 = vadd.f32 %v746_v42, %v745_v40  ;;  %v754_v45 = vrot.slane %v753_v43, 2 }
 0x127   :  { %p1036_p4 = pnand %p1035_p3, %p1029_p0 }
 0x128   :  { %v748_v46 = vrot.slane %v747_v44, 1  ;;  %v755_v47 = vadd.f32 %v754_v45, %v753_v43 }
 0x12a   :  { %v749_v48 = vadd.f32 %v748_v46, %v747_v44  ;;  %v756_v49 = vrot.slane %v755_v47, 1 }
 0x12c   :  { %750 = vst [vmem:[#allocation3] sm:$0x1] %v749_v48  ;;  %v757_v50 = vadd.f32 %v756_v49, %v755_v47 }
 0x12d   :  { %1039 = shalt.err (!%p1036_p4)
}
 0x12e   :  { %s1040_s12 = scalar_lea.hbm %s1354_s4, 16 }
 0x12f   :  { %p1041_p5 = scmp.ne.s32.totalorder %s1354_s4, %s1040_s12  ;;  %p1044_p6 = scmp.lt.u32.totalorder %s1040_s12, %s1354_s4 }
 0x131   :  { %p1046_p7 = pnand %p1044_p6, %p1041_p5 }
 0x133   :  { %1049 = shalt.err (!%p1046_p7)
}
 0x134   :  { %772 = dma.vmem_to_hbm [thread:$0]  %s770_s7, 16, %s1354_s4, [#allocation4]   ;;  %758 = vst [vmem:[#allocation5] sm:$0x1] %v757_v50 }
 0x135   :  { %s1050_s19 = scalar_lea.vmem %s1318_s8, 16  ;;  %s1054_s20 = scalar_lea.vmem %s1318_s8, 32 }
 0x136   :  { %p1051_p8 = scmp.ne.s32.totalorder %s1318_s8, %s1050_s19  ;;  %p1055_p9 = scmp.lt.s32.totalorder %s1318_s8, %s1318_s8 }
 0x137   :  { %p1056_p10 = scmp.lt.s32.totalorder %s1054_s20, %s1050_s19 }
 0x139   :  { %p1057_p11 = por %p1056_p10, %p1055_p9 }
 0x13b   :  { %p1058_p12 = pnand %p1057_p11, %p1051_p8 }
 0x13d   :  { %1061 = shalt.err (!%p1058_p12)
}
 0x13e   :  { %s1062_s23 = scalar_lea.hbm %s1355_s5, 16 }
 0x13f   :  { %p1063_p13 = scmp.ne.s32.totalorder %s1355_s5, %s1062_s23  ;;  %p1066_p0 = scmp.lt.u32.totalorder %s1062_s23, %s1355_s5 }
 0x141   :  { %p1068_p1 = pnand %p1066_p0, %p1063_p13 }
 0x143   :  { %1071 = shalt.err (!%p1068_p1)
}
 0x144   :  { %782 = dma.vmem_to_hbm [thread:$0]  %s1318_s8, 16, %s1355_s5, [#allocation6]  }
 0x145   :  { %1072 = dma.done.wait [#allocation4], 16  }
 0x146   :  { %1073 = vsyncadd [#allocation4], 4294967280 }
 0x147   :  { %1074 = dma.done.wait [#allocation6], 16  }
 0x148   :  { %1075 = vsyncadd [#allocation6], 4294967280 }
 0x149   :  { %791 = vsyncpa [#allocation4], 1 }
 0x14a   :  { %792 = vsyncpa [#allocation6], 1 }

// kernel: squeeze.22
= control target key start
LH: loop header
LB: loop body
LE: loop exit
PB: predicated region body
PF: predicated region fallthrough
CT: control target
= control target key end

     0   :  { %s37_s8 = smov 32   ;;  %vm7_vm0 = vcmask 261120   ;;  %s38_s9 = smov 64   ;;  %s55_s0 = inlined_call_operand.vmem [shape: f32[128], index: 0, kind: input, shape index: {}]   ;;  %s56_s1 = inlined_call_operand.vmem [shape: f32[4,32], index: 1, kind: output, shape index: {}]  }
   0x1   :  { %v4_v0 = vld [vmem:[%s55_s0] sm:$0x1]  ;;  %s36_s0 = smov 96  }
   0x2   :  { %5 = vst [vmem:[#allocation1] sm:$0x1] %v4_v0 }
   0x9   :  { %v9_v1 = vld [vmem:[#allocation1] sm:$0x1]  }
   0xa   :  { %v21_v2 = vld [vmem:[#allocation1] sm:$0x1]   ;;  %10 = vrot.lane.b32.xlu0 %v9_v1, %s36_s0 }
   0xb   :  { %22 = vrot.lane.b32.xlu1 %v21_v2, %s37_s8  ;;  %v6_v3 = vld [vmem:[#allocation1] sm:$0x1]  }
   0xc   :  { %v15_v4 = vld [vmem:[#allocation1] sm:$0x1]   ;;  %8 = vst.msk [vmem:[#allocation0] sm:$0x1] %vm7_vm0, %v6_v3  }
   0xe   :  { %16 = vrot.lane.b32.xlu0 %v15_v4, %s38_s9 }
  0x7c   :  { %v11_v5 = vpop.permute.xlu0 %10  }
  0x7d   :  { %v23_v6 = vpop.permute.xlu1 %22   ;;  %14 = vst.msk [vmem:[#allocation0 + $0x1] sm:$0x1] %vm7_vm0, %v11_v5  }
  0x7e   :  { %26 = vst.msk [vmem:[#allocation0 + $0x3] sm:$0x1] %vm7_vm0, %v23_v6  }
  0x80   :  { %v17_v7 = vpop.permute.xlu0 %16  }
  0x81   :  { %20 = vst.msk [vmem:[#allocation0 + $0x2] sm:$0x1] %vm7_vm0, %v17_v7  }
  0x88   :  { %v30_v8 = vld [vmem:[#allocation0] sm:$0xf] }
  0x89   :  { %32 = vst [vmem:[%s56_s1] sm:$0xf] %v30_v8 }

// kernel: unet_generator_forward.15
= control target key start
LH: loop header
LB: loop body
LE: loop exit
PB: predicated region body
PF: predicated region fallthrough
CT: control target
= control target key end

     0   :  { %vm478_vm0 = vcmask 523264   ;;  %s1181_s1 = inlined_call_operand.vmem [shape: bf16[576,256], index: 1, kind: input, shape index: {}]   ;;  %s1182_s0 = inlined_call_operand.vmem [shape: bf16[8,576], index: 0, kind: input, shape index: {}]   ;;  %s1183_s2 = inlined_call_operand.vmem [shape: f32[1,256], index: 2, kind: input, shape index: {}]   ;;  %s1184_s3 = inlined_call_operand.vmem [shape: bf16[8,256], index: 3, kind: output, shape index: {0}]   ;;  %s1185_s4 = inlined_call_operand.vmem [shape: f32[1,1,256], index: 4, kind: output, shape index: {1}]   ;;  %s1186_s5 = inlined_call_operand.vmem [shape: f32[1,1,256], index: 5, kind: output, shape index: {2}]  }
   0x1   :  { %v799_v0 = vld [vmem:[%s1181_s1 + $0x4] ss:$8 sps:$4 sm:$0xff]   ;;  %v803_v2 = vld [vmem:[%s1181_s1] ss:$8 sps:$4 sm:$0xff]   ;;  %v805_v4 = vld [vmem:[%s1181_s1 + $0x14] ss:$8 sps:$4 sm:$0xff]  }
   0x2   :  { %v801_v1 = vld [vmem:[%s1181_s1 + $0x104] ss:$8 sps:$4 sm:$0xff]   ;;  %482 = vmatprep.subr.bf16.mxu0 %v799_v0  ;;  %v804_v3 = vld [vmem:[%s1181_s1 + $0x100] ss:$8 sps:$4 sm:$0xff]   ;;  %v807_v5 = vld [vmem:[%s1181_s1 + $0x114] ss:$8 sps:$4 sm:$0xff]  }
   0x3   :  { %523 = vmatprep.subr.bf16.mxu1 %v801_v1  ;;  %483 = vmatpush1.bf16.msra.mxu0 %v803_v2  ;;  %v809_v6 = vld [vmem:[%s1181_s1 + $0x10] ss:$8 sps:$4 sm:$0xff]   ;;  %v811_v8 = vld [vmem:[%s1181_s1 + $0x24] ss:$8 sps:$4 sm:$0xff]   ;;  %v815_v10 = vld [vmem:[%s1181_s1 + $0x20] ss:$8 sps:$4 sm:$0xff]  }
   0x4   :  { %524 = vmatpush1.bf16.msra.mxu1 %v804_v3  ;;  %484 = vmatprep.subr.bf16.mxu0 %v805_v4  ;;  %v810_v7 = vld [vmem:[%s1181_s1 + $0x110] ss:$8 sps:$4 sm:$0xff]   ;;  %v813_v9 = vld [vmem:[%s1181_s1 + $0x124] ss:$8 sps:$4 sm:$0xff]   ;;  %v816_v11 = vld [vmem:[%s1181_s1 + $0x120] ss:$8 sps:$4 sm:$0xff]  }
   0x5   :  { %525 = vmatprep.subr.bf16.mxu1 %v807_v5  ;;  %v817_v12 = vld [vmem:[%s1181_s1 + $0x34] ss:$8 sps:$4 sm:$0xff]   ;;  %v821_v14 = vld [vmem:[%s1181_s1 + $0x30] ss:$8 sps:$4 sm:$0xff]   ;;  %v823_v16 = vld [vmem:[%s1181_s1 + $0x44] ss:$8 sps:$4 sm:$0xff]  }
   0x6   :  { %v819_v13 = vld [vmem:[%s1181_s1 + $0x134] ss:$8 sps:$4 sm:$0xff]   ;;  %v822_v15 = vld [vmem:[%s1181_s1 + $0x130] ss:$8 sps:$4 sm:$0xff]   ;;  %v825_v17 = vld [vmem:[%s1181_s1 + $0x144] ss:$8 sps:$4 sm:$0xff]  }
   0x7   :  { %485 = vmatpush1.bf16.msra.mxu0 %v809_v6  ;;  %v827_v18 = vld [vmem:[%s1181_s1 + $0x40] ss:$8 sps:$4 sm:$0xff]   ;;  %v829_v20 = vld [vmem:[%s1181_s1 + $0x54] ss:$8 sps:$4 sm:$0xff]   ;;  %v833_v22 = vld [vmem:[%s1181_s1 + $0x50] ss:$8 sps:$4 sm:$0xff]  }
   0x8   :  { %526 = vmatpush1.bf16.msra.mxu1 %v810_v7  ;;  %486 = vmatprep.subr.bf16.mxu0 %v811_v8  ;;  %v828_v19 = vld [vmem:[%s1181_s1 + $0x140] ss:$8 sps:$4 sm:$0xff]   ;;  %v831_v21 = vld [vmem:[%s1181_s1 + $0x154] ss:$8 sps:$4 sm:$0xff]   ;;  %v834_v23 = vld [vmem:[%s1181_s1 + $0x150] ss:$8 sps:$4 sm:$0xff]  }
   0x9   :  { %527 = vmatprep.subr.bf16.mxu1 %v813_v9  ;;  %v835_v24 = vld [vmem:[%s1181_s1 + $0x64] ss:$8 sps:$4 sm:$0xff]   ;;  %v839_v26 = vld [vmem:[%s1181_s1 + $0x60] ss:$8 sps:$4 sm:$0xff]   ;;  %v841_v28 = vld [vmem:[%s1181_s1 + $0x74] ss:$8 sps:$4 sm:$0xff]  }
   0xa   :  { %v837_v25 = vld [vmem:[%s1181_s1 + $0x164] ss:$8 sps:$4 sm:$0xff]   ;;  %v840_v27 = vld [vmem:[%s1181_s1 + $0x160] ss:$8 sps:$4 sm:$0xff]   ;;  %v843_v29 = vld [vmem:[%s1181_s1 + $0x174] ss:$8 sps:$4 sm:$0xff]  }
   0xb   :  { %487 = vmatpush1.bf16.msra.mxu0 %v815_v10  ;;  %v845_v30 = vld [vmem:[%s1181_s1 + $0x70] ss:$8 sps:$4 sm:$0xff]   ;;  %v847_v32 = vld [vmem:[%s1181_s1 + $0x84] ss:$8 sps:$4 sm:$0xff]   ;;  %v851_v34 = vld [vmem:[%s1181_s1 + $0x80] ss:$8 sps:$4 sm:$0xff]  }
   0xc   :  { %528 = vmatpush1.bf16.msra.mxu1 %v816_v11  ;;  %488 = vmatprep.subr.bf16.mxu0 %v817_v12  ;;  %v846_v31 = vld [vmem:[%s1181_s1 + $0x170] ss:$8 sps:$4 sm:$0xff]   ;;  %v849_v33 = vld [vmem:[%s1181_s1 + $0x184] ss:$8 sps:$4 sm:$0xff]   ;;  %v852_v35 = vld [vmem:[%s1181_s1 + $0x180] ss:$8 sps:$4 sm:$0xff]  }
   0xd   :  { %529 = vmatprep.subr.bf16.mxu1 %v819_v13  ;;  %v853_v36 = vld [vmem:[%s1181_s1 + $0x94] ss:$8 sps:$4 sm:$0xff]   ;;  %v857_v38 = vld [vmem:[%s1181_s1 + $0x90] ss:$8 sps:$4 sm:$0xff]   ;;  %v859_v40 = vld [vmem:[%s1181_s1 + $0xa4] ss:$8 sps:$4 sm:$0xff]  }
   0xe   :  { %v855_v37 = vld [vmem:[%s1181_s1 + $0x194] ss:$8 sps:$4 sm:$0xff]   ;;  %v858_v39 = vld [vmem:[%s1181_s1 + $0x190] ss:$8 sps:$4 sm:$0xff]   ;;  %v861_v41 = vld [vmem:[%s1181_s1 + $0x1a4] ss:$8 sps:$4 sm:$0xff]  }
   0xf   :  { %489 = vmatpush1.bf16.msra.mxu0 %v821_v14  ;;  %v863_v42 = vld [vmem:[%s1181_s1 + $0xa0] ss:$8 sps:$4 sm:$0xff]   ;;  %v865_v44 = vld [vmem:[%s1181_s1 + $0xb4] ss:$8 sps:$4 sm:$0xff]   ;;  %v869_v46 = vld [vmem:[%s1181_s1 + $0xb0] ss:$8 sps:$4 sm:$0xff]  }
  0x10   :  { %530 = vmatpush1.bf16.msra.mxu1 %v822_v15  ;;  %490 = vmatprep.subr.bf16.mxu0 %v823_v16  ;;  %v864_v43 = vld [vmem:[%s1181_s1 + $0x1a0] ss:$8 sps:$4 sm:$0xff]   ;;  %v867_v45 = vld [vmem:[%s1181_s1 + $0x1b4] ss:$8 sps:$4 sm:$0xff]   ;;  %v870_v48 = vld [vmem:[%s1181_s1 + $0x1b0] ss:$8 sps:$4 sm:$0xff]  }
  0x11   :  { %531 = vmatprep.subr.bf16.mxu1 %v825_v17  ;;  %v26_v47 = vld [vmem:[%s1182_s0] sm:$0xff]  ;;  %v27_v50 = vld [vmem:[%s1182_s0 + $0x8] sm:$0xff]  ;;  %v877_v56 = vld [vmem:[%s1181_s1 + $0xd4] ss:$8 sps:$4 sm:$0xff]   ;;  %v912_v10 = vmov 0  }
  0x12   :  { %v718_v49 = vcombine.high %v26_v47, %v26_v47  ;;  %v871_v51 = vld [vmem:[%s1181_s1 + $0xc4] ss:$8 sps:$4 sm:$0xff]   ;;  %v720_v52 = vcombine.high %v27_v50, %v27_v50  ;;  %v875_v54 = vld [vmem:[%s1181_s1 + $0xc0] ss:$8 sps:$4 sm:$0xff]   ;;  %v879_v57 = vld [vmem:[%s1181_s1 + $0x1d4] ss:$8 sps:$4 sm:$0xff]   ;;  %v717_v5 = vcombine.low %v26_v47, %v26_v47  ;;  %v719_v6 = vcombine.low %v27_v50, %v27_v50 }
  0x13   :  { %491 = vmatpush1.bf16.msra.mxu0 %v827_v18  ;;  %v873_v53 = vld [vmem:[%s1181_s1 + $0x1c4] ss:$8 sps:$4 sm:$0xff]   ;;  %v876_v55 = vld [vmem:[%s1181_s1 + $0x1c0] ss:$8 sps:$4 sm:$0xff]   ;;  %v881_v58 = vld [vmem:[%s1181_s1 + $0xd0] ss:$8 sps:$4 sm:$0xff]  }
  0x14   :  { %532 = vmatpush1.bf16.msra.mxu1 %v828_v19  ;;  %492 = vmatprep.subr.bf16.mxu0 %v829_v20  ;;  %v882_v59 = vld [vmem:[%s1181_s1 + $0x1d0] ss:$8 sps:$4 sm:$0xff]   ;;  %v883_v60 = vld [vmem:[%s1181_s1 + $0xe4] ss:$8 sps:$4 sm:$0xff]   ;;  %v887_v62 = vld [vmem:[%s1181_s1 + $0xe0] ss:$8 sps:$4 sm:$0xff]  }
  0x15   :  { %533 = vmatprep.subr.bf16.mxu1 %v831_v21  ;;  %514 = vmatprep.mubr.bf16.mxu0 %v718_v49  ;;  %v885_v61 = vld [vmem:[%s1181_s1 + $0x1e4] ss:$8 sps:$4 sm:$0xff]   ;;  %v888_v63 = vld [vmem:[%s1181_s1 + $0x1e0] ss:$8 sps:$4 sm:$0xff]   ;;  %v889_v0 = vld [vmem:[%s1181_s1 + $0xf4] ss:$8 sps:$4 sm:$0xff]  }
  0x16   :  { %555 = vmatprep.mubr.bf16.mxu1 %v720_v52  ;;  %v891_v1 = vld [vmem:[%s1181_s1 + $0x1f4] ss:$8 sps:$4 sm:$0xff]   ;;  %v893_v2 = vld [vmem:[%s1181_s1 + $0xf0] ss:$8 sps:$4 sm:$0xff]   ;;  %v902_v4 = vld [vmem:[%s1181_s1 + $0x204] ss:$8 sps:$4 sm:$0xff]  }
  0x17   :  { %493 = vmatpush1.bf16.msra.mxu0 %v833_v22  ;;  %v894_v3 = vld [vmem:[%s1181_s1 + $0x1f0] ss:$8 sps:$4 sm:$0xff]   ;;  %v900_v7 = vld [vmem:[%s1181_s1 + $0x200] ss:$8 sps:$4 sm:$0xff]   ;;  %v905_v8 = vld [vmem:[%s1181_s1 + $0x214] ss:$8 sps:$4 sm:$0xff]  }
  0x18   :  { %534 = vmatpush1.bf16.msra.mxu1 %v834_v23  ;;  %494 = vmatprep.subr.bf16.mxu0 %v835_v24  ;;  %v903_v9 = vld [vmem:[%s1181_s1 + $0x210] ss:$8 sps:$4 sm:$0xff]   ;;  %v908_v11 = vld [vmem:[%s1181_s1 + $0x224] ss:$8 sps:$4 sm:$0xff]   ;;  %v906_v12 = vld [vmem:[%s1181_s1 + $0x220] ss:$8 sps:$4 sm:$0xff]  }
  0x19   :  { %535 = vmatprep.subr.bf16.mxu1 %v837_v25  ;;  %v911_v13 = vld [vmem:[%s1181_s1 + $0x234] ss:$8 sps:$4 sm:$0xff]   ;;  %v909_v14 = vld [vmem:[%s1181_s1 + $0x230] ss:$8 sps:$4 sm:$0xff]  }
  0x1a   :  { %v897_v15 = vld [vmem:[%s1182_s0 + $0x10] ss:$0 sps:$4 sm:$0xff]  }
  0x1b   :  { %495 = vmatpush1.bf16.msra.mxu0 %v839_v26  ;;  %v616_v26 = vlaneseq }
  0x1c   :  { %536 = vmatpush1.bf16.msra.mxu1 %v840_v27  ;;  %496 = vmatprep.subr.bf16.mxu0 %v841_v28 }
  0x1d   :  { %537 = vmatprep.subr.bf16.mxu1 %v843_v29  ;;  %v617_v27 = vshrl.u32 %v616_v26, 7  ;;  %v614_v29 = vld [vmem:[%s1183_s2] sm:$0x3]  ;;  %vm660_vm1 = vcmp.lt.s32.totalorder %v616_v26, 256 }
  0x1f   :  { %497 = vmatpush1.bf16.msra.mxu0 %v845_v30  ;;  %v618_v28 = vsub.s32 0, %v617_v27  ;;  %v622_v30 = vsub.s32 1, %v617_v27 }
  0x20   :  { %538 = vmatpush1.bf16.msra.mxu1 %v846_v31  ;;  %498 = vmatprep.subr.bf16.mxu0 %v847_v32 }
  0x21   :  { %539 = vmatprep.subr.bf16.mxu1 %v849_v33  ;;  %v619_v31 = vrot.slane %v614_v29, %v618_v28  ;;  %v623_v33 = vrot.slane %v614_v29, %v622_v30 }
  0x23   :  { %499 = vmatpush1.bf16.msra.mxu0 %v851_v34 }
  0x24   :  { %540 = vmatpush1.bf16.msra.mxu1 %v852_v35  ;;  %500 = vmatprep.subr.bf16.mxu0 %v853_v36 }
  0x25   :  { %541 = vmatprep.subr.bf16.mxu1 %v855_v37 }
  0x27   :  { %501 = vmatpush1.bf16.msra.mxu0 %v857_v38 }
  0x28   :  { %542 = vmatpush1.bf16.msra.mxu1 %v858_v39  ;;  %502 = vmatprep.subr.bf16.mxu0 %v859_v40 }
  0x29   :  { %543 = vmatprep.subr.bf16.mxu1 %v861_v41 }
  0x2b   :  { %503 = vmatpush1.bf16.msra.mxu0 %v863_v42 }
  0x2c   :  { %544 = vmatpush1.bf16.msra.mxu1 %v864_v43  ;;  %504 = vmatprep.subr.bf16.mxu0 %v865_v44 }
  0x2d   :  { %545 = vmatprep.subr.bf16.mxu1 %v867_v45 }
  0x2f   :  { %505 = vmatpush1.bf16.msra.mxu0 %v869_v46 }
  0x30   :  { %546 = vmatpush1.bf16.msra.mxu1 %v870_v48  ;;  %506 = vmatprep.subr.bf16.mxu0 %v871_v51  ;;  %v913_v48 = vmov 1966171168  }
  0x31   :  { %547 = vmatprep.subr.bf16.mxu1 %v873_v53  ;;  %v644_v49 = vunpack.c.l.s4 %v913_v48 }
  0x33   :  { %507 = vmatpush1.bf16.msra.mxu0 %v875_v54 }
  0x34   :  { %548 = vmatpush1.bf16.msra.mxu1 %v876_v55  ;;  %508 = vmatprep.subr.bf16.mxu0 %v877_v56 }
  0x35   :  { %549 = vmatprep.subr.bf16.mxu1 %v879_v57 }
  0x37   :  { %509 = vmatpush1.bf16.msra.mxu0 %v881_v58  ;;  %v645_v58 = vunpack.c.0.s8 %v644_v49 }
  0x38   :  { %550 = vmatpush1.bf16.msra.mxu1 %v882_v59  ;;  %510 = vmatprep.subr.bf16.mxu0 %v883_v60 }
  0x39   :  { %551 = vmatprep.subr.bf16.mxu1 %v885_v61 }
  0x3b   :  { %511 = vmatpush1.bf16.msra.mxu0 %v887_v62 }
  0x3c   :  { %552 = vmatpush1.bf16.msra.mxu1 %v888_v63  ;;  %512 = vmatprep.subr.bf16.mxu0 %v889_v0 }
  0x3d   :  { %553 = vmatprep.subr.bf16.mxu1 %v891_v1 }
  0x3f   :  { %513 = vmatpush1.bf16.msra.mxu0 %v893_v2 }
  0x40   :  { %554 = vmatpush1.bf16.msra.mxu1 %v894_v3  ;;  %564 = vmatprep.subr.bf16.mxu0 %v902_v4  ;;  %v648_v3 = vsub.s32 %v645_v58, %v617_v27 }
  0x42   :  { %515 = vmatmul.mubr.bf16.vlgmr.msra.gmra.mrb[0].mxu0 %v717_v5 }
  0x43   :  { %556 = vmatmul.mubr.bf16.vlgmr.msra.gmra.mrb[0].mxu1 %v719_v6  ;;  %565 = vmatpush1.bf16.msra.mxu0 %v900_v7 }
  0x44   :  { %596 = vmatprep.mubr.bf16.mxu0 %v912_v10  ;;  %566 = vmatprep.subr.bf16.mxu0 %v905_v8 }
  0x47   :  { %567 = vmatpush1.bf16.msra.mxu0 %v903_v9 }
  0x48   :  { %568 = vmatprep.subr.bf16.mxu0 %v908_v11 }
  0x4b   :  { %569 = vmatpush1.bf16.msra.mxu0 %v906_v12 }
  0x4c   :  { %570 = vmatprep.subr.bf16.mxu0 %v911_v13 }
  0x4f   :  { %571 = vmatpush1.bf16.msra.mxu0 %v909_v14 }
  0x52   :  { %794 = vmatmul.mubr.msk.bf16.vlgmr.msra.gmra.mrb[4].mxu0 %vm478_vm0, %v897_v15 }
 0x115   :  { %v516_v16 = vpop.f32.mrb[0].mxu0 }
 0x116   :  { %v557_v17 = vpop.f32.mrb[0].mxu1  ;;  %v518_v19 = vpop.f32.mrb[1].mxu0 }
 0x117   :  { %v558_v18 = vadd.f32 %v557_v17, %v516_v16  ;;  %v559_v20 = vpop.f32.mrb[1].mxu1  ;;  %v520_v22 = vpop.f32.mrb[2].mxu0 }
 0x118   :  { %v560_v21 = vadd.f32 %v559_v20, %v518_v19  ;;  %v561_v23 = vpop.f32.mrb[2].mxu1  ;;  %v521_v24 = vpop.f32.mrb[3].mxu0 }
 0x119   :  { %v562_v25 = vpop.f32.mrb[3].mxu1 }
 0x125   :  { %v598_v32 = vpop.f32.mrb[4].mxu0 }
 0x126   :  { %v599_v34 = vadd.f32 %v598_v32, %v558_v18  ;;  %v600_v35 = vpop.f32.mrb[5].mxu0 }
 0x127   :  { %v601_v36 = vadd.f32 %v600_v35, %v560_v21  ;;  %v602_v37 = vpop.f32.mrb[6].mxu0 }
 0x128   :  { %v626_v38 = vadd.f32 %v619_v31, %v599_v34  ;;  %v603_v39 = vpop.f32.mrb[7].mxu0 }
 0x129   :  { %v627_v40 = vadd.f32 %v623_v33, %v601_v36 }
 0x12a   :  { %v628_v41 = vrot.slane %v626_v38, 4  ;;  %v663_v42 = vmul.f32 %v626_v38, %v626_v38 }
 0x12b   :  { %v634_v43 = vrot.slane %v627_v40, 4  ;;  %v664_v44 = vmul.f32 %v627_v40, %v627_v40  ;;  %v796_v45 = vpack.c.bf16 %v627_v40, %v626_v38 }
 0x12c   :  { %v629_v46 = vadd.f32 %v628_v41, %v626_v38  ;;  %v665_v47 = vrot.slane %v663_v42, 4 }
 0x12d   :  { %v635_v50 = vadd.f32 %v634_v43, %v627_v40  ;;  %v671_v51 = vrot.slane %v664_v44, 4  ;;  %704 = vst [vmem:[%s1184_s3] sm:$0xff] %v796_v45 }
 0x12e   :  { %v630_v52 = vrot.slane %v629_v46, 2  ;;  %v666_v53 = vadd.f32 %v665_v47, %v663_v42 }
 0x12f   :  { %v636_v54 = vrot.slane %v635_v50, 2  ;;  %v672_v55 = vadd.f32 %v671_v51, %v664_v44 }
 0x130   :  { %v631_v56 = vadd.f32 %v630_v52, %v629_v46  ;;  %v667_v57 = vrot.slane %v666_v53, 2 }
 0x131   :  { %v637_v59 = vadd.f32 %v636_v54, %v635_v50  ;;  %v673_v60 = vrot.slane %v672_v55, 2 }
 0x132   :  { %v632_v61 = vrot.slane %v631_v56, 1  ;;  %v668_v62 = vadd.f32 %v667_v57, %v666_v53 }
 0x133   :  { %v638_v63 = vrot.slane %v637_v59, 1  ;;  %v674_v0 = vadd.f32 %v673_v60, %v672_v55 }
 0x134   :  { %v633_v1 = vadd.f32 %v632_v61, %v631_v56  ;;  %v669_v2 = vrot.slane %v668_v62, 1 }
 0x135   :  { %v639_v4 = vadd.f32 %v638_v63, %v637_v59  ;;  %v675_v5 = vrot.slane %v674_v0, 1 }
 0x136   :  { %v670_v6 = vadd.f32 %v669_v2, %v668_v62 }
 0x137   :  { %v642_v7 = vcombine.low %v633_v1, %v639_v4  ;;  %v676_v8 = vadd.f32 %v675_v5, %v674_v0 }
 0x139   :  { %v649_v9 = vrot.slane %v642_v7, %v648_v3  ;;  %v679_v10 = vcombine.low %v670_v6, %v676_v8 }
 0x13b   :  { %v656_v11 = vrot.slane %v649_v9, %v648_v3  ;;  %v686_v12 = vrot.slane %v679_v10, %v648_v3 }
 0x13d   :  { %662 = vst.msk [vmem:[%s1185_s4] sm:$0x3] %vm660_vm1, %v656_v11  ;;  %v693_v13 = vrot.slane %v686_v12, %v648_v3 }
 0x13f   :  { %695 = vst.msk [vmem:[%s1186_s5] sm:$0x3] %vm660_vm1, %v693_v13 }

// kernel: squeeze.24
= control target key start
LH: loop header
LB: loop body
LE: loop exit
PB: predicated region body
PF: predicated region fallthrough
CT: control target
= control target key end

     0   :  { %s37_s8 = smov 80   ;;  %vm7_vm0 = vcmask 130048   ;;  %s38_s9 = smov 96   ;;  %s55_s0 = inlined_call_operand.vmem [shape: f32[64], index: 0, kind: input, shape index: {}]   ;;  %s56_s1 = inlined_call_operand.vmem [shape: f32[4,16], index: 1, kind: output, shape index: {}]  }
   0x1   :  { %v4_v0 = vld [vmem:[%s55_s0] sm:$0x1]  ;;  %s36_s0 = smov 112  }
   0x2   :  { %5 = vst [vmem:[#allocation1] sm:$0x1] %v4_v0 }
   0x9   :  { %v9_v1 = vld [vmem:[#allocation1] sm:$0x1]  }
   0xa   :  { %v21_v2 = vld [vmem:[#allocation1] sm:$0x1]   ;;  %10 = vrot.lane.b32.xlu0 %v9_v1, %s36_s0 }
   0xb   :  { %22 = vrot.lane.b32.xlu1 %v21_v2, %s37_s8  ;;  %v6_v3 = vld [vmem:[#allocation1] sm:$0x1]  }
   0xc   :  { %v15_v4 = vld [vmem:[#allocation1] sm:$0x1]   ;;  %8 = vst.msk [vmem:[#allocation0] sm:$0x1] %vm7_vm0, %v6_v3  }
   0xe   :  { %16 = vrot.lane.b32.xlu0 %v15_v4, %s38_s9 }
  0x7c   :  { %v11_v5 = vpop.permute.xlu0 %10  }
  0x7d   :  { %v23_v6 = vpop.permute.xlu1 %22   ;;  %14 = vst.msk [vmem:[#allocation0 + $0x1] sm:$0x1] %vm7_vm0, %v11_v5  }
  0x7e   :  { %26 = vst.msk [vmem:[#allocation0 + $0x3] sm:$0x1] %vm7_vm0, %v23_v6  }
  0x80   :  { %v17_v7 = vpop.permute.xlu0 %16  }
  0x81   :  { %20 = vst.msk [vmem:[#allocation0 + $0x2] sm:$0x1] %vm7_vm0, %v17_v7  }
  0x88   :  { %v30_v8 = vld [vmem:[#allocation0] sm:$0xf] }
  0x89   :  { %32 = vst [vmem:[%s56_s1] sm:$0xf] %v30_v8 }

// kernel: unet_generator_forward.16
= control target key start
LH: loop header
LB: loop body
LE: loop exit
PB: predicated region body
PF: predicated region fallthrough
CT: control target
= control target key end

     0   :  { %s1043_s18 = smov 0   ;;  %s1045_s19 = smov 0   ;;  %s1124_s0 = inlined_call_operand.vmem [shape: bf16[8,1152], index: 0, kind: input, shape index: {}]   ;;  %s1125_s1 = inlined_call_operand.vmem [shape: bf16[1152,128], index: 1, kind: input, shape index: {}]   ;;  %s1126_s2 = inlined_call_operand.vmem [shape: f32[1,128], index: 2, kind: input, shape index: {}]   ;;  %s1127_s3 = inlined_call_operand.vmem [shape: bf16[8,128], index: 3, kind: output, shape index: {0}]   ;;  %s1128_s4 = inlined_call_operand.vmem [shape: f32[1,1,128], index: 4, kind: output, shape index: {1}]   ;;  %s1129_s5 = inlined_call_operand.vmem [shape: f32[1,1,128], index: 5, kind: output, shape index: {2}]  }
   0x1   :  { %s1047_s20 = smov 0  }
   0x2 LB: > { %s28_s21 = sadd.s32 1, %s1004_s19  ;;  %p843_p0 = scmp.ge.s32.totalorder %s1008_s20, 1  ;;  %s1008_s20 = sphi %s1047_s20, %s16_s20   ;;  %s1004_s19 = sphi %s1045_s19, %s1131_s19   ;;  %s1000_s18 = sphi %s1043_s18, %s1130_s18  }
   0x3   : > { %p29_p1 = scmp.ge.s32.totalorder %s28_s21, 3  ;;  %p248_p2 = scmp.lt.s32.totalorder %s1008_s20, 4 }
   0x5   : > { %s1133_s21 = smov (%p29_p1, %s28_s21), 0  ;;  %p249_p3 = pnand %p843_p0, %p248_p2 }
   0x6   : > { %s305_s22 = smul.u32 (!%p249_p3), 3, %s1000_s18  ;;  %p846_p6 = scmp.ne.s32.totalorder (!%p249_p3), %s1000_s18, 0 }
   0x7   : > { %252 = sbr.rel (%p249_p3) target bundleno = 301 (0x12d), region = 32 }
   0x8   : > { %s315_s23 = smul.u32 (!%p249_p3), 48, %s1000_s18  ;;  %p308_p4 = scmp.lt.s32.totalorder (!%p249_p3), %s305_s22, 8 }
   0xa   : > { %p316_p5 = scmp.lt.s32.totalorder (!%p249_p3), %s315_s23, 143 }
   0xe   : > { %s1135_s22 = smov (!%p308_p4, %s305_s22), 8  ;;  %s1137_s23 = smov (!%p316_p5, %s315_s23), 143 }
   0xf   : > { %s844_s24 = sshll.u32 %s1135_s22, 2  ;;  %s845_s28 = sshll.u32 %s1137_s23, 2  ;;  %v1010_v0 = vmov (!%p846_p6), 0.0  }
  0x10   : > { %s1068_s27 = scalar_lea.vmem %s1124_s0, %s844_s24  ;;  %s1073_s6 = scalar_lea.vmem %s1125_s1, %s845_s28  ;;  %351 = vst [vmem:[#allocation2] sm:$0xff] (!%p846_p6), %v1010_v0 }
  0x11   : > { %350 = sbr.rel (%p846_p6) target bundleno = 24 (0x18), region = 36 }
  0x18 PF: > { %v959_v1 = vld [vmem:[%s1073_s6 + $0x40] sm:$0xff]   ;;  %v1011_v2 = vmov 0.0   ;;  %vm1012_vm0 = vmmov 0   ;;  %v962_v5 = vld [vmem:[%s1073_s6 + $0x48] sm:$0xff]   ;;  %v965_v8 = vld [vmem:[%s1073_s6 + $0x50] sm:$0xff]   ;;  %p874_p7 = scmp.ne.s32.totalorder %s1000_s18, 2 }
  0x19   : > { %912 = vmatprep.subr.bf16.mxu1 %v1011_v2  ;;  %v960_v3 = vld [vmem:[%s1073_s6] sm:$0xff]   ;;  %881 = vmatprep.subr.bf16.mxu0 %v959_v1  ;;  %v963_v6 = vld [vmem:[%s1073_s6 + $0x8] sm:$0xff]   ;;  %v966_v9 = vld [vmem:[%s1073_s6 + $0x10] sm:$0xff]  }
  0x1a   : > { %v961_v4 = vld [vmem:[%s1073_s6 + $0x80] sm:$0xff]   ;;  %928 = vmatprep.mubr.msk.bf16.mxu1 %vm1012_vm0, %v1011_v2  ;;  %882 = vmatpush3.bf16.msra.mxu0 %v960_v3  ;;  %v964_v7 = vld [vmem:[%s1073_s6 + $0x88] sm:$0xff]   ;;  %v967_v10 = vld [vmem:[%s1073_s6 + $0x90] sm:$0xff]  }
  0x1b   : > { %913 = vmatpush3.bf16.msra.mxu1 %v961_v4  ;;  %883 = vmatprep.subr.bf16.mxu0 %v962_v5  ;;  %v968_v11 = vld [vmem:[%s1073_s6 + $0x58] sm:$0xff]   ;;  %v971_v14 = vld [vmem:[%s1073_s6 + $0x60] sm:$0xff]   ;;  %v974_v17 = vld [vmem:[%s1073_s6 + $0x68] sm:$0xff]  }
  0x1c   : > { %914 = vmatprep.subr.bf16.mxu1 %v1011_v2  ;;  %v969_v12 = vld [vmem:[%s1073_s6 + $0x18] sm:$0xff]   ;;  %v972_v15 = vld [vmem:[%s1073_s6 + $0x20] sm:$0xff]   ;;  %v975_v18 = vld [vmem:[%s1073_s6 + $0x28] sm:$0xff]  }
  0x1d   : > { %v970_v13 = vld [vmem:[%s1073_s6 + $0x98] sm:$0xff]   ;;  %v973_v16 = vld [vmem:[%s1073_s6 + $0xa0] sm:$0xff]   ;;  %v976_v19 = vld [vmem:[%s1073_s6 + $0xa8] sm:$0xff]  }
  0x1e   : > { %884 = vmatpush3.bf16.msra.mxu0 %v963_v6  ;;  %v977_v20 = vld [vmem:[%s1073_s6 + $0x70] sm:$0xff]   ;;  %v980_v23 = vld [vmem:[%s1073_s6 + $0x78] sm:$0xff]   ;;  %v353_v24 = vld [vmem:[%s1068_s27] sm:$0xff] }
  0x1f   : > { %915 = vmatpush3.bf16.msra.mxu1 %v964_v7  ;;  %885 = vmatprep.subr.bf16.mxu0 %v965_v8  ;;  %v978_v21 = vld [vmem:[%s1073_s6 + $0x30] sm:$0xff]   ;;  %v848_v25 = vcombine.high %v353_v24, %v353_v24  ;;  %v981_v26 = vld [vmem:[%s1073_s6 + $0x38] sm:$0xff]   ;;  %v847_v28 = vcombine.low %v353_v24, %v353_v24  ;;  %v985_v29 = vld [vmem:[%s1068_s27 + $0x8] ss:$0 sps:$4 sm:$0xff]  }
  0x20   : > { %916 = vmatprep.subr.bf16.mxu1 %v1011_v2  ;;  %v979_v22 = vld [vmem:[%s1073_s6 + $0xb0] sm:$0xff]   ;;  %v982_v27 = vld [vmem:[%s1073_s6 + $0xb8] sm:$0xff]   ;;  %v352_v36 = vld [vmem:[#allocation2] sm:$0xff] }
  0x21   : > { %590 = vmatprep.mubr.bf16.mxu0 %v848_v25  ;;  %v875_v43 = vld [vmem:[%s1126_s2] ss:$0 sm:$0xff] (!%p874_p7) }
  0x22   : > { %886 = vmatpush3.bf16.msra.mxu0 %v966_v9 }
  0x23   : > { %917 = vmatpush3.bf16.msra.mxu1 %v967_v10  ;;  %887 = vmatprep.subr.bf16.mxu0 %v968_v11 }
  0x24   : > { %918 = vmatprep.subr.bf16.mxu1 %v1011_v2 }
  0x26   : > { %888 = vmatpush3.bf16.msra.mxu0 %v969_v12 }
  0x27   : > { %919 = vmatpush3.bf16.msra.mxu1 %v970_v13  ;;  %889 = vmatprep.subr.bf16.mxu0 %v971_v14 }
  0x28   : > { %920 = vmatprep.subr.bf16.mxu1 %v1011_v2 }
  0x2a   : > { %890 = vmatpush3.bf16.msra.mxu0 %v972_v15 }
  0x2b   : > { %921 = vmatpush3.bf16.msra.mxu1 %v973_v16  ;;  %891 = vmatprep.subr.bf16.mxu0 %v974_v17 }
  0x2c   : > { %922 = vmatprep.subr.bf16.mxu1 %v1011_v2 }
  0x2e   : > { %892 = vmatpush3.bf16.msra.mxu0 %v975_v18 }
  0x2f   : > { %923 = vmatpush3.bf16.msra.mxu1 %v976_v19  ;;  %893 = vmatprep.subr.bf16.mxu0 %v977_v20 }
  0x30   : > { %924 = vmatprep.subr.bf16.mxu1 %v1011_v2 }
  0x32   : > { %894 = vmatpush3.bf16.msra.mxu0 %v978_v21 }
  0x33   : > { %925 = vmatpush3.bf16.msra.mxu1 %v979_v22  ;;  %895 = vmatprep.subr.bf16.mxu0 %v980_v23 }
  0x34   : > { %926 = vmatprep.subr.bf16.mxu1 %v1011_v2 }
  0x36   : > { %896 = vmatpush3.bf16.msra.mxu0 %v981_v26 }
  0x37   : > { %927 = vmatpush3.bf16.msra.mxu1 %v982_v27 }
  0x39   : > { %591 = vmatmul.mubr.bf16.vlgmr.msra.gmra.mrb[0].mxu0 %v847_v28 }
  0x3a   : > { %929 = vmatmul.mubr.bf16.vlgmr.msra.gmra.mrb[0].mxu1 %v985_v29 }
 0x10c   : > { %v897_v30 = vpop.f32.mrb[0].mxu0 }
 0x10d   : > { %v632_v31 = vpop.f32.mrb[0].mxu1  ;;  %v898_v32 = vpop.f32.mrb[1].mxu0 }
 0x10e   : > { %v899_v33 = vadd.f32 %v898_v32, %v897_v30  ;;  %v930_v34 = vpop.f32.mrb[1].mxu1  ;;  %v900_v35 = vpop.f32.mrb[2].mxu0  ;;  %643 = sbr.rel (%p874_p7) target bundleno = 301 (0x12d), region = 40 }
 0x10f   : > { %v635_v37 = vpop.f32.mrb[2].mxu1  ;;  %v901_v38 = vpop.f32.mrb[3].mxu0 }
 0x110   : > { %v633_v39 = vadd.f32 %v899_v33, %v632_v31  ;;  %v931_v40 = vpop.f32.mrb[3].mxu1 }
 0x112   : > { %v638_v41 = vadd.f32 %v633_v39, %v352_v36 }
 0x114   : > { %639 = vst [vmem:[#allocation2] sm:$0xff] %v638_v41 }
 0x11b   : > { %v644_v42 = vld [vmem:[#allocation2] sm:$0xff] }
 0x11c   : > { %v652_v44 = vadd.f32 %v875_v43, %v644_v42 }
 0x11e   : > { %v653_v45 = vrot.slane %v652_v44, 4  ;;  %v660_v46 = vmul.f32 %v652_v44, %v652_v44  ;;  %v668_v47 = vpack.c.bf16 %v652_v44, %v652_v44 }
 0x120   : > { %v654_v48 = vadd.f32 %v653_v45, %v652_v44  ;;  %v661_v49 = vrot.slane %v660_v46, 4  ;;  %669 = vst [vmem:[%s1127_s3] sm:$0xf] %v668_v47 }
 0x122   : > { %v655_v50 = vrot.slane %v654_v48, 2  ;;  %v662_v51 = vadd.f32 %v661_v49, %v660_v46 }
 0x124   : > { %v656_v52 = vadd.f32 %v655_v50, %v654_v48  ;;  %v663_v53 = vrot.slane %v662_v51, 2 }
 0x126   : > { %v657_v54 = vrot.slane %v656_v52, 1  ;;  %v664_v55 = vadd.f32 %v663_v53, %v662_v51 }
 0x128   : > { %v658_v56 = vadd.f32 %v657_v54, %v656_v52  ;;  %v665_v57 = vrot.slane %v664_v55, 1 }
 0x12a   : > { %659 = vst [vmem:[%s1128_s4] sm:$0x1] %v658_v56  ;;  %v666_v58 = vadd.f32 %v665_v57, %v664_v55 }
 0x12c   : > { %667 = vst [vmem:[%s1129_s5] sm:$0x1] %v666_v58 }
 0x12d PF: > { %s16_s20 = sadd.s32 1, %s1008_s20   ;;  %s1130_s18 = smov %s1004_s19 }
 0x12e   : > { %p13_p8 = scmp.ge.s32.totalorder %s16_s20, 5   ;;  %s1131_s19 = smov %s1133_s21 }
 0x130   :  { %15 = sbr.rel (!%p13_p8) target bundleno = 2 (0x2), region = 100 }

// kernel: squeeze.26
= control target key start
LH: loop header
LB: loop body
LE: loop exit
PB: predicated region body
PF: predicated region fallthrough
CT: control target
= control target key end

     0   :  { %s37_s8 = smov 104   ;;  %vm7_vm0 = vcmask 64512   ;;  %s38_s9 = smov 112   ;;  %s55_s0 = inlined_call_operand.vmem [shape: f32[32], index: 0, kind: input, shape index: {}]   ;;  %s56_s1 = inlined_call_operand.vmem [shape: f32[4,8], index: 1, kind: output, shape index: {}]  }
   0x1   :  { %v4_v0 = vld [vmem:[%s55_s0] sm:$0x1]  ;;  %s36_s0 = smov 120  }
   0x2   :  { %5 = vst [vmem:[#allocation1] sm:$0x1] %v4_v0 }
   0x9   :  { %v9_v1 = vld [vmem:[#allocation1] sm:$0x1]  }
   0xa   :  { %v21_v2 = vld [vmem:[#allocation1] sm:$0x1]   ;;  %10 = vrot.lane.b32.xlu0 %v9_v1, %s36_s0 }
   0xb   :  { %22 = vrot.lane.b32.xlu1 %v21_v2, %s37_s8  ;;  %v6_v3 = vld [vmem:[#allocation1] sm:$0x1]  }
   0xc   :  { %v15_v4 = vld [vmem:[#allocation1] sm:$0x1]   ;;  %8 = vst.msk [vmem:[#allocation0] sm:$0x1] %vm7_vm0, %v6_v3  }
   0xe   :  { %16 = vrot.lane.b32.xlu0 %v15_v4, %s38_s9 }
  0x7c   :  { %v11_v5 = vpop.permute.xlu0 %10  }
  0x7d   :  { %v23_v6 = vpop.permute.xlu1 %22   ;;  %14 = vst.msk [vmem:[#allocation0 + $0x1] sm:$0x1] %vm7_vm0, %v11_v5  }
  0x7e   :  { %26 = vst.msk [vmem:[#allocation0 + $0x3] sm:$0x1] %vm7_vm0, %v23_v6  }
  0x80   :  { %v17_v7 = vpop.permute.xlu0 %16  }
  0x81   :  { %20 = vst.msk [vmem:[#allocation0 + $0x2] sm:$0x1] %vm7_vm0, %v17_v7  }
  0x88   :  { %v30_v8 = vld [vmem:[#allocation0] sm:$0xf] }
  0x89   :  { %32 = vst [vmem:[%s56_s1] sm:$0xf] %v30_v8 }

// kernel: unet_generator_forward.17
= control target key start
LH: loop header
LB: loop body
LE: loop exit
PB: predicated region body
PF: predicated region fallthrough
CT: control target
= control target key end

     0   :  { %vm380_vm0 = vcmask 523264   ;;  %s991_s1 = inlined_call_operand.vmem [shape: bf16[576,128], index: 1, kind: input, shape index: {}]   ;;  %s992_s0 = inlined_call_operand.vmem [shape: bf16[32,576], index: 0, kind: input, shape index: {}]   ;;  %s993_s2 = inlined_call_operand.vmem [shape: f32[1,128], index: 2, kind: input, shape index: {}]   ;;  %s994_s3 = inlined_call_operand.vmem [shape: bf16[32,128], index: 3, kind: output, shape index: {0}]   ;;  %s995_s4 = inlined_call_operand.vmem [shape: f32[1,1,128], index: 4, kind: output, shape index: {1}]   ;;  %s996_s5 = inlined_call_operand.vmem [shape: f32[1,1,128], index: 5, kind: output, shape index: {2}]  }
   0x1   :  { %v758_v0 = vld [vmem:[%s991_s1 + $0x40] sm:$0xff]   ;;  %v762_v4 = vld [vmem:[%s991_s1 + $0x48] sm:$0xff]   ;;  %v766_v8 = vld [vmem:[%s991_s1 + $0x50] sm:$0xff]  }
   0x2   :  { %v759_v1 = vld [vmem:[%s991_s1 + $0xc0] sm:$0xff]   ;;  %684 = vmatprep.subr.bf16.mxu0 %v758_v0  ;;  %v763_v5 = vld [vmem:[%s991_s1 + $0xc8] sm:$0xff]   ;;  %v767_v9 = vld [vmem:[%s991_s1 + $0xd0] sm:$0xff]  }
   0x3   :  { %v760_v2 = vld [vmem:[%s991_s1] sm:$0xff]   ;;  %712 = vmatprep.subr.bf16.mxu1 %v759_v1  ;;  %v764_v6 = vld [vmem:[%s991_s1 + $0x8] sm:$0xff]   ;;  %v768_v10 = vld [vmem:[%s991_s1 + $0x10] sm:$0xff]  }
   0x4   :  { %v761_v3 = vld [vmem:[%s991_s1 + $0x80] sm:$0xff]   ;;  %685 = vmatpush3.bf16.msra.mxu0 %v760_v2  ;;  %v765_v7 = vld [vmem:[%s991_s1 + $0x88] sm:$0xff]   ;;  %v769_v11 = vld [vmem:[%s991_s1 + $0x90] sm:$0xff]  }
   0x5   :  { %713 = vmatpush3.bf16.msra.mxu1 %v761_v3  ;;  %686 = vmatprep.subr.bf16.mxu0 %v762_v4  ;;  %v770_v12 = vld [vmem:[%s991_s1 + $0x58] sm:$0xff]   ;;  %v774_v16 = vld [vmem:[%s991_s1 + $0x60] sm:$0xff]   ;;  %v778_v20 = vld [vmem:[%s991_s1 + $0x68] sm:$0xff]  }
   0x6   :  { %714 = vmatprep.subr.bf16.mxu1 %v763_v5  ;;  %v771_v13 = vld [vmem:[%s991_s1 + $0xd8] sm:$0xff]   ;;  %v775_v17 = vld [vmem:[%s991_s1 + $0xe0] sm:$0xff]   ;;  %v779_v21 = vld [vmem:[%s991_s1 + $0xe8] sm:$0xff]  }
   0x7   :  { %v772_v14 = vld [vmem:[%s991_s1 + $0x18] sm:$0xff]   ;;  %v776_v18 = vld [vmem:[%s991_s1 + $0x20] sm:$0xff]   ;;  %v780_v22 = vld [vmem:[%s991_s1 + $0x28] sm:$0xff]  }
   0x8   :  { %687 = vmatpush3.bf16.msra.mxu0 %v764_v6  ;;  %v773_v15 = vld [vmem:[%s991_s1 + $0x98] sm:$0xff]   ;;  %v777_v19 = vld [vmem:[%s991_s1 + $0xa0] sm:$0xff]   ;;  %v781_v23 = vld [vmem:[%s991_s1 + $0xa8] sm:$0xff]  }
   0x9   :  { %715 = vmatpush3.bf16.msra.mxu1 %v765_v7  ;;  %688 = vmatprep.subr.bf16.mxu0 %v766_v8  ;;  %v782_v24 = vld [vmem:[%s991_s1 + $0x70] sm:$0xff]   ;;  %v786_v28 = vld [vmem:[%s991_s1 + $0x78] sm:$0xff]   ;;  %v795_v35 = vld [vmem:[%s992_s0 + $0xc] ss:$20 sps:$4 sm:$0xff]  }
   0xa   :  { %716 = vmatprep.subr.bf16.mxu1 %v767_v9  ;;  %v783_v25 = vld [vmem:[%s991_s1 + $0xf0] sm:$0xff]   ;;  %v787_v29 = vld [vmem:[%s991_s1 + $0xf8] sm:$0xff]   ;;  %v796_v36 = vld [vmem:[%s991_s1 + $0x100] sm:$0xff]   ;;  %468 = vmatprep.mubr.bf16.mxu1 %v795_v35 }
   0xb   :  { %v784_v26 = vld [vmem:[%s991_s1 + $0x30] sm:$0xff]   ;;  %v788_v30 = vld [vmem:[%s991_s1 + $0x38] sm:$0xff]   ;;  %v797_v37 = vld [vmem:[%s991_s1 + $0x108] sm:$0xff]  }
   0xc   :  { %689 = vmatpush3.bf16.msra.mxu0 %v768_v10  ;;  %v785_v27 = vld [vmem:[%s991_s1 + $0xb0] sm:$0xff]   ;;  %v789_v31 = vld [vmem:[%s991_s1 + $0xb8] sm:$0xff]   ;;  %v798_v38 = vld [vmem:[%s992_s0 + $0x2c] ss:$20 sps:$4 sm:$0xff]  }
   0xd   :  { %717 = vmatpush3.bf16.msra.mxu1 %v769_v11  ;;  %690 = vmatprep.subr.bf16.mxu0 %v770_v12  ;;  %v790_v32 = vld [vmem:[%s992_s0] ss:$20 sps:$4 sm:$0xff]   ;;  %v792_v33 = vld [vmem:[%s992_s0 + $0x4] ss:$20 sps:$4 sm:$0xff]   ;;  %v793_v34 = vld [vmem:[%s992_s0 + $0x8] ss:$20 sps:$4 sm:$0xff]  }
   0xe   :  { %718 = vmatprep.subr.bf16.mxu1 %v771_v13  ;;  %419 = vmatprep.mubr.bf16.mxu0 %v792_v33  ;;  %v800_v39 = vld [vmem:[%s992_s0 + $0x34] ss:$20 sps:$4 sm:$0xff]   ;;  %v803_v42 = vld [vmem:[%s992_s0 + $0x30] ss:$20 sps:$4 sm:$0xff]   ;;  %v805_v44 = vld [vmem:[%s991_s1 + $0x118] sm:$0xff]  }
   0xf   :  { %v802_v40 = vld [vmem:[%s992_s0 + $0x28] ss:$20 sps:$4 sm:$0xff]   ;;  %v804_v41 = vld [vmem:[%s991_s1 + $0x110] sm:$0xff]   ;;  %v807_v45 = vld [vmem:[%s992_s0 + $0x38] ss:$20 sps:$4 sm:$0xff]  }
  0x10   :  { %691 = vmatpush3.bf16.msra.mxu0 %v772_v14  ;;  %v806_v43 = vld [vmem:[%s992_s0 + $0x10] ss:$20 sps:$4 sm:$0xff]   ;;  %v664_v12 = vld [vmem:[%s993_s2] ss:$0 sm:$0xff] }
  0x11   :  { %719 = vmatpush3.bf16.msra.mxu1 %v773_v15  ;;  %692 = vmatprep.subr.bf16.mxu0 %v774_v16 }
  0x12   :  { %720 = vmatprep.subr.bf16.mxu1 %v775_v17 }
  0x14   :  { %693 = vmatpush3.bf16.msra.mxu0 %v776_v18 }
  0x15   :  { %721 = vmatpush3.bf16.msra.mxu1 %v777_v19  ;;  %694 = vmatprep.subr.bf16.mxu0 %v778_v20 }
  0x16   :  { %722 = vmatprep.subr.bf16.mxu1 %v779_v21 }
  0x18   :  { %695 = vmatpush3.bf16.msra.mxu0 %v780_v22 }
  0x19   :  { %723 = vmatpush3.bf16.msra.mxu1 %v781_v23  ;;  %696 = vmatprep.subr.bf16.mxu0 %v782_v24 }
  0x1a   :  { %724 = vmatprep.subr.bf16.mxu1 %v783_v25 }
  0x1c   :  { %697 = vmatpush3.bf16.msra.mxu0 %v784_v26 }
  0x1d   :  { %725 = vmatpush3.bf16.msra.mxu1 %v785_v27  ;;  %698 = vmatprep.subr.bf16.mxu0 %v786_v28 }
  0x1e   :  { %726 = vmatprep.subr.bf16.mxu1 %v787_v29 }
  0x20   :  { %699 = vmatpush3.bf16.msra.mxu0 %v788_v30 }
  0x21   :  { %727 = vmatpush3.bf16.msra.mxu1 %v789_v31  ;;  %746 = vmatprep.subr.bf16.mxu0 %v796_v36 }
  0x23   :  { %420 = vmatmul.mubr.bf16.vlgmr.msra.gmra.mrb[0].mxu0 %v790_v32 }
  0x24   :  { %469 = vmatmul.mubr.bf16.vlgmr.msra.gmra.mrb[0].mxu1 %v793_v34  ;;  %747 = vmatpush3.bf16.msra.mxu0 %v796_v36 }
  0x25   :  { %748 = vmatprep.subr.bf16.mxu0 %v797_v37  ;;  %427 = vmatprep.mubr.bf16.mxu0 %v798_v38 }
  0x26   :  { %476 = vmatprep.mubr.bf16.mxu1 %v800_v39 }
  0x28   :  { %749 = vmatpush3.bf16.msra.mxu0 %v797_v37 }
  0x29   :  { %750 = vmatprep.subr.bf16.mxu0 %v804_v41 }
  0x2b   :  { %428 = vmatmul.mubr.bf16.gmra.mrb[4].mxu0 %v802_v40 }
  0x2c   :  { %477 = vmatmul.mubr.bf16.gmra.mrb[4].mxu1 %v803_v42  ;;  %754 = vmatprep.mubr.msk.bf16.mxu0 %vm380_vm0, %v806_v43 }
  0x2d   :  { %751 = vmatpush3.bf16.msra.mxu0 %v804_v41 }
  0x2e   :  { %752 = vmatprep.subr.bf16.mxu0 %v805_v44 }
  0x31   :  { %753 = vmatpush3.bf16.msra.mxu0 %v805_v44 }
  0x34   :  { %755 = vmatmul.mubr.msk.bf16.vlgmr.msra.gmra.mrb[8].mxu0 %vm380_vm0, %v807_v45 }
  0xf6   :  { %v700_v46 = vpop.f32.mrb[0].mxu0 }
  0xf7   :  { %v728_v47 = vpop.f32.mrb[0].mxu1  ;;  %v701_v48 = vpop.f32.mrb[1].mxu0 }
  0xf8   :  { %v702_v49 = vadd.f32 %v701_v48, %v700_v46  ;;  %v729_v50 = vpop.f32.mrb[1].mxu1  ;;  %v703_v51 = vpop.f32.mrb[2].mxu0 }
  0xf9   :  { %v730_v52 = vadd.f32 %v729_v50, %v728_v47  ;;  %v731_v53 = vpop.f32.mrb[2].mxu1  ;;  %v704_v54 = vpop.f32.mrb[3].mxu0 }
  0xfa   :  { %v705_v55 = vadd.f32 %v704_v54, %v703_v51  ;;  %v732_v56 = vpop.f32.mrb[3].mxu1 }
  0xfb   :  { %v733_v57 = vadd.f32 %v732_v56, %v731_v53  ;;  %v471_v58 = vadd.f32 %v730_v52, %v702_v49 }
  0xfd   :  { %v474_v59 = vadd.f32 %v733_v57, %v705_v55 }
  0xfe   :  { %v706_v60 = vpop.f32.mrb[4].mxu0 }
  0xff   :  { %v734_v61 = vpop.f32.mrb[4].mxu1  ;;  %v707_v62 = vpop.f32.mrb[5].mxu0 }
 0x100   :  { %v708_v63 = vadd.f32 %v707_v62, %v706_v60  ;;  %v735_v0 = vpop.f32.mrb[5].mxu1  ;;  %v709_v1 = vpop.f32.mrb[6].mxu0 }
 0x101   :  { %v736_v2 = vadd.f32 %v735_v0, %v734_v61  ;;  %v737_v3 = vpop.f32.mrb[6].mxu1  ;;  %v710_v4 = vpop.f32.mrb[7].mxu0 }
 0x102   :  { %v711_v5 = vadd.f32 %v710_v4, %v709_v1  ;;  %v738_v6 = vpop.f32.mrb[7].mxu1 }
 0x103   :  { %v739_v7 = vadd.f32 %v738_v6, %v737_v3  ;;  %v479_v8 = vadd.f32 %v736_v2, %v708_v63 }
 0x105   :  { %v482_v9 = vadd.f32 %v739_v7, %v711_v5 }
 0x107   :  { %v756_v10 = vpop.f32.mrb[8].mxu0 }
 0x108   :  { %v528_v11 = vadd.f32 %v756_v10, %v479_v8  ;;  %v519_v13 = vpop.f32.mrb[9].mxu0 }
 0x109   :  { %v520_v14 = vadd.f32 %v519_v13, %v471_v58  ;;  %v757_v15 = vpop.f32.mrb[10].mxu0 }
 0x10a   :  { %v531_v16 = vadd.f32 %v757_v15, %v482_v9  ;;  %v522_v17 = vpop.f32.mrb[11].mxu0  ;;  %v558_v20 = vadd.f32 %v664_v12, %v528_v11 }
 0x10b   :  { %v556_v18 = vadd.f32 %v664_v12, %v520_v14  ;;  %v523_v19 = vadd.f32 %v522_v17, %v474_v59 }
 0x10c   :  { %v559_v21 = vadd.f32 %v664_v12, %v531_v16  ;;  %v572_v28 = vmul.f32 %v558_v20, %v558_v20 }
 0x10d   :  { %v557_v22 = vadd.f32 %v664_v12, %v523_v19  ;;  %v570_v24 = vmul.f32 %v556_v18, %v556_v18 }
 0x10e   :  { %v681_v23 = vpack.c.bf16 %v559_v21, %v558_v20  ;;  %v573_v31 = vmul.f32 %v559_v21, %v559_v21 }
 0x10f   :  { %v560_v25 = vadd.f32 %v557_v22, %v556_v18  ;;  %v571_v26 = vmul.f32 %v557_v22, %v557_v22  ;;  %v676_v27 = vpack.c.bf16 %v557_v22, %v556_v18 }
 0x110   :  { %683 = vst [vmem:[%s994_s3 + $0x8] sm:$0xff] %v681_v23  }
 0x111   :  { %v561_v29 = vadd.f32 %v560_v25, %v558_v20  ;;  %v574_v30 = vadd.f32 %v571_v26, %v570_v24  ;;  %677 = vst [vmem:[%s994_s3] sm:$0xff] %v676_v27  }
 0x113   :  { %v562_v32 = vadd.f32 %v561_v29, %v559_v21  ;;  %v575_v33 = vadd.f32 %v574_v30, %v572_v28 }
 0x115   :  { %v563_v34 = vrot.slane %v562_v32, 4  ;;  %v576_v35 = vadd.f32 %v575_v33, %v573_v31 }
 0x117   :  { %v564_v36 = vadd.f32 %v563_v34, %v562_v32  ;;  %v577_v37 = vrot.slane %v576_v35, 4 }
 0x119   :  { %v565_v38 = vrot.slane %v564_v36, 2  ;;  %v578_v39 = vadd.f32 %v577_v37, %v576_v35 }
 0x11b   :  { %v566_v40 = vadd.f32 %v565_v38, %v564_v36  ;;  %v579_v41 = vrot.slane %v578_v39, 2 }
 0x11d   :  { %v567_v42 = vrot.slane %v566_v40, 1  ;;  %v580_v43 = vadd.f32 %v579_v41, %v578_v39 }
 0x11f   :  { %v568_v44 = vadd.f32 %v567_v42, %v566_v40  ;;  %v581_v45 = vrot.slane %v580_v43, 1 }
 0x121   :  { %569 = vst [vmem:[%s995_s4] sm:$0x1] %v568_v44  ;;  %v582_v46 = vadd.f32 %v581_v45, %v580_v43 }
 0x123   :  { %583 = vst [vmem:[%s996_s5] sm:$0x1] %v582_v46 }

// kernel: unet_generator_forward.18
= control target key start
LH: loop header
LB: loop body
LE: loop exit
PB: predicated region body
PF: predicated region fallthrough
CT: control target
= control target key end

     0   :  { %vm350_vm0 = vcmask 261120   ;;  %s1312_s1 = inlined_call_operand.vmem [shape: bf16[288,128], index: 1, kind: input, shape index: {}]   ;;  %s1313_s0 = inlined_call_operand.vmem [shape: bf16[128,288], index: 0, kind: input, shape index: {}]   ;;  %s1314_s2 = inlined_call_operand.vmem [shape: f32[1,128], index: 2, kind: input, shape index: {}]   ;;  %s1315_s3 = inlined_call_operand.vmem [shape: bf16[128,128], index: 3, kind: output, shape index: {0}]   ;;  %s1316_s4 = inlined_call_operand.vmem [shape: f32[1,1,128], index: 4, kind: output, shape index: {1}]   ;;  %s1317_s5 = inlined_call_operand.vmem [shape: f32[1,1,128], index: 5, kind: output, shape index: {2}]  }
   0x1   :  { %v1035_v0 = vld [vmem:[%s1312_s1 + $0x40] sm:$0xff]   ;;  %v1037_v2 = vld [vmem:[%s1312_s1 + $0x48] sm:$0xff]   ;;  %v1039_v4 = vld [vmem:[%s1312_s1 + $0x50] sm:$0xff]  }
   0x2   :  { %v1036_v1 = vld [vmem:[%s1312_s1] sm:$0xff]   ;;  %925 = vmatprep.subr.bf16.mxu0 %v1035_v0  ;;  %1019 = vmatprep.subr.bf16.mxu1 %v1035_v0  ;;  %v1038_v3 = vld [vmem:[%s1312_s1 + $0x8] sm:$0xff]   ;;  %v1040_v5 = vld [vmem:[%s1312_s1 + $0x10] sm:$0xff]  }
   0x3   :  { %926 = vmatpush3.bf16.msra.mxu0 %v1036_v1  ;;  %1027 = vmatpush3.bf16.msra.mxu1 %v1036_v1  ;;  %v1041_v6 = vld [vmem:[%s1312_s1 + $0x58] sm:$0xff]   ;;  %v1043_v8 = vld [vmem:[%s1312_s1 + $0x60] sm:$0xff]   ;;  %v1045_v10 = vld [vmem:[%s1312_s1 + $0x68] sm:$0xff]  }
   0x4   :  { %927 = vmatprep.subr.bf16.mxu0 %v1037_v2  ;;  %1020 = vmatprep.subr.bf16.mxu1 %v1037_v2  ;;  %v1042_v7 = vld [vmem:[%s1312_s1 + $0x18] sm:$0xff]   ;;  %v1044_v9 = vld [vmem:[%s1312_s1 + $0x20] sm:$0xff]   ;;  %v1046_v13 = vld [vmem:[%s1312_s1 + $0x28] sm:$0xff]  }
   0x5   :  { %v1053_v11 = vld [vmem:[%s1313_s0 + $0x4] ss:$12 sps:$4 sm:$0xff]   ;;  %v1056_v12 = vld [vmem:[%s1313_s0 + $0x94] ss:$12 sps:$4 sm:$0xff]   ;;  %v1049_v16 = vld [vmem:[%s1312_s1 + $0x78] sm:$0xff]  }
   0x6   :  { %v1047_v14 = vld [vmem:[%s1312_s1 + $0x70] sm:$0xff]   ;;  %407 = vmatprep.mubr.bf16.mxu0 %v1053_v11  ;;  %455 = vmatprep.mubr.bf16.mxu1 %v1056_v12  ;;  %v1050_v17 = vld [vmem:[%s1312_s1 + $0x38] sm:$0xff]   ;;  %v1051_v18 = vld [vmem:[%s1313_s0] ss:$12 sps:$4 sm:$0xff]  }
   0x7   :  { %928 = vmatpush3.bf16.msra.mxu0 %v1038_v3  ;;  %1028 = vmatpush3.bf16.msra.mxu1 %v1038_v3  ;;  %v1048_v15 = vld [vmem:[%s1312_s1 + $0x30] sm:$0xff]   ;;  %v1057_v19 = vld [vmem:[%s1312_s1 + $0x80] sm:$0xff]   ;;  %v1058_v21 = vld [vmem:[%s1313_s0 + $0x1c] ss:$12 sps:$4 sm:$0xff]  }
   0x8   :  { %929 = vmatprep.subr.bf16.mxu0 %v1039_v4  ;;  %1021 = vmatprep.subr.bf16.mxu1 %v1039_v4  ;;  %v1054_v20 = vld [vmem:[%s1313_s0 + $0x90] ss:$12 sps:$4 sm:$0xff]   ;;  %v1060_v22 = vld [vmem:[%s1313_s0 + $0xac] ss:$12 sps:$4 sm:$0xff]   ;;  %v1063_v25 = vld [vmem:[%s1313_s0 + $0xa8] ss:$12 sps:$4 sm:$0xff]  }
   0x9   :  { %v1064_v23 = vld [vmem:[%s1312_s1 + $0x88] sm:$0xff]   ;;  %v1062_v24 = vld [vmem:[%s1313_s0 + $0x18] ss:$12 sps:$4 sm:$0xff]   ;;  %v1065_v26 = vld [vmem:[%s1313_s0 + $0x34] ss:$12 sps:$4 sm:$0xff]  }
   0xa   :  { %v1067_v27 = vld [vmem:[%s1313_s0 + $0x8] ss:$12 sps:$4 sm:$0xff]   ;;  %v1068_v28 = vld [vmem:[%s1313_s0 + $0x30] ss:$12 sps:$4 sm:$0xff]   ;;  %v1069_v29 = vld [vmem:[%s1313_s0 + $0x20] ss:$12 sps:$4 sm:$0xff]  }
   0xb   :  { %930 = vmatpush3.bf16.msra.mxu0 %v1040_v5  ;;  %1029 = vmatpush3.bf16.msra.mxu1 %v1040_v5  ;;  %v1070_v30 = vld [vmem:[%s1313_s0 + $0x4c] ss:$12 sps:$4 sm:$0xff]   ;;  %v1073_v32 = vld [vmem:[%s1313_s0 + $0x48] ss:$12 sps:$4 sm:$0xff]   ;;  %v1074_v33 = vld [vmem:[%s1313_s0 + $0x50] ss:$12 sps:$4 sm:$0xff]  }
   0xc   :  { %931 = vmatprep.subr.bf16.mxu0 %v1041_v6  ;;  %1022 = vmatprep.subr.bf16.mxu1 %v1041_v6  ;;  %v1072_v31 = vld [vmem:[%s1313_s0 + $0x38] ss:$12 sps:$4 sm:$0xff]   ;;  %v1077_v35 = vld [vmem:[%s1313_s0 + $0x68] ss:$12 sps:$4 sm:$0xff]   ;;  %v1078_v36 = vld [vmem:[%s1313_s0 + $0x60] ss:$12 sps:$4 sm:$0xff]  }
   0xd   :  { %v1075_v34 = vld [vmem:[%s1313_s0 + $0x64] ss:$12 sps:$4 sm:$0xff]   ;;  %v1079_v37 = vld [vmem:[%s1313_s0 + $0x80] ss:$12 sps:$4 sm:$0xff]   ;;  %v1080_v38 = vld [vmem:[%s1313_s0 + $0x7c] ss:$12 sps:$4 sm:$0xff]  }
   0xe   :  { %v1082_v39 = vld [vmem:[%s1313_s0 + $0x98] ss:$12 sps:$4 sm:$0xff]   ;;  %v1084_v41 = vld [vmem:[%s1313_s0 + $0xb0] ss:$12 sps:$4 sm:$0xff]   ;;  %v1260_v5 = vld [vmem:[%s1314_s2] ss:$0 sm:$0xff] }
   0xf   :  { %932 = vmatpush3.bf16.msra.mxu0 %v1042_v7  ;;  %1030 = vmatpush3.bf16.msra.mxu1 %v1042_v7  ;;  %v1083_v40 = vld [vmem:[%s1313_s0 + $0x78] ss:$12 sps:$4 sm:$0xff]  }
  0x10   :  { %933 = vmatprep.subr.bf16.mxu0 %v1043_v8  ;;  %1023 = vmatprep.subr.bf16.mxu1 %v1043_v8 }
  0x13   :  { %934 = vmatpush3.bf16.msra.mxu0 %v1044_v9  ;;  %1031 = vmatpush3.bf16.msra.mxu1 %v1044_v9 }
  0x14   :  { %935 = vmatprep.subr.bf16.mxu0 %v1045_v10  ;;  %1024 = vmatprep.subr.bf16.mxu1 %v1045_v10 }
  0x17   :  { %936 = vmatpush3.bf16.msra.mxu0 %v1046_v13  ;;  %1032 = vmatpush3.bf16.msra.mxu1 %v1046_v13 }
  0x18   :  { %937 = vmatprep.subr.bf16.mxu0 %v1047_v14  ;;  %1025 = vmatprep.subr.bf16.mxu1 %v1047_v14 }
  0x1b   :  { %938 = vmatpush3.bf16.msra.mxu0 %v1048_v15  ;;  %1033 = vmatpush3.bf16.msra.mxu1 %v1048_v15 }
  0x1c   :  { %939 = vmatprep.subr.bf16.mxu0 %v1049_v16  ;;  %1026 = vmatprep.subr.bf16.mxu1 %v1049_v16 }
  0x1f   :  { %940 = vmatpush3.bf16.msra.mxu0 %v1050_v17  ;;  %1034 = vmatpush3.bf16.msra.mxu1 %v1050_v17 }
  0x20   :  { %999 = vmatprep.subr.bf16.mxu1 %v1057_v19 }
  0x22   :  { %408 = vmatmul.mubr.bf16.vlgmr.msra.gmra.mrb[0].mxu0 %v1051_v18  ;;  %456 = vmatmul.mubr.bf16.vlgmr.msra.gmra.mrb[0].mxu1 %v1054_v20 }
  0x23   :  { %1000 = vmatpush3.bf16.msra.mxu1 %v1057_v19  ;;  %415 = vmatprep.mubr.bf16.mxu0 %v1058_v21 }
  0x24   :  { %463 = vmatprep.mubr.bf16.mxu1 %v1060_v22  ;;  %1001 = vmatprep.subr.bf16.mxu1 %v1064_v23 }
  0x27   :  { %1002 = vmatpush3.bf16.msra.mxu1 %v1064_v23 }
  0x2a   :  { %416 = vmatmul.mubr.bf16.gmra.mrb[4].mxu0 %v1062_v24  ;;  %464 = vmatmul.mubr.bf16.gmra.mrb[4].mxu1 %v1063_v25 }
  0x2b   :  { %423 = vmatprep.mubr.bf16.mxu0 %v1065_v26  ;;  %1003 = vmatprep.mubr.msk.bf16.mxu1 %vm350_vm0, %v1067_v27 }
  0x32   :  { %424 = vmatmul.mubr.bf16.gmra.mrb[8].mxu0 %v1068_v28  ;;  %1004 = vmatmul.mubr.msk.bf16.vlgmr.msra.gmra.mrb[8].mxu1 %vm350_vm0, %v1069_v29 }
  0x33   :  { %431 = vmatprep.mubr.bf16.mxu0 %v1070_v30  ;;  %1007 = vmatprep.mubr.msk.bf16.mxu1 %vm350_vm0, %v1072_v31 }
  0x3a   :  { %432 = vmatmul.mubr.bf16.gmra.mrb[12].mxu0 %v1073_v32  ;;  %1008 = vmatmul.mubr.msk.bf16.gmra.mrb[12].mxu1 %vm350_vm0, %v1074_v33 }
  0x3b   :  { %439 = vmatprep.mubr.bf16.mxu0 %v1075_v34  ;;  %1011 = vmatprep.mubr.msk.bf16.mxu1 %vm350_vm0, %v1077_v35 }
  0x42   :  { %440 = vmatmul.mubr.bf16.gmra.mrb[16].mxu0 %v1078_v36  ;;  %1012 = vmatmul.mubr.msk.bf16.gmra.mrb[16].mxu1 %vm350_vm0, %v1079_v37 }
  0x43   :  { %447 = vmatprep.mubr.bf16.mxu0 %v1080_v38  ;;  %1015 = vmatprep.mubr.msk.bf16.mxu1 %vm350_vm0, %v1082_v39 }
  0x4a   :  { %448 = vmatmul.mubr.bf16.gmra.mrb[20].mxu0 %v1083_v40  ;;  %1016 = vmatmul.mubr.msk.bf16.gmra.mrb[20].mxu1 %vm350_vm0, %v1084_v41 }
  0xf5   :  { %v941_v42 = vpop.f32.mrb[0].mxu0  ;;  %v977_v43 = vpop.f32.mrb[0].mxu1 }
  0xf6   :  { %v942_v44 = vpop.f32.mrb[1].mxu0  ;;  %v978_v45 = vpop.f32.mrb[1].mxu1 }
  0xf7   :  { %v943_v46 = vadd.f32 %v942_v44, %v941_v42  ;;  %v944_v47 = vpop.f32.mrb[2].mxu0  ;;  %v1249_v48 = vadd.f32 %v978_v45, %v977_v43  ;;  %v980_v49 = vpop.f32.mrb[2].mxu1 }
  0xf8   :  { %v945_v50 = vpop.f32.mrb[3].mxu0  ;;  %v981_v51 = vpop.f32.mrb[3].mxu1 }
  0xf9   :  { %v946_v52 = vadd.f32 %v945_v50, %v944_v47  ;;  %v1251_v53 = vadd.f32 %v981_v51, %v980_v49 }
  0xfd   :  { %v947_v54 = vpop.f32.mrb[4].mxu0  ;;  %v983_v55 = vpop.f32.mrb[4].mxu1 }
  0xfe   :  { %v948_v56 = vpop.f32.mrb[5].mxu0  ;;  %v984_v57 = vpop.f32.mrb[5].mxu1 }
  0xff   :  { %v949_v58 = vadd.f32 %v948_v56, %v947_v54  ;;  %v950_v59 = vpop.f32.mrb[6].mxu0  ;;  %v1253_v60 = vadd.f32 %v984_v57, %v983_v55  ;;  %v986_v61 = vpop.f32.mrb[6].mxu1 }
 0x100   :  { %v951_v62 = vpop.f32.mrb[7].mxu0  ;;  %v987_v63 = vpop.f32.mrb[7].mxu1 }
 0x101   :  { %v952_v0 = vadd.f32 %v951_v62, %v950_v59  ;;  %v1255_v1 = vadd.f32 %v987_v63, %v986_v61 }
 0x105   :  { %v953_v2 = vpop.f32.mrb[8].mxu0  ;;  %v1005_v3 = vpop.f32.mrb[8].mxu1 }
 0x106   :  { %v515_v4 = vadd.f32 %v1005_v3, %v949_v58  ;;  %v954_v6 = vpop.f32.mrb[9].mxu0  ;;  %v506_v7 = vpop.f32.mrb[9].mxu1 }
 0x107   :  { %v955_v8 = vadd.f32 %v954_v6, %v953_v2  ;;  %v507_v9 = vadd.f32 %v943_v46, %v506_v7  ;;  %v956_v10 = vpop.f32.mrb[10].mxu0  ;;  %v1006_v11 = vpop.f32.mrb[10].mxu1 }
 0x108   :  { %v518_v12 = vadd.f32 %v1006_v11, %v952_v0  ;;  %v957_v13 = vpop.f32.mrb[11].mxu0  ;;  %v509_v14 = vpop.f32.mrb[11].mxu1  ;;  %v629_v18 = vadd.f32 %v1260_v5, %v515_v4 }
 0x109   :  { %v627_v15 = vadd.f32 %v1260_v5, %v507_v9  ;;  %v958_v16 = vadd.f32 %v957_v13, %v956_v10  ;;  %v510_v17 = vadd.f32 %v946_v52, %v509_v14 }
 0x10a   :  { %v630_v19 = vadd.f32 %v1260_v5, %v518_v12  ;;  %v667_v28 = vmul.f32 %v629_v18, %v629_v18 }
 0x10b   :  { %v628_v20 = vadd.f32 %v1260_v5, %v510_v17  ;;  %v665_v22 = vmul.f32 %v627_v15, %v627_v15 }
 0x10c   :  { %v886_v21 = vpack.c.bf16 %v630_v19, %v629_v18  ;;  %v668_v37 = vmul.f32 %v630_v19, %v630_v19 }
 0x10d   :  { %v643_v23 = vadd.f32 %v628_v20, %v627_v15  ;;  %v666_v24 = vmul.f32 %v628_v20, %v628_v20  ;;  %v881_v25 = vpack.c.bf16 %v628_v20, %v627_v15  ;;  %v959_v26 = vpop.f32.mrb[12].mxu0  ;;  %v1009_v27 = vpop.f32.mrb[12].mxu1 }
 0x10e   :  { %918 = vst [vmem:[%s1315_s3 + $0x8] sm:$0xff] %v886_v21   ;;  %v960_v29 = vpop.f32.mrb[13].mxu0  ;;  %v522_v30 = vpop.f32.mrb[13].mxu1 }
 0x10f   :  { %v644_v31 = vadd.f32 %v643_v23, %v629_v18  ;;  %v681_v32 = vadd.f32 %v666_v24, %v665_v22  ;;  %882 = vst [vmem:[%s1315_s3] sm:$0xff] %v881_v25   ;;  %v961_v33 = vadd.f32 %v960_v29, %v959_v26  ;;  %v523_v34 = vadd.f32 %v955_v8, %v522_v30  ;;  %v962_v35 = vpop.f32.mrb[14].mxu0  ;;  %v1010_v36 = vpop.f32.mrb[14].mxu1 }
 0x110   :  { %v963_v38 = vpop.f32.mrb[15].mxu0  ;;  %v525_v39 = vpop.f32.mrb[15].mxu1 }
 0x111   :  { %v682_v40 = vadd.f32 %v681_v32, %v667_v28  ;;  %v531_v41 = vadd.f32 %v1009_v27, %v961_v33  ;;  %v631_v42 = vadd.f32 %v1260_v5, %v523_v34  ;;  %v645_v43 = vadd.f32 %v644_v31, %v630_v19 }
 0x112   :  { %v964_v44 = vadd.f32 %v963_v38, %v962_v35  ;;  %v526_v45 = vadd.f32 %v958_v16, %v525_v39 }
 0x113   :  { %v646_v46 = vadd.f32 %v645_v43, %v631_v42  ;;  %v669_v47 = vmul.f32 %v631_v42, %v631_v42  ;;  %v683_v49 = vadd.f32 %v682_v40, %v668_v37  ;;  %v633_v50 = vadd.f32 %v1260_v5, %v531_v41 }
 0x114   :  { %v534_v51 = vadd.f32 %v1010_v36, %v964_v44  ;;  %v632_v52 = vadd.f32 %v1260_v5, %v526_v45 }
 0x115   :  { %v684_v54 = vadd.f32 %v683_v49, %v669_v47  ;;  %v965_v55 = vpop.f32.mrb[16].mxu0  ;;  %v1013_v56 = vpop.f32.mrb[16].mxu1  ;;  %v671_v4 = vmul.f32 %v633_v50, %v633_v50 }
 0x116   :  { %v634_v57 = vadd.f32 %v1260_v5, %v534_v51  ;;  %v647_v58 = vadd.f32 %v646_v46, %v632_v52  ;;  %v670_v59 = vmul.f32 %v632_v52, %v632_v52  ;;  %v891_v61 = vpack.c.bf16 %v632_v52, %v631_v42  ;;  %v966_v62 = vpop.f32.mrb[17].mxu0  ;;  %v538_v63 = vpop.f32.mrb[17].mxu1 }
 0x117   :  { %v967_v0 = vadd.f32 %v966_v62, %v965_v55  ;;  %v968_v2 = vpop.f32.mrb[18].mxu0  ;;  %v1014_v3 = vpop.f32.mrb[18].mxu1 }
 0x118   :  { %v896_v6 = vpack.c.bf16 %v634_v57, %v633_v50  ;;  %v648_v7 = vadd.f32 %v647_v58, %v633_v50  ;;  %v685_v8 = vadd.f32 %v684_v54, %v670_v59  ;;  %919 = vst [vmem:[%s1315_s3 + $0x10] sm:$0xff] %v891_v61   ;;  %v969_v9 = vpop.f32.mrb[19].mxu0  ;;  %v541_v10 = vpop.f32.mrb[19].mxu1  ;;  %v672_v13 = vmul.f32 %v634_v57, %v634_v57 }
 0x119   :  { %v970_v11 = vadd.f32 %v969_v9, %v968_v2  ;;  %v539_v12 = vadd.f32 %v967_v0, %v538_v63 }
 0x11a   :  { %920 = vst [vmem:[%s1315_s3 + $0x18] sm:$0xff] %v896_v6   ;;  %v686_v14 = vadd.f32 %v685_v8, %v671_v4  ;;  %v649_v15 = vadd.f32 %v648_v7, %v634_v57 }
 0x11b   :  { %v635_v16 = vadd.f32 %v1260_v5, %v539_v12  ;;  %v542_v17 = vadd.f32 %v970_v11, %v541_v10 }
 0x11c   :  { %v687_v18 = vadd.f32 %v686_v14, %v672_v13 }
 0x11d   :  { %v650_v19 = vadd.f32 %v649_v15, %v635_v16  ;;  %v673_v20 = vmul.f32 %v635_v16, %v635_v16  ;;  %v636_v21 = vadd.f32 %v1260_v5, %v542_v17  ;;  %v971_v22 = vpop.f32.mrb[20].mxu0  ;;  %v1017_v23 = vpop.f32.mrb[20].mxu1 }
 0x11e   :  { %v563_v24 = vadd.f32 %v1017_v23, %v1253_v60  ;;  %v972_v25 = vpop.f32.mrb[21].mxu0  ;;  %v554_v26 = vpop.f32.mrb[21].mxu1 }
 0x11f   :  { %v688_v27 = vadd.f32 %v687_v18, %v673_v20  ;;  %v651_v28 = vadd.f32 %v650_v19, %v636_v21  ;;  %v674_v29 = vmul.f32 %v636_v21, %v636_v21  ;;  %v901_v30 = vpack.c.bf16 %v636_v21, %v635_v16  ;;  %v974_v31 = vpop.f32.mrb[22].mxu0  ;;  %v1018_v32 = vpop.f32.mrb[22].mxu1 }
 0x120   :  { %v973_v33 = vadd.f32 %v972_v25, %v971_v22  ;;  %v555_v34 = vadd.f32 %v1249_v48, %v554_v26  ;;  %v566_v35 = vadd.f32 %v1018_v32, %v1255_v1  ;;  %v975_v36 = vpop.f32.mrb[23].mxu0  ;;  %v557_v37 = vpop.f32.mrb[23].mxu1  ;;  %v641_v40 = vadd.f32 %v1260_v5, %v563_v24 }
 0x121   :  { %v689_v38 = vadd.f32 %v688_v27, %v674_v29  ;;  %921 = vst [vmem:[%s1315_s3 + $0x20] sm:$0xff] %v901_v30   ;;  %v976_v60 = vadd.f32 %v975_v36, %v974_v31  ;;  %v558_v39 = vadd.f32 %v1251_v53, %v557_v37 }
 0x122   :  { %v547_v41 = vadd.f32 %v1013_v56, %v973_v33  ;;  %v642_v42 = vadd.f32 %v1260_v5, %v566_v35  ;;  %v639_v43 = vadd.f32 %v1260_v5, %v555_v34  ;;  %v679_v61 = vmul.f32 %v641_v40, %v641_v40 }
 0x123   :  { %v550_v48 = vadd.f32 %v1014_v3, %v976_v60  ;;  %v640_v1 = vadd.f32 %v1260_v5, %v558_v39 }
 0x124   :  { %v637_v44 = vadd.f32 %v1260_v5, %v547_v41  ;;  %v916_v45 = vpack.c.bf16 %v642_v42, %v641_v40  ;;  %v680_v0 = vmul.f32 %v642_v42, %v642_v42 }
 0x125   :  { %v638_v46 = vadd.f32 %v1260_v5, %v550_v48  ;;  %v911_v47 = vpack.c.bf16 %v640_v1, %v639_v43  ;;  %v677_v5 = vmul.f32 %v639_v43, %v639_v43  ;;  %v678_v58 = vmul.f32 %v640_v1, %v640_v1 }
 0x126   :  { %v652_v49 = vadd.f32 %v651_v28, %v637_v44  ;;  %v675_v50 = vmul.f32 %v637_v44, %v637_v44  ;;  %924 = vst [vmem:[%s1315_s3 + $0x38] sm:$0xff] %v916_v45  }
 0x127   :  { %v676_v53 = vmul.f32 %v638_v46, %v638_v46  ;;  %v906_v51 = vpack.c.bf16 %v638_v46, %v637_v44  ;;  %923 = vst [vmem:[%s1315_s3 + $0x30] sm:$0xff] %v911_v47  }
 0x128   :  { %v690_v52 = vadd.f32 %v689_v38, %v675_v50  ;;  %v653_v54 = vadd.f32 %v652_v49, %v638_v46 }
 0x129   :  { %922 = vst [vmem:[%s1315_s3 + $0x28] sm:$0xff] %v906_v51  }
 0x12a   :  { %v691_v55 = vadd.f32 %v690_v52, %v676_v53  ;;  %v654_v56 = vadd.f32 %v653_v54, %v639_v43 }
 0x12c   :  { %v655_v57 = vadd.f32 %v654_v56, %v640_v1  ;;  %v692_v59 = vadd.f32 %v691_v55, %v677_v5 }
 0x12e   :  { %v656_v62 = vadd.f32 %v655_v57, %v641_v40  ;;  %v693_v63 = vadd.f32 %v692_v59, %v678_v58 }
 0x130   :  { %v657_v2 = vadd.f32 %v656_v62, %v642_v42  ;;  %v694_v3 = vadd.f32 %v693_v63, %v679_v61 }
 0x132   :  { %v658_v4 = vrot.slane %v657_v2, 4  ;;  %v695_v6 = vadd.f32 %v694_v3, %v680_v0 }
 0x134   :  { %v659_v7 = vadd.f32 %v658_v4, %v657_v2  ;;  %v696_v8 = vrot.slane %v695_v6, 4 }
 0x136   :  { %v660_v9 = vrot.slane %v659_v7, 2  ;;  %v697_v10 = vadd.f32 %v696_v8, %v695_v6 }
 0x138   :  { %v661_v11 = vadd.f32 %v660_v9, %v659_v7  ;;  %v698_v12 = vrot.slane %v697_v10, 2 }
 0x13a   :  { %v662_v13 = vrot.slane %v661_v11, 1  ;;  %v699_v14 = vadd.f32 %v698_v12, %v697_v10 }
 0x13c   :  { %v663_v15 = vadd.f32 %v662_v13, %v661_v11  ;;  %v700_v16 = vrot.slane %v699_v14, 1 }
 0x13e   :  { %664 = vst [vmem:[%s1316_s4] sm:$0x1] %v663_v15  ;;  %v701_v17 = vadd.f32 %v700_v16, %v699_v14 }
 0x140   :  { %702 = vst [vmem:[%s1317_s5] sm:$0x1] %v701_v17 }

// kernel: unet_generator_forward.19
= control target key start
LH: loop header
LB: loop body
LE: loop exit
PB: predicated region body
PF: predicated region fallthrough
CT: control target
= control target key end

     0   :  { %11 = vsyncpa [#allocation4], 0  ;;  %v2000_v1 = vmov 0   ;;  %vm576_vm0 = vcmask 130048   ;;  %s2769_s0 = inlined_call_operand.vmem [shape: bf16[512,144], index: 0, kind: input, shape index: {}]   ;;  %s2770_s1 = inlined_call_operand.vmem [shape: bf16[144,128], index: 1, kind: input, shape index: {}]   ;;  %s2771_s2 = inlined_call_operand.vmem [shape: f32[1,128], index: 2, kind: input, shape index: {}]   ;;  %s2772_s3 = inlined_call_operand.vmem [shape: f32[512,128], index: 3, kind: output, shape index: {0}]   ;;  %s2773_s4 = inlined_call_operand.hbm [shape: f32[1,1,128], index: 4, kind: output, shape index: {1}]   ;;  %s2774_s5 = inlined_call_operand.hbm [shape: f32[1,1,128], index: 5, kind: output, shape index: {2}]  }
   0x1   :  { %v1719_v0 = vld [vmem:[%s2770_s1] sm:$0xff]   ;;  %673 = vmatprep.subr.bf16.mxu0 %v2000_v1  ;;  %1698 = vmatprep.subr.bf16.mxu1 %v2000_v1  ;;  %v1720_v2 = vld [vmem:[%s2770_s1 + $0x8] sm:$0xff]   ;;  %v1721_v3 = vld [vmem:[%s2770_s1 + $0x10] sm:$0xff]  }
   0x2   :  { %674 = vmatpush1.bf16.msra.mxu0 %v1719_v0  ;;  %1707 = vmatpush1.bf16.msra.mxu1 %v1719_v0  ;;  %v1722_v4 = vld [vmem:[%s2770_s1 + $0x18] sm:$0xff]   ;;  %v1730_v5 = vld [vmem:[%s2769_s0 + $0x4] ss:$8 sps:$4 sm:$0xff]   ;;  %v1725_v9 = vld [vmem:[%s2770_s1 + $0x30] sm:$0xff]  }
   0x3   :  { %675 = vmatprep.subr.bf16.mxu0 %v2000_v1  ;;  %1699 = vmatprep.subr.bf16.mxu1 %v2000_v1  ;;  %v1723_v6 = vld [vmem:[%s2770_s1 + $0x20] sm:$0xff]   ;;  %v1724_v7 = vld [vmem:[%s2770_s1 + $0x28] sm:$0xff]   ;;  %v1726_v10 = vld [vmem:[%s2770_s1 + $0x38] sm:$0xff]  }
   0x4   :  { %1665 = vmatprep.mubr.msk.bf16.mxu0 %vm576_vm0, %v1730_v5  ;;  %v1754_v8 = vld [vmem:[%s2769_s0 + $0x104] ss:$8 sps:$4 sm:$0xff]   ;;  %v1728_v12 = vld [vmem:[%s2769_s0] ss:$8 sps:$4 sm:$0xff]   ;;  %v1731_v13 = vld [vmem:[%s2769_s0 + $0x14] ss:$8 sps:$4 sm:$0xff]  }
   0x5   :  { %1681 = vmatprep.mubr.msk.bf16.mxu1 %vm576_vm0, %v1754_v8  ;;  %v1727_v11 = vld [vmem:[%s2770_s1 + $0x40] sm:$0xff]   ;;  %v1758_v15 = vld [vmem:[%s2769_s0 + $0x114] ss:$8 sps:$4 sm:$0xff]   ;;  %v1733_v16 = vld [vmem:[%s2769_s0 + $0x10] ss:$8 sps:$4 sm:$0xff]  }
   0x6   :  { %676 = vmatpush1.bf16.msra.mxu0 %v1720_v2  ;;  %1708 = vmatpush1.bf16.msra.mxu1 %v1720_v2  ;;  %v1752_v14 = vld [vmem:[%s2769_s0 + $0x100] ss:$8 sps:$4 sm:$0xff]   ;;  %v1734_v17 = vld [vmem:[%s2769_s0 + $0x24] ss:$8 sps:$4 sm:$0xff]   ;;  %v1760_v18 = vld [vmem:[%s2769_s0 + $0x110] ss:$8 sps:$4 sm:$0xff]  }
   0x7   :  { %677 = vmatprep.subr.bf16.mxu0 %v2000_v1  ;;  %1700 = vmatprep.subr.bf16.mxu1 %v2000_v1  ;;  %v1764_v19 = vld [vmem:[%s2769_s0 + $0x124] ss:$8 sps:$4 sm:$0xff]   ;;  %v1736_v20 = vld [vmem:[%s2769_s0 + $0x20] ss:$8 sps:$4 sm:$0xff]   ;;  %v1737_v21 = vld [vmem:[%s2769_s0 + $0x34] ss:$8 sps:$4 sm:$0xff]  }
   0x8   :  { %v1766_v22 = vld [vmem:[%s2769_s0 + $0x120] ss:$8 sps:$4 sm:$0xff]   ;;  %v1770_v23 = vld [vmem:[%s2769_s0 + $0x134] ss:$8 sps:$4 sm:$0xff]  }
   0xa   :  { %678 = vmatpush1.bf16.msra.mxu0 %v1721_v3  ;;  %1709 = vmatpush1.bf16.msra.mxu1 %v1721_v3 }
   0xb   :  { %679 = vmatprep.subr.bf16.mxu0 %v2000_v1  ;;  %1701 = vmatprep.subr.bf16.mxu1 %v2000_v1 }
   0xe   :  { %680 = vmatpush1.bf16.msra.mxu0 %v1722_v4  ;;  %1710 = vmatpush1.bf16.msra.mxu1 %v1722_v4 }
   0xf   :  { %681 = vmatprep.subr.bf16.mxu0 %v2000_v1  ;;  %1702 = vmatprep.subr.bf16.mxu1 %v2000_v1 }
  0x12   :  { %682 = vmatpush1.bf16.msra.mxu0 %v1723_v6  ;;  %1711 = vmatpush1.bf16.msra.mxu1 %v1723_v6 }
  0x13   :  { %683 = vmatprep.subr.bf16.mxu0 %v2000_v1  ;;  %1703 = vmatprep.subr.bf16.mxu1 %v2000_v1 }
  0x16   :  { %684 = vmatpush1.bf16.msra.mxu0 %v1724_v7  ;;  %1712 = vmatpush1.bf16.msra.mxu1 %v1724_v7 }
  0x17   :  { %685 = vmatprep.subr.bf16.mxu0 %v2000_v1  ;;  %1704 = vmatprep.subr.bf16.mxu1 %v2000_v1 }
  0x1a   :  { %686 = vmatpush1.bf16.msra.mxu0 %v1725_v9  ;;  %1713 = vmatpush1.bf16.msra.mxu1 %v1725_v9 }
  0x1b   :  { %687 = vmatprep.subr.bf16.mxu0 %v2000_v1  ;;  %1705 = vmatprep.subr.bf16.mxu1 %v2000_v1 }
  0x1e   :  { %688 = vmatpush1.bf16.msra.mxu0 %v1726_v10  ;;  %1714 = vmatpush1.bf16.msra.mxu1 %v1726_v10 }
  0x1f   :  { %689 = vmatprep.subr.bf16.mxu0 %v2000_v1  ;;  %1706 = vmatprep.subr.bf16.mxu1 %v2000_v1 }
  0x22   :  { %690 = vmatpush1.bf16.msra.mxu0 %v1727_v11  ;;  %1715 = vmatpush1.bf16.msra.mxu1 %v1727_v11 }
  0x25   :  { %706 = vmatmul.mubr.bf16.vlgmr.msra.gmra.mrb[0].mxu0 %v1728_v12  ;;  %834 = vmatmul.mubr.bf16.vlgmr.msra.gmra.mrb[0].mxu1 %v1752_v14 }
  0x26   :  { %1666 = vmatprep.mubr.msk.bf16.mxu0 %vm576_vm0, %v1731_v13  ;;  %1682 = vmatprep.mubr.msk.bf16.mxu1 %vm576_vm0, %v1758_v15 }
  0x2d   :  { %714 = vmatmul.mubr.bf16.gmra.mrb[4].mxu0 %v1733_v16  ;;  %842 = vmatmul.mubr.bf16.gmra.mrb[4].mxu1 %v1760_v18 }
  0x2e   :  { %1667 = vmatprep.mubr.msk.bf16.mxu0 %vm576_vm0, %v1734_v17  ;;  %1683 = vmatprep.mubr.msk.bf16.mxu1 %vm576_vm0, %v1764_v19 }
  0x2f   :  { %12 = vsyncpa [#allocation6], 0  ;;  %v1739_v24 = vld [vmem:[%s2769_s0 + $0x30] ss:$8 sps:$4 sm:$0xff]   ;;  %v1740_v26 = vld [vmem:[%s2769_s0 + $0x44] ss:$8 sps:$4 sm:$0xff]  }
  0x30   :  { %v1772_v25 = vld [vmem:[%s2769_s0 + $0x130] ss:$8 sps:$4 sm:$0xff]   ;;  %v1776_v27 = vld [vmem:[%s2769_s0 + $0x144] ss:$8 sps:$4 sm:$0xff]   ;;  %v1742_v28 = vld [vmem:[%s2769_s0 + $0x40] ss:$8 sps:$4 sm:$0xff]  }
  0x31   :  { %v1778_v29 = vld [vmem:[%s2769_s0 + $0x140] ss:$8 sps:$4 sm:$0xff]   ;;  %v1743_v30 = vld [vmem:[%s2769_s0 + $0x54] ss:$8 sps:$4 sm:$0xff]   ;;  %v1745_v32 = vld [vmem:[%s2769_s0 + $0x50] ss:$8 sps:$4 sm:$0xff]  }
  0x32   :  { %v1782_v31 = vld [vmem:[%s2769_s0 + $0x154] ss:$8 sps:$4 sm:$0xff]   ;;  %v1784_v33 = vld [vmem:[%s2769_s0 + $0x150] ss:$8 sps:$4 sm:$0xff]   ;;  %v1746_v34 = vld [vmem:[%s2769_s0 + $0x64] ss:$8 sps:$4 sm:$0xff]  }
  0x33   :  { %v1788_v35 = vld [vmem:[%s2769_s0 + $0x164] ss:$8 sps:$4 sm:$0xff]   ;;  %v1748_v36 = vld [vmem:[%s2769_s0 + $0x60] ss:$8 sps:$4 sm:$0xff]   ;;  %v1749_v38 = vld [vmem:[%s2769_s0 + $0x74] ss:$8 sps:$4 sm:$0xff]  }
  0x34   :  { %v1790_v37 = vld [vmem:[%s2769_s0 + $0x160] ss:$8 sps:$4 sm:$0xff]   ;;  %v1794_v39 = vld [vmem:[%s2769_s0 + $0x174] ss:$8 sps:$4 sm:$0xff]   ;;  %v1751_v40 = vld [vmem:[%s2769_s0 + $0x70] ss:$8 sps:$4 sm:$0xff]  }
  0x35   :  { %722 = vmatmul.mubr.bf16.gmra.mrb[8].mxu0 %v1736_v20  ;;  %850 = vmatmul.mubr.bf16.gmra.mrb[8].mxu1 %v1766_v22  ;;  %v1796_v41 = vld [vmem:[%s2769_s0 + $0x170] ss:$8 sps:$4 sm:$0xff]   ;;  %v1755_v42 = vld [vmem:[%s2769_s0 + $0x84] ss:$8 sps:$4 sm:$0xff]   ;;  %v1757_v44 = vld [vmem:[%s2769_s0 + $0x80] ss:$8 sps:$4 sm:$0xff]  }
  0x36   :  { %1668 = vmatprep.mubr.msk.bf16.mxu0 %vm576_vm0, %v1737_v21  ;;  %1684 = vmatprep.mubr.msk.bf16.mxu1 %vm576_vm0, %v1770_v23  ;;  %v1800_v43 = vld [vmem:[%s2769_s0 + $0x184] ss:$8 sps:$4 sm:$0xff]   ;;  %v1802_v45 = vld [vmem:[%s2769_s0 + $0x180] ss:$8 sps:$4 sm:$0xff]   ;;  %v1761_v46 = vld [vmem:[%s2769_s0 + $0x94] ss:$8 sps:$4 sm:$0xff]  }
  0x37   :  { %v1803_v47 = vld [vmem:[%s2769_s0 + $0x194] ss:$8 sps:$4 sm:$0xff]   ;;  %v1763_v48 = vld [vmem:[%s2769_s0 + $0x90] ss:$8 sps:$4 sm:$0xff]   ;;  %v1767_v50 = vld [vmem:[%s2769_s0 + $0xa4] ss:$8 sps:$4 sm:$0xff]  }
  0x38   :  { %v1805_v49 = vld [vmem:[%s2769_s0 + $0x190] ss:$8 sps:$4 sm:$0xff]   ;;  %v1806_v51 = vld [vmem:[%s2769_s0 + $0x1a4] ss:$8 sps:$4 sm:$0xff]   ;;  %v1769_v52 = vld [vmem:[%s2769_s0 + $0xa0] ss:$8 sps:$4 sm:$0xff]  }
  0x39   :  { %v1808_v53 = vld [vmem:[%s2769_s0 + $0x1a0] ss:$8 sps:$4 sm:$0xff]   ;;  %v1773_v54 = vld [vmem:[%s2769_s0 + $0xb4] ss:$8 sps:$4 sm:$0xff]   ;;  %v1775_v56 = vld [vmem:[%s2769_s0 + $0xb0] ss:$8 sps:$4 sm:$0xff]  }
  0x3a   :  { %v1809_v55 = vld [vmem:[%s2769_s0 + $0x1b4] ss:$8 sps:$4 sm:$0xff]   ;;  %v1811_v57 = vld [vmem:[%s2769_s0 + $0x1b0] ss:$8 sps:$4 sm:$0xff]   ;;  %v1779_v58 = vld [vmem:[%s2769_s0 + $0xc4] ss:$8 sps:$4 sm:$0xff]  }
  0x3b   :  { %v1812_v59 = vld [vmem:[%s2769_s0 + $0x1c4] ss:$8 sps:$4 sm:$0xff]   ;;  %v1781_v60 = vld [vmem:[%s2769_s0 + $0xc0] ss:$8 sps:$4 sm:$0xff]   ;;  %v1785_v62 = vld [vmem:[%s2769_s0 + $0xd4] ss:$8 sps:$4 sm:$0xff]  }
  0x3c   :  { %v1814_v61 = vld [vmem:[%s2769_s0 + $0x1c0] ss:$8 sps:$4 sm:$0xff]   ;;  %v1815_v63 = vld [vmem:[%s2769_s0 + $0x1d4] ss:$8 sps:$4 sm:$0xff]   ;;  %v1787_v0 = vld [vmem:[%s2769_s0 + $0xd0] ss:$8 sps:$4 sm:$0xff]  }
  0x3d   :  { %730 = vmatmul.mubr.bf16.gmra.mrb[12].mxu0 %v1739_v24  ;;  %858 = vmatmul.mubr.bf16.gmra.mrb[12].mxu1 %v1772_v25  ;;  %v1817_v1 = vld [vmem:[%s2769_s0 + $0x1d0] ss:$8 sps:$4 sm:$0xff]   ;;  %v1791_v2 = vld [vmem:[%s2769_s0 + $0xe4] ss:$8 sps:$4 sm:$0xff]   ;;  %v1793_v4 = vld [vmem:[%s2769_s0 + $0xe0] ss:$8 sps:$4 sm:$0xff]  }
  0x3e   :  { %1669 = vmatprep.mubr.msk.bf16.mxu0 %vm576_vm0, %v1740_v26  ;;  %1685 = vmatprep.mubr.msk.bf16.mxu1 %vm576_vm0, %v1776_v27  ;;  %v1818_v3 = vld [vmem:[%s2769_s0 + $0x1e4] ss:$8 sps:$4 sm:$0xff]   ;;  %v1820_v5 = vld [vmem:[%s2769_s0 + $0x1e0] ss:$8 sps:$4 sm:$0xff]   ;;  %v1797_v6 = vld [vmem:[%s2769_s0 + $0xf4] ss:$8 sps:$4 sm:$0xff]  }
  0x3f   :  { %v1821_v7 = vld [vmem:[%s2769_s0 + $0x1f4] ss:$8 sps:$4 sm:$0xff]   ;;  %v1799_v8 = vld [vmem:[%s2769_s0 + $0xf0] ss:$8 sps:$4 sm:$0xff]   ;;  %v2287_v10 = vld [vmem:[%s2771_s2] ss:$0 sm:$0xff] }
  0x40   :  { %v1823_v9 = vld [vmem:[%s2769_s0 + $0x1f0] ss:$8 sps:$4 sm:$0xff]   ;;  %s2002_s25 = smov [#allocation5]  }
  0x41   :  { %s1578_s26 = sshll.u32 %s2002_s25, 4  ;;  %s2737_s26 = int_to_ptr.vmem [resolvable:$true] %s1578_s26 }
  0x45   :  { %738 = vmatmul.mubr.bf16.gmra.mrb[16].mxu0 %v1742_v28  ;;  %866 = vmatmul.mubr.bf16.gmra.mrb[16].mxu1 %v1778_v29 }
  0x46   :  { %1670 = vmatprep.mubr.msk.bf16.mxu0 %vm576_vm0, %v1743_v30  ;;  %1686 = vmatprep.mubr.msk.bf16.mxu1 %vm576_vm0, %v1782_v31 }
  0x4d   :  { %746 = vmatmul.mubr.bf16.gmra.mrb[20].mxu0 %v1745_v32  ;;  %874 = vmatmul.mubr.bf16.gmra.mrb[20].mxu1 %v1784_v33 }
  0x4e   :  { %1671 = vmatprep.mubr.msk.bf16.mxu0 %vm576_vm0, %v1746_v34  ;;  %1687 = vmatprep.mubr.msk.bf16.mxu1 %vm576_vm0, %v1788_v35 }
  0x55   :  { %754 = vmatmul.mubr.bf16.gmra.mrb[24].mxu0 %v1748_v36  ;;  %882 = vmatmul.mubr.bf16.gmra.mrb[24].mxu1 %v1790_v37 }
  0x56   :  { %1672 = vmatprep.mubr.msk.bf16.mxu0 %vm576_vm0, %v1749_v38  ;;  %1688 = vmatprep.mubr.msk.bf16.mxu1 %vm576_vm0, %v1794_v39 }
  0x5d   :  { %762 = vmatmul.mubr.bf16.gmra.mrb[28].mxu0 %v1751_v40  ;;  %890 = vmatmul.mubr.bf16.gmra.mrb[28].mxu1 %v1796_v41 }
  0x5e   :  { %1673 = vmatprep.mubr.msk.bf16.mxu0 %vm576_vm0, %v1755_v42  ;;  %1689 = vmatprep.mubr.msk.bf16.mxu1 %vm576_vm0, %v1800_v43 }
  0x65   :  { %770 = vmatmul.mubr.bf16.gmra.mrb[32].mxu0 %v1757_v44  ;;  %898 = vmatmul.mubr.bf16.gmra.mrb[32].mxu1 %v1802_v45 }
  0x66   :  { %1674 = vmatprep.mubr.msk.bf16.mxu0 %vm576_vm0, %v1761_v46  ;;  %1690 = vmatprep.mubr.msk.bf16.mxu1 %vm576_vm0, %v1803_v47 }
  0x6d   :  { %778 = vmatmul.mubr.bf16.gmra.mrb[36].mxu0 %v1763_v48  ;;  %906 = vmatmul.mubr.bf16.gmra.mrb[36].mxu1 %v1805_v49 }
  0x6e   :  { %1675 = vmatprep.mubr.msk.bf16.mxu0 %vm576_vm0, %v1767_v50  ;;  %1691 = vmatprep.mubr.msk.bf16.mxu1 %vm576_vm0, %v1806_v51 }
  0x75   :  { %786 = vmatmul.mubr.bf16.gmra.mrb[40].mxu0 %v1769_v52  ;;  %914 = vmatmul.mubr.bf16.gmra.mrb[40].mxu1 %v1808_v53 }
  0x76   :  { %1676 = vmatprep.mubr.msk.bf16.mxu0 %vm576_vm0, %v1773_v54  ;;  %1692 = vmatprep.mubr.msk.bf16.mxu1 %vm576_vm0, %v1809_v55 }
  0x7d   :  { %794 = vmatmul.mubr.bf16.gmra.mrb[44].mxu0 %v1775_v56  ;;  %922 = vmatmul.mubr.bf16.gmra.mrb[44].mxu1 %v1811_v57 }
  0x7e   :  { %1677 = vmatprep.mubr.msk.bf16.mxu0 %vm576_vm0, %v1779_v58  ;;  %1693 = vmatprep.mubr.msk.bf16.mxu1 %vm576_vm0, %v1812_v59 }
  0x85   :  { %802 = vmatmul.mubr.bf16.gmra.mrb[48].mxu0 %v1781_v60  ;;  %930 = vmatmul.mubr.bf16.gmra.mrb[48].mxu1 %v1814_v61 }
  0x86   :  { %1678 = vmatprep.mubr.msk.bf16.mxu0 %vm576_vm0, %v1785_v62  ;;  %1694 = vmatprep.mubr.msk.bf16.mxu1 %vm576_vm0, %v1815_v63 }
  0x8d   :  { %810 = vmatmul.mubr.bf16.gmra.mrb[52].mxu0 %v1787_v0  ;;  %938 = vmatmul.mubr.bf16.gmra.mrb[52].mxu1 %v1817_v1 }
  0x8e   :  { %1679 = vmatprep.mubr.msk.bf16.mxu0 %vm576_vm0, %v1791_v2  ;;  %1695 = vmatprep.mubr.msk.bf16.mxu1 %vm576_vm0, %v1818_v3 }
  0x95   :  { %818 = vmatmul.mubr.bf16.gmra.mrb[56].mxu0 %v1793_v4  ;;  %946 = vmatmul.mubr.bf16.gmra.mrb[56].mxu1 %v1820_v5 }
  0x96   :  { %1680 = vmatprep.mubr.msk.bf16.mxu0 %vm576_vm0, %v1797_v6  ;;  %1696 = vmatprep.mubr.msk.bf16.mxu1 %vm576_vm0, %v1821_v7 }
  0x9d   :  { %826 = vmatmul.mubr.bf16.gmra.mrb[60].mxu0 %v1799_v8  ;;  %954 = vmatmul.mubr.bf16.gmra.mrb[60].mxu1 %v1823_v9 }
  0xf8   :  { %v707_v11 = vpop.f32.mrb[0].mxu0  ;;  %v835_v12 = vpop.f32.mrb[0].mxu1 }
  0xf9   :  { %v1164_v13 = vadd.f32 %v2287_v10, %v707_v11  ;;  %v709_v14 = vpop.f32.mrb[1].mxu0  ;;  %v2291_v15 = vadd.f32 %v2287_v10, %v835_v12  ;;  %v837_v16 = vpop.f32.mrb[1].mxu1 }
  0xfa   :  { %v710_v17 = vpop.f32.mrb[2].mxu0  ;;  %v838_v18 = vpop.f32.mrb[2].mxu1 }
  0xfb   :  { %1824 = vtanh.f32 %v1164_v13  ;;  %v1165_v19 = vadd.f32 %v2287_v10, %v710_v17  ;;  %v712_v20 = vpop.f32.mrb[3].mxu0  ;;  %v840_v21 = vpop.f32.mrb[3].mxu1  ;;  %v2296_v22 = vadd.f32 %v2287_v10, %v838_v18  ;;  %v1298_v23 = vmul.f32 %v1164_v13, %v1164_v13 }
  0xfc   :  { %1826 = vtanh.f32 %v2291_v15 }
  0xfd   :  { %v1228_v24 = vadd.f32 %v1165_v19, %v1164_v13  ;;  %v1299_v25 = vmul.f32 %v1165_v19, %v1165_v19  ;;  %1828 = vtanh.f32 %v1165_v19 }
  0xfe   :  { %1830 = vtanh.f32 %v2296_v22 }
  0xff   :  { %v1362_v26 = vadd.f32 %v1299_v25, %v1298_v23 }
 0x100   :  { %v715_v27 = vpop.f32.mrb[4].mxu0  ;;  %v843_v28 = vpop.f32.mrb[4].mxu1 }
 0x101   :  { %v1166_v29 = vadd.f32 %v2287_v10, %v715_v27  ;;  %v717_v30 = vpop.f32.mrb[5].mxu0  ;;  %v2301_v31 = vadd.f32 %v2287_v10, %v843_v28  ;;  %v845_v32 = vpop.f32.mrb[5].mxu1 }
 0x102   :  { %v718_v33 = vpop.f32.mrb[6].mxu0  ;;  %v846_v34 = vpop.f32.mrb[6].mxu1 }
 0x103   :  { %v1229_v35 = vadd.f32 %v1228_v24, %v1166_v29  ;;  %v1300_v36 = vmul.f32 %v1166_v29, %v1166_v29  ;;  %1832 = vtanh.f32 %v1166_v29  ;;  %v1167_v37 = vadd.f32 %v2287_v10, %v718_v33  ;;  %v720_v38 = vpop.f32.mrb[7].mxu0  ;;  %v848_v39 = vpop.f32.mrb[7].mxu1 }
 0x104   :  { %1834 = vtanh.f32 %v2301_v31  ;;  %v2306_v40 = vadd.f32 %v2287_v10, %v846_v34 }
 0x105   :  { %v1825_v41 = vpop.eup %1824  ;;  %v1363_v42 = vadd.f32 %v1362_v26, %v1300_v36  ;;  %v1230_v43 = vadd.f32 %v1229_v35, %v1167_v37  ;;  %v1301_v44 = vmul.f32 %v1167_v37, %v1167_v37  ;;  %1836 = vtanh.f32 %v1167_v37 }
 0x106   :  { %v1827_v45 = vpop.eup %1826  ;;  %1496 = vst [vmem:[%s2772_s3] sm:$0xff] %v1825_v41  ;;  %1838 = vtanh.f32 %v2306_v40 }
 0x107   :  { %v1829_v46 = vpop.eup %1828  ;;  %v1364_v47 = vadd.f32 %v1363_v42, %v1301_v44  ;;  %1528 = vst [vmem:[%s2772_s3 + $0x100] sm:$0xff] %v1827_v45 }
 0x108   :  { %v1831_v48 = vpop.eup %1830  ;;  %1497 = vst [vmem:[%s2772_s3 + $0x8] sm:$0xff] %v1829_v46  ;;  %v723_v49 = vpop.f32.mrb[8].mxu0 }
 0x109   :  { %v851_v50 = vpop.f32.mrb[8].mxu1  ;;  %v1168_v51 = vadd.f32 %v2287_v10, %v723_v49  ;;  %v725_v52 = vpop.f32.mrb[9].mxu0  ;;  %1529 = vst [vmem:[%s2772_s3 + $0x108] sm:$0xff] %v1831_v48 }
 0x10a   :  { %v2323_v53 = vadd.f32 %v2287_v10, %v851_v50  ;;  %v853_v54 = vpop.f32.mrb[9].mxu1  ;;  %v726_v55 = vpop.f32.mrb[10].mxu0 }
 0x10b   :  { %v854_v56 = vpop.f32.mrb[10].mxu1  ;;  %v1231_v57 = vadd.f32 %v1230_v43, %v1168_v51  ;;  %v1302_v58 = vmul.f32 %v1168_v51, %v1168_v51  ;;  %1840 = vtanh.f32 %v1168_v51  ;;  %v1169_v59 = vadd.f32 %v2287_v10, %v726_v55  ;;  %v728_v60 = vpop.f32.mrb[11].mxu0 }
 0x10c   :  { %v856_v61 = vpop.f32.mrb[11].mxu1  ;;  %1842 = vtanh.f32 %v2323_v53  ;;  %v2328_v62 = vadd.f32 %v2287_v10, %v854_v56 }
 0x10d   :  { %v1833_v63 = vpop.eup %1832  ;;  %v1365_v0 = vadd.f32 %v1364_v47, %v1302_v58  ;;  %v1232_v1 = vadd.f32 %v1231_v57, %v1169_v59  ;;  %v1303_v2 = vmul.f32 %v1169_v59, %v1169_v59  ;;  %1844 = vtanh.f32 %v1169_v59 }
 0x10e   :  { %v1835_v3 = vpop.eup %1834  ;;  %1498 = vst [vmem:[%s2772_s3 + $0x10] sm:$0xff] %v1833_v63  ;;  %1846 = vtanh.f32 %v2328_v62 }
 0x10f   :  { %v1837_v4 = vpop.eup %1836  ;;  %v1366_v5 = vadd.f32 %v1365_v0, %v1303_v2  ;;  %1530 = vst [vmem:[%s2772_s3 + $0x110] sm:$0xff] %v1835_v3 }
 0x110   :  { %v1839_v6 = vpop.eup %1838  ;;  %1499 = vst [vmem:[%s2772_s3 + $0x18] sm:$0xff] %v1837_v4  ;;  %v731_v7 = vpop.f32.mrb[12].mxu0 }
 0x111   :  { %v859_v8 = vpop.f32.mrb[12].mxu1  ;;  %v1170_v9 = vadd.f32 %v2287_v10, %v731_v7  ;;  %v733_v11 = vpop.f32.mrb[13].mxu0  ;;  %1531 = vst [vmem:[%s2772_s3 + $0x118] sm:$0xff] %v1839_v6 }
 0x112   :  { %v2345_v12 = vadd.f32 %v2287_v10, %v859_v8  ;;  %v861_v13 = vpop.f32.mrb[13].mxu1  ;;  %v734_v14 = vpop.f32.mrb[14].mxu0 }
 0x113   :  { %v862_v16 = vpop.f32.mrb[14].mxu1  ;;  %v1233_v17 = vadd.f32 %v1232_v1, %v1170_v9  ;;  %v1304_v18 = vmul.f32 %v1170_v9, %v1170_v9  ;;  %1848 = vtanh.f32 %v1170_v9  ;;  %v1171_v19 = vadd.f32 %v2287_v10, %v734_v14  ;;  %v736_v20 = vpop.f32.mrb[15].mxu0 }
 0x114   :  { %v864_v21 = vpop.f32.mrb[15].mxu1  ;;  %1850 = vtanh.f32 %v2345_v12  ;;  %v2350_v23 = vadd.f32 %v2287_v10, %v862_v16 }
 0x115   :  { %v1841_v24 = vpop.eup %1840  ;;  %v1367_v25 = vadd.f32 %v1366_v5, %v1304_v18  ;;  %v1234_v26 = vadd.f32 %v1233_v17, %v1171_v19  ;;  %v1305_v27 = vmul.f32 %v1171_v19, %v1171_v19  ;;  %1852 = vtanh.f32 %v1171_v19 }
 0x116   :  { %v1843_v28 = vpop.eup %1842  ;;  %1500 = vst [vmem:[%s2772_s3 + $0x20] sm:$0xff] %v1841_v24  ;;  %1854 = vtanh.f32 %v2350_v23 }
 0x117   :  { %v1845_v29 = vpop.eup %1844  ;;  %v1368_v30 = vadd.f32 %v1367_v25, %v1305_v27  ;;  %1532 = vst [vmem:[%s2772_s3 + $0x120] sm:$0xff] %v1843_v28 }
 0x118   :  { %v1847_v32 = vpop.eup %1846  ;;  %1501 = vst [vmem:[%s2772_s3 + $0x28] sm:$0xff] %v1845_v29  ;;  %v739_v33 = vpop.f32.mrb[16].mxu0 }
 0x119   :  { %v867_v34 = vpop.f32.mrb[16].mxu1  ;;  %v1172_v35 = vadd.f32 %v2287_v10, %v739_v33  ;;  %v741_v36 = vpop.f32.mrb[17].mxu0  ;;  %1533 = vst [vmem:[%s2772_s3 + $0x128] sm:$0xff] %v1847_v32 }
 0x11a   :  { %v2367_v37 = vadd.f32 %v2287_v10, %v867_v34  ;;  %v869_v38 = vpop.f32.mrb[17].mxu1  ;;  %v742_v39 = vpop.f32.mrb[18].mxu0 }
 0x11b   :  { %v870_v41 = vpop.f32.mrb[18].mxu1  ;;  %v1235_v42 = vadd.f32 %v1234_v26, %v1172_v35  ;;  %v1306_v43 = vmul.f32 %v1172_v35, %v1172_v35  ;;  %1856 = vtanh.f32 %v1172_v35  ;;  %v1173_v44 = vadd.f32 %v2287_v10, %v742_v39  ;;  %v744_v45 = vpop.f32.mrb[19].mxu0 }
 0x11c   :  { %v872_v46 = vpop.f32.mrb[19].mxu1  ;;  %1858 = vtanh.f32 %v2367_v37  ;;  %v2372_v47 = vadd.f32 %v2287_v10, %v870_v41 }
 0x11d   :  { %v1849_v48 = vpop.eup %1848  ;;  %v1369_v49 = vadd.f32 %v1368_v30, %v1306_v43  ;;  %v1236_v50 = vadd.f32 %v1235_v42, %v1173_v44  ;;  %v1307_v51 = vmul.f32 %v1173_v44, %v1173_v44  ;;  %1860 = vtanh.f32 %v1173_v44 }
 0x11e   :  { %v1851_v52 = vpop.eup %1850  ;;  %1502 = vst [vmem:[%s2772_s3 + $0x30] sm:$0xff] %v1849_v48  ;;  %1862 = vtanh.f32 %v2372_v47 }
 0x11f   :  { %v1853_v54 = vpop.eup %1852  ;;  %v1370_v55 = vadd.f32 %v1369_v49, %v1307_v51  ;;  %1534 = vst [vmem:[%s2772_s3 + $0x130] sm:$0xff] %v1851_v52 }
 0x120   :  { %v1855_v56 = vpop.eup %1854  ;;  %1503 = vst [vmem:[%s2772_s3 + $0x38] sm:$0xff] %v1853_v54  ;;  %v747_v57 = vpop.f32.mrb[20].mxu0 }
 0x121   :  { %v875_v58 = vpop.f32.mrb[20].mxu1  ;;  %v1174_v59 = vadd.f32 %v2287_v10, %v747_v57  ;;  %v749_v60 = vpop.f32.mrb[21].mxu0  ;;  %1535 = vst [vmem:[%s2772_s3 + $0x138] sm:$0xff] %v1855_v56 }
 0x122   :  { %v2389_v61 = vadd.f32 %v2287_v10, %v875_v58  ;;  %v877_v63 = vpop.f32.mrb[21].mxu1  ;;  %v750_v0 = vpop.f32.mrb[22].mxu0 }
 0x123   :  { %v878_v1 = vpop.f32.mrb[22].mxu1  ;;  %v1237_v2 = vadd.f32 %v1236_v50, %v1174_v59  ;;  %v1308_v3 = vmul.f32 %v1174_v59, %v1174_v59  ;;  %1864 = vtanh.f32 %v1174_v59  ;;  %v1175_v4 = vadd.f32 %v2287_v10, %v750_v0  ;;  %v752_v5 = vpop.f32.mrb[23].mxu0 }
 0x124   :  { %v880_v6 = vpop.f32.mrb[23].mxu1  ;;  %1866 = vtanh.f32 %v2389_v61  ;;  %v2394_v7 = vadd.f32 %v2287_v10, %v878_v1 }
 0x125   :  { %v1857_v8 = vpop.eup %1856  ;;  %v1371_v9 = vadd.f32 %v1370_v55, %v1308_v3  ;;  %v1238_v11 = vadd.f32 %v1237_v2, %v1175_v4  ;;  %v1309_v13 = vmul.f32 %v1175_v4, %v1175_v4  ;;  %1868 = vtanh.f32 %v1175_v4 }
 0x126   :  { %v1859_v14 = vpop.eup %1858  ;;  %1504 = vst [vmem:[%s2772_s3 + $0x40] sm:$0xff] %v1857_v8  ;;  %1870 = vtanh.f32 %v2394_v7 }
 0x127   :  { %v1861_v16 = vpop.eup %1860  ;;  %v1372_v17 = vadd.f32 %v1371_v9, %v1309_v13  ;;  %1536 = vst [vmem:[%s2772_s3 + $0x140] sm:$0xff] %v1859_v14 }
 0x128   :  { %v1863_v18 = vpop.eup %1862  ;;  %1505 = vst [vmem:[%s2772_s3 + $0x48] sm:$0xff] %v1861_v16  ;;  %v755_v19 = vpop.f32.mrb[24].mxu0 }
 0x129   :  { %v883_v20 = vpop.f32.mrb[24].mxu1  ;;  %v1176_v21 = vadd.f32 %v2287_v10, %v755_v19  ;;  %v757_v24 = vpop.f32.mrb[25].mxu0  ;;  %1537 = vst [vmem:[%s2772_s3 + $0x148] sm:$0xff] %v1863_v18 }
 0x12a   :  { %v2411_v25 = vadd.f32 %v2287_v10, %v883_v20  ;;  %v885_v26 = vpop.f32.mrb[25].mxu1  ;;  %v758_v27 = vpop.f32.mrb[26].mxu0 }
 0x12b   :  { %v886_v28 = vpop.f32.mrb[26].mxu1  ;;  %v1239_v29 = vadd.f32 %v1238_v11, %v1176_v21  ;;  %v1310_v30 = vmul.f32 %v1176_v21, %v1176_v21  ;;  %1872 = vtanh.f32 %v1176_v21  ;;  %v1177_v32 = vadd.f32 %v2287_v10, %v758_v27  ;;  %v760_v33 = vpop.f32.mrb[27].mxu0 }
 0x12c   :  { %v888_v34 = vpop.f32.mrb[27].mxu1  ;;  %1874 = vtanh.f32 %v2411_v25  ;;  %v2416_v35 = vadd.f32 %v2287_v10, %v886_v28 }
 0x12d   :  { %v1865_v36 = vpop.eup %1864  ;;  %v1373_v38 = vadd.f32 %v1372_v17, %v1310_v30  ;;  %v1240_v39 = vadd.f32 %v1239_v29, %v1177_v32  ;;  %v1311_v41 = vmul.f32 %v1177_v32, %v1177_v32  ;;  %1876 = vtanh.f32 %v1177_v32 }
 0x12e   :  { %v1867_v42 = vpop.eup %1866  ;;  %1506 = vst [vmem:[%s2772_s3 + $0x50] sm:$0xff] %v1865_v36  ;;  %1878 = vtanh.f32 %v2416_v35 }
 0x12f   :  { %v1869_v43 = vpop.eup %1868  ;;  %v1374_v44 = vadd.f32 %v1373_v38, %v1311_v41  ;;  %1538 = vst [vmem:[%s2772_s3 + $0x150] sm:$0xff] %v1867_v42 }
 0x130   :  { %v1871_v45 = vpop.eup %1870  ;;  %1507 = vst [vmem:[%s2772_s3 + $0x58] sm:$0xff] %v1869_v43  ;;  %v763_v46 = vpop.f32.mrb[28].mxu0 }
 0x131   :  { %v891_v48 = vpop.f32.mrb[28].mxu1  ;;  %v1178_v49 = vadd.f32 %v2287_v10, %v763_v46  ;;  %v765_v50 = vpop.f32.mrb[29].mxu0  ;;  %1539 = vst [vmem:[%s2772_s3 + $0x158] sm:$0xff] %v1871_v45 }
 0x132   :  { %v2433_v51 = vadd.f32 %v2287_v10, %v891_v48  ;;  %v893_v52 = vpop.f32.mrb[29].mxu1  ;;  %v766_v54 = vpop.f32.mrb[30].mxu0 }
 0x133   :  { %v894_v55 = vpop.f32.mrb[30].mxu1  ;;  %v1241_v56 = vadd.f32 %v1240_v39, %v1178_v49  ;;  %v1312_v57 = vmul.f32 %v1178_v49, %v1178_v49  ;;  %1880 = vtanh.f32 %v1178_v49  ;;  %v1179_v58 = vadd.f32 %v2287_v10, %v766_v54  ;;  %v768_v59 = vpop.f32.mrb[31].mxu0 }
 0x134   :  { %v896_v60 = vpop.f32.mrb[31].mxu1  ;;  %1882 = vtanh.f32 %v2433_v51  ;;  %v2438_v63 = vadd.f32 %v2287_v10, %v894_v55 }
 0x135   :  { %v1873_v0 = vpop.eup %1872  ;;  %v1375_v1 = vadd.f32 %v1374_v44, %v1312_v57  ;;  %v1242_v2 = vadd.f32 %v1241_v56, %v1179_v58  ;;  %v1313_v3 = vmul.f32 %v1179_v58, %v1179_v58  ;;  %1884 = vtanh.f32 %v1179_v58 }
 0x136   :  { %v1875_v4 = vpop.eup %1874  ;;  %1508 = vst [vmem:[%s2772_s3 + $0x60] sm:$0xff] %v1873_v0  ;;  %1886 = vtanh.f32 %v2438_v63 }
 0x137   :  { %v1877_v5 = vpop.eup %1876  ;;  %v1376_v6 = vadd.f32 %v1375_v1, %v1313_v3  ;;  %1540 = vst [vmem:[%s2772_s3 + $0x160] sm:$0xff] %v1875_v4 }
 0x138   :  { %v1879_v8 = vpop.eup %1878  ;;  %1509 = vst [vmem:[%s2772_s3 + $0x68] sm:$0xff] %v1877_v5  ;;  %v771_v9 = vpop.f32.mrb[32].mxu0 }
 0x139   :  { %v899_v11 = vpop.f32.mrb[32].mxu1  ;;  %v1180_v13 = vadd.f32 %v2287_v10, %v771_v9  ;;  %v773_v14 = vpop.f32.mrb[33].mxu0  ;;  %1541 = vst [vmem:[%s2772_s3 + $0x168] sm:$0xff] %v1879_v8 }
 0x13a   :  { %v2455_v16 = vadd.f32 %v2287_v10, %v899_v11  ;;  %v901_v17 = vpop.f32.mrb[33].mxu1  ;;  %v774_v18 = vpop.f32.mrb[34].mxu0 }
 0x13b   :  { %v902_v19 = vpop.f32.mrb[34].mxu1  ;;  %v1243_v20 = vadd.f32 %v1242_v2, %v1180_v13  ;;  %v1314_v21 = vmul.f32 %v1180_v13, %v1180_v13  ;;  %1888 = vtanh.f32 %v1180_v13  ;;  %v1181_v24 = vadd.f32 %v2287_v10, %v774_v18  ;;  %v776_v26 = vpop.f32.mrb[35].mxu0 }
 0x13c   :  { %v904_v27 = vpop.f32.mrb[35].mxu1  ;;  %1890 = vtanh.f32 %v2455_v16  ;;  %v2460_v28 = vadd.f32 %v2287_v10, %v902_v19 }
 0x13d   :  { %v1881_v29 = vpop.eup %1880  ;;  %v1377_v30 = vadd.f32 %v1376_v6, %v1314_v21  ;;  %v1244_v32 = vadd.f32 %v1243_v20, %v1181_v24  ;;  %v1315_v33 = vmul.f32 %v1181_v24, %v1181_v24  ;;  %1892 = vtanh.f32 %v1181_v24 }
 0x13e   :  { %v1883_v34 = vpop.eup %1882  ;;  %1510 = vst [vmem:[%s2772_s3 + $0x70] sm:$0xff] %v1881_v29  ;;  %1894 = vtanh.f32 %v2460_v28 }
 0x13f   :  { %v1885_v36 = vpop.eup %1884  ;;  %v1378_v38 = vadd.f32 %v1377_v30, %v1315_v33  ;;  %1542 = vst [vmem:[%s2772_s3 + $0x170] sm:$0xff] %v1883_v34 }
 0x140   :  { %v1887_v39 = vpop.eup %1886  ;;  %1511 = vst [vmem:[%s2772_s3 + $0x78] sm:$0xff] %v1885_v36  ;;  %v779_v41 = vpop.f32.mrb[36].mxu0 }
 0x141   :  { %v907_v42 = vpop.f32.mrb[36].mxu1  ;;  %v1182_v43 = vadd.f32 %v2287_v10, %v779_v41  ;;  %v781_v44 = vpop.f32.mrb[37].mxu0  ;;  %1543 = vst [vmem:[%s2772_s3 + $0x178] sm:$0xff] %v1887_v39 }
 0x142   :  { %v2477_v45 = vadd.f32 %v2287_v10, %v907_v42  ;;  %v909_v46 = vpop.f32.mrb[37].mxu1  ;;  %v782_v48 = vpop.f32.mrb[38].mxu0 }
 0x143   :  { %v910_v49 = vpop.f32.mrb[38].mxu1  ;;  %v1245_v50 = vadd.f32 %v1244_v32, %v1182_v43  ;;  %v1316_v52 = vmul.f32 %v1182_v43, %v1182_v43  ;;  %1896 = vtanh.f32 %v1182_v43  ;;  %v1183_v54 = vadd.f32 %v2287_v10, %v782_v48  ;;  %v784_v55 = vpop.f32.mrb[39].mxu0 }
 0x144   :  { %v912_v56 = vpop.f32.mrb[39].mxu1  ;;  %1898 = vtanh.f32 %v2477_v45  ;;  %v2482_v57 = vadd.f32 %v2287_v10, %v910_v49 }
 0x145   :  { %v1889_v58 = vpop.eup %1888  ;;  %v1379_v59 = vadd.f32 %v1378_v38, %v1316_v52  ;;  %v1246_v60 = vadd.f32 %v1245_v50, %v1183_v54  ;;  %v1317_v0 = vmul.f32 %v1183_v54, %v1183_v54  ;;  %1900 = vtanh.f32 %v1183_v54 }
 0x146   :  { %v1891_v1 = vpop.eup %1890  ;;  %1512 = vst [vmem:[%s2772_s3 + $0x80] sm:$0xff] %v1889_v58  ;;  %1902 = vtanh.f32 %v2482_v57 }
 0x147   :  { %v1893_v2 = vpop.eup %1892  ;;  %v1380_v3 = vadd.f32 %v1379_v59, %v1317_v0  ;;  %1544 = vst [vmem:[%s2772_s3 + $0x180] sm:$0xff] %v1891_v1 }
 0x148   :  { %v1895_v4 = vpop.eup %1894  ;;  %1513 = vst [vmem:[%s2772_s3 + $0x88] sm:$0xff] %v1893_v2  ;;  %v787_v5 = vpop.f32.mrb[40].mxu0 }
 0x149   :  { %v915_v6 = vpop.f32.mrb[40].mxu1  ;;  %v1184_v8 = vadd.f32 %v2287_v10, %v787_v5  ;;  %v789_v9 = vpop.f32.mrb[41].mxu0  ;;  %1545 = vst [vmem:[%s2772_s3 + $0x188] sm:$0xff] %v1895_v4 }
 0x14a   :  { %v2499_v11 = vadd.f32 %v2287_v10, %v915_v6  ;;  %v917_v13 = vpop.f32.mrb[41].mxu1  ;;  %v790_v14 = vpop.f32.mrb[42].mxu0 }
 0x14b   :  { %v918_v17 = vpop.f32.mrb[42].mxu1  ;;  %v1247_v18 = vadd.f32 %v1246_v60, %v1184_v8  ;;  %v1318_v19 = vmul.f32 %v1184_v8, %v1184_v8  ;;  %1904 = vtanh.f32 %v1184_v8  ;;  %v1185_v20 = vadd.f32 %v2287_v10, %v790_v14  ;;  %v792_v21 = vpop.f32.mrb[43].mxu0 }
 0x14c   :  { %v920_v24 = vpop.f32.mrb[43].mxu1  ;;  %1906 = vtanh.f32 %v2499_v11  ;;  %v2504_v26 = vadd.f32 %v2287_v10, %v918_v17 }
 0x14d   :  { %v1897_v27 = vpop.eup %1896  ;;  %v1381_v29 = vadd.f32 %v1380_v3, %v1318_v19  ;;  %v1248_v30 = vadd.f32 %v1247_v18, %v1185_v20  ;;  %v1319_v32 = vmul.f32 %v1185_v20, %v1185_v20  ;;  %1908 = vtanh.f32 %v1185_v20 }
 0x14e   :  { %v1899_v33 = vpop.eup %1898  ;;  %1514 = vst [vmem:[%s2772_s3 + $0x90] sm:$0xff] %v1897_v27  ;;  %1910 = vtanh.f32 %v2504_v26 }
 0x14f   :  { %v1901_v34 = vpop.eup %1900  ;;  %v1382_v36 = vadd.f32 %v1381_v29, %v1319_v32  ;;  %1546 = vst [vmem:[%s2772_s3 + $0x190] sm:$0xff] %v1899_v33 }
 0x150   :  { %v1903_v38 = vpop.eup %1902  ;;  %1515 = vst [vmem:[%s2772_s3 + $0x98] sm:$0xff] %v1901_v34  ;;  %v795_v39 = vpop.f32.mrb[44].mxu0 }
 0x151   :  { %v923_v41 = vpop.f32.mrb[44].mxu1  ;;  %v1186_v42 = vadd.f32 %v2287_v10, %v795_v39  ;;  %v797_v43 = vpop.f32.mrb[45].mxu0  ;;  %1547 = vst [vmem:[%s2772_s3 + $0x198] sm:$0xff] %v1903_v38 }
 0x152   :  { %v2521_v44 = vadd.f32 %v2287_v10, %v923_v41  ;;  %v925_v46 = vpop.f32.mrb[45].mxu1  ;;  %v798_v48 = vpop.f32.mrb[46].mxu0 }
 0x153   :  { %v926_v49 = vpop.f32.mrb[46].mxu1  ;;  %v1249_v50 = vadd.f32 %v1248_v30, %v1186_v42  ;;  %v1320_v52 = vmul.f32 %v1186_v42, %v1186_v42  ;;  %1912 = vtanh.f32 %v1186_v42  ;;  %v1187_v54 = vadd.f32 %v2287_v10, %v798_v48  ;;  %v800_v55 = vpop.f32.mrb[47].mxu0 }
 0x154   :  { %v928_v56 = vpop.f32.mrb[47].mxu1  ;;  %1914 = vtanh.f32 %v2521_v44  ;;  %v2526_v58 = vadd.f32 %v2287_v10, %v926_v49 }
 0x155   :  { %v1905_v59 = vpop.eup %1904  ;;  %v1383_v60 = vadd.f32 %v1382_v36, %v1320_v52  ;;  %v1250_v0 = vadd.f32 %v1249_v50, %v1187_v54  ;;  %v1321_v1 = vmul.f32 %v1187_v54, %v1187_v54  ;;  %1916 = vtanh.f32 %v1187_v54 }
 0x156   :  { %v1907_v2 = vpop.eup %1906  ;;  %1516 = vst [vmem:[%s2772_s3 + $0xa0] sm:$0xff] %v1905_v59  ;;  %1918 = vtanh.f32 %v2526_v58 }
 0x157   :  { %v1909_v3 = vpop.eup %1908  ;;  %v1384_v4 = vadd.f32 %v1383_v60, %v1321_v1  ;;  %1548 = vst [vmem:[%s2772_s3 + $0x1a0] sm:$0xff] %v1907_v2 }
 0x158   :  { %v1911_v5 = vpop.eup %1910  ;;  %1517 = vst [vmem:[%s2772_s3 + $0xa8] sm:$0xff] %v1909_v3  ;;  %v803_v6 = vpop.f32.mrb[48].mxu0 }
 0x159   :  { %v931_v8 = vpop.f32.mrb[48].mxu1  ;;  %v1188_v9 = vadd.f32 %v2287_v10, %v803_v6  ;;  %v805_v13 = vpop.f32.mrb[49].mxu0  ;;  %1549 = vst [vmem:[%s2772_s3 + $0x1a8] sm:$0xff] %v1911_v5 }
 0x15a   :  { %v2543_v14 = vadd.f32 %v2287_v10, %v931_v8  ;;  %v933_v17 = vpop.f32.mrb[49].mxu1  ;;  %v806_v18 = vpop.f32.mrb[50].mxu0 }
 0x15b   :  { %v934_v19 = vpop.f32.mrb[50].mxu1  ;;  %v1251_v20 = vadd.f32 %v1250_v0, %v1188_v9  ;;  %v1322_v21 = vmul.f32 %v1188_v9, %v1188_v9  ;;  %1920 = vtanh.f32 %v1188_v9  ;;  %v1189_v24 = vadd.f32 %v2287_v10, %v806_v18  ;;  %v808_v27 = vpop.f32.mrb[51].mxu0 }
 0x15c   :  { %v936_v29 = vpop.f32.mrb[51].mxu1  ;;  %1922 = vtanh.f32 %v2543_v14  ;;  %v2548_v30 = vadd.f32 %v2287_v10, %v934_v19 }
 0x15d   :  { %v1913_v32 = vpop.eup %1912  ;;  %v1385_v33 = vadd.f32 %v1384_v4, %v1322_v21  ;;  %v1252_v34 = vadd.f32 %v1251_v20, %v1189_v24  ;;  %v1323_v36 = vmul.f32 %v1189_v24, %v1189_v24  ;;  %1924 = vtanh.f32 %v1189_v24 }
 0x15e   :  { %v1915_v38 = vpop.eup %1914  ;;  %1518 = vst [vmem:[%s2772_s3 + $0xb0] sm:$0xff] %v1913_v32  ;;  %1926 = vtanh.f32 %v2548_v30 }
 0x15f   :  { %v1917_v39 = vpop.eup %1916  ;;  %v1386_v41 = vadd.f32 %v1385_v33, %v1323_v36  ;;  %1550 = vst [vmem:[%s2772_s3 + $0x1b0] sm:$0xff] %v1915_v38 }
 0x160   :  { %v1919_v42 = vpop.eup %1918  ;;  %1519 = vst [vmem:[%s2772_s3 + $0xb8] sm:$0xff] %v1917_v39  ;;  %v811_v43 = vpop.f32.mrb[52].mxu0 }
 0x161   :  { %v939_v46 = vpop.f32.mrb[52].mxu1  ;;  %v1190_v48 = vadd.f32 %v2287_v10, %v811_v43  ;;  %v813_v49 = vpop.f32.mrb[53].mxu0  ;;  %1551 = vst [vmem:[%s2772_s3 + $0x1b8] sm:$0xff] %v1919_v42 }
 0x162   :  { %v2565_v50 = vadd.f32 %v2287_v10, %v939_v46  ;;  %v941_v52 = vpop.f32.mrb[53].mxu1  ;;  %v814_v54 = vpop.f32.mrb[54].mxu0 }
 0x163   :  { %v942_v55 = vpop.f32.mrb[54].mxu1  ;;  %v1253_v56 = vadd.f32 %v1252_v34, %v1190_v48  ;;  %v1324_v59 = vmul.f32 %v1190_v48, %v1190_v48  ;;  %1928 = vtanh.f32 %v1190_v48  ;;  %v1191_v60 = vadd.f32 %v2287_v10, %v814_v54  ;;  %v816_v0 = vpop.f32.mrb[55].mxu0 }
 0x164   :  { %v944_v1 = vpop.f32.mrb[55].mxu1  ;;  %1930 = vtanh.f32 %v2565_v50  ;;  %v2570_v2 = vadd.f32 %v2287_v10, %v942_v55 }
 0x165   :  { %v1921_v3 = vpop.eup %1920  ;;  %v1387_v4 = vadd.f32 %v1386_v41, %v1324_v59  ;;  %v1254_v5 = vadd.f32 %v1253_v56, %v1191_v60  ;;  %v1325_v6 = vmul.f32 %v1191_v60, %v1191_v60  ;;  %1932 = vtanh.f32 %v1191_v60 }
 0x166   :  { %v1923_v8 = vpop.eup %1922  ;;  %1520 = vst [vmem:[%s2772_s3 + $0xc0] sm:$0xff] %v1921_v3  ;;  %1934 = vtanh.f32 %v2570_v2 }
 0x167   :  { %v1925_v9 = vpop.eup %1924  ;;  %v1388_v13 = vadd.f32 %v1387_v4, %v1325_v6  ;;  %1552 = vst [vmem:[%s2772_s3 + $0x1c0] sm:$0xff] %v1923_v8 }
 0x168   :  { %v1927_v17 = vpop.eup %1926  ;;  %1521 = vst [vmem:[%s2772_s3 + $0xc8] sm:$0xff] %v1925_v9  ;;  %v819_v18 = vpop.f32.mrb[56].mxu0 }
 0x169   :  { %v947_v19 = vpop.f32.mrb[56].mxu1  ;;  %v1192_v20 = vadd.f32 %v2287_v10, %v819_v18  ;;  %v821_v21 = vpop.f32.mrb[57].mxu0  ;;  %1553 = vst [vmem:[%s2772_s3 + $0x1c8] sm:$0xff] %v1927_v17 }
 0x16a   :  { %v2587_v24 = vadd.f32 %v2287_v10, %v947_v19  ;;  %v949_v27 = vpop.f32.mrb[57].mxu1  ;;  %v822_v29 = vpop.f32.mrb[58].mxu0 }
 0x16b   :  { %v950_v32 = vpop.f32.mrb[58].mxu1  ;;  %v1255_v33 = vadd.f32 %v1254_v5, %v1192_v20  ;;  %v1326_v34 = vmul.f32 %v1192_v20, %v1192_v20  ;;  %1936 = vtanh.f32 %v1192_v20  ;;  %v1193_v36 = vadd.f32 %v2287_v10, %v822_v29  ;;  %v824_v38 = vpop.f32.mrb[59].mxu0 }
 0x16c   :  { %v952_v39 = vpop.f32.mrb[59].mxu1  ;;  %1938 = vtanh.f32 %v2587_v24  ;;  %v2592_v41 = vadd.f32 %v2287_v10, %v950_v32  ;;  %v1331_v38 = vmul.f32 %v2296_v22, %v2296_v22 }
 0x16d   :  { %v1929_v42 = vpop.eup %1928  ;;  %v1389_v43 = vadd.f32 %v1388_v13, %v1326_v34  ;;  %v1256_v46 = vadd.f32 %v1255_v33, %v1193_v36  ;;  %v1327_v48 = vmul.f32 %v1193_v36, %v1193_v36  ;;  %1940 = vtanh.f32 %v1193_v36 }
 0x16e   :  { %v1931_v49 = vpop.eup %1930  ;;  %1522 = vst [vmem:[%s2772_s3 + $0xd0] sm:$0xff] %v1929_v42  ;;  %1942 = vtanh.f32 %v2592_v41  ;;  %v1330_v33 = vmul.f32 %v2291_v15, %v2291_v15 }
 0x16f   :  { %v1933_v52 = vpop.eup %1932  ;;  %v1390_v54 = vadd.f32 %v1389_v43, %v1327_v48  ;;  %1554 = vst [vmem:[%s2772_s3 + $0x1d0] sm:$0xff] %v1931_v49  ;;  %v1333_v49 = vmul.f32 %v2306_v40, %v2306_v40 }
 0x170   :  { %v1935_v55 = vpop.eup %1934  ;;  %1523 = vst [vmem:[%s2772_s3 + $0xd8] sm:$0xff] %v1933_v52  ;;  %v827_v56 = vpop.f32.mrb[60].mxu0 }
 0x171   :  { %v955_v59 = vpop.f32.mrb[60].mxu1  ;;  %v1194_v60 = vadd.f32 %v2287_v10, %v827_v56  ;;  %v829_v0 = vpop.f32.mrb[61].mxu0  ;;  %1555 = vst [vmem:[%s2772_s3 + $0x1d8] sm:$0xff] %v1935_v55  ;;  %v1334_v56 = vmul.f32 %v2323_v53, %v2323_v53 }
 0x172   :  { %v2609_v1 = vadd.f32 %v2287_v10, %v955_v59  ;;  %v957_v3 = vpop.f32.mrb[61].mxu1  ;;  %v830_v4 = vpop.f32.mrb[62].mxu0 }
 0x173   :  { %v958_v5 = vpop.f32.mrb[62].mxu1  ;;  %v1257_v6 = vadd.f32 %v1256_v46, %v1194_v60  ;;  %v1328_v8 = vmul.f32 %v1194_v60, %v1194_v60  ;;  %1944 = vtanh.f32 %v1194_v60  ;;  %v1195_v9 = vadd.f32 %v2287_v10, %v830_v4  ;;  %v832_v13 = vpop.f32.mrb[63].mxu0 }
 0x174   :  { %v960_v17 = vpop.f32.mrb[63].mxu1  ;;  %1946 = vtanh.f32 %v2609_v1  ;;  %v2614_v18 = vadd.f32 %v2287_v10, %v958_v5 }
 0x175   :  { %v1937_v19 = vpop.eup %1936  ;;  %v1391_v20 = vadd.f32 %v1390_v54, %v1328_v8  ;;  %v1258_v21 = vadd.f32 %v1257_v6, %v1195_v9  ;;  %v1329_v27 = vmul.f32 %v1195_v9, %v1195_v9  ;;  %1948 = vtanh.f32 %v1195_v9 }
 0x176   :  { %v1939_v29 = vpop.eup %1938  ;;  %1524 = vst [vmem:[%s2772_s3 + $0xe0] sm:$0xff] %v1937_v19  ;;  %1950 = vtanh.f32 %v2614_v18  ;;  %v1337_v6 = vmul.f32 %v2350_v23, %v2350_v23  ;;  %v1339_v19 = vmul.f32 %v2372_v47, %v2372_v47 }
 0x177   :  { %v1941_v32 = vpop.eup %1940  ;;  %v1259_v34 = vadd.f32 %v1258_v21, %v2291_v15  ;;  %v1392_v10 = vadd.f32 %v1391_v20, %v1329_v27  ;;  %1556 = vst [vmem:[%s2772_s3 + $0x1e0] sm:$0xff] %v1939_v29  ;;  %v1332_v15 = vmul.f32 %v2301_v31, %v2301_v31 }
 0x178   :  { %v1943_v36 = vpop.eup %1942  ;;  %1525 = vst [vmem:[%s2772_s3 + $0xe8] sm:$0xff] %v1941_v32 }
 0x179   :  { %v1260_v39 = vadd.f32 %v1259_v34, %v2296_v22  ;;  %v1393_v42 = vadd.f32 %v1392_v10, %v1330_v33  ;;  %1557 = vst [vmem:[%s2772_s3 + $0x1e8] sm:$0xff] %v1943_v36 }
 0x17b   :  { %v1261_v43 = vadd.f32 %v1260_v39, %v2301_v31  ;;  %v1394_v46 = vadd.f32 %v1393_v42, %v1331_v38 }
 0x17d   :  { %v1945_v48 = vpop.eup %1944  ;;  %v1262_v52 = vadd.f32 %v1261_v43, %v2306_v40  ;;  %v1395_v54 = vadd.f32 %v1394_v46, %v1332_v15  ;;  %v1335_v40 = vmul.f32 %v2328_v62, %v2328_v62  ;;  %v1346_v46 = vmul.f32 %v2455_v16, %v2455_v16 }
 0x17e   :  { %v1947_v55 = vpop.eup %1946  ;;  %1526 = vst [vmem:[%s2772_s3 + $0xf0] sm:$0xff] %v1945_v48 }
 0x17f   :  { %v1949_v22 = vpop.eup %1948  ;;  %v1263_v59 = vadd.f32 %v1262_v52, %v2323_v53  ;;  %v1396_v31 = vadd.f32 %v1395_v54, %v1333_v49  ;;  %1558 = vst [vmem:[%s2772_s3 + $0x1f0] sm:$0xff] %v1947_v55  ;;  %v1336_v53 = vmul.f32 %v2345_v12, %v2345_v12  ;;  %v1347_v52 = vmul.f32 %v2460_v28, %v2460_v28 }
 0x180   :  { %v1951_v60 = vpop.eup %1950  ;;  %1527 = vst [vmem:[%s2772_s3 + $0xf8] sm:$0xff] %v1949_v22  ;;  %v1348_v55 = vmul.f32 %v2477_v45, %v2477_v45 }
 0x181   :  { %v1264_v0 = vadd.f32 %v1263_v59, %v2328_v62  ;;  %v1397_v3 = vadd.f32 %v1396_v31, %v1334_v56  ;;  %1559 = vst [vmem:[%s2772_s3 + $0x1f8] sm:$0xff] %v1951_v60  ;;  %v1338_v62 = vmul.f32 %v2367_v37, %v2367_v37  ;;  %v1349_v56 = vmul.f32 %v2482_v57, %v2482_v57  ;;  %s2001_s3 = smov [#allocation3]  }
 0x182   :  { %v1350_v31 = vmul.f32 %v2499_v11, %v2499_v11  ;;  %s1568_s24 = sshll.u32 %s2001_s3, 4  ;;  %s1569_s24 = int_to_ptr.vmem [resolvable:$true] %s1568_s24 }
 0x183   :  { %v1265_v4 = vadd.f32 %v1264_v0, %v2345_v12  ;;  %v1398_v5 = vadd.f32 %v1397_v3, %v1335_v40  ;;  %v1340_v12 = vmul.f32 %v2389_v61, %v2389_v61  ;;  %v1351_v40 = vmul.f32 %v2504_v26, %v2504_v26  ;;  %s1952_s27 = scalar_lea.vmem %s1569_s24, 16  ;;  %s1956_s28 = scalar_lea.vmem %s1569_s24, 32 }
 0x184   :  { %v1352_v3 = vmul.f32 %v2521_v44, %v2521_v44  ;;  %p1953_p0 = scmp.ne.s32.totalorder %s1569_s24, %s1952_s27  ;;  %p1957_p1 = scmp.lt.s32.totalorder %s1569_s24, %s1569_s24 }
 0x185   :  { %v1266_v8 = vadd.f32 %v1265_v4, %v2350_v23  ;;  %v1399_v9 = vadd.f32 %v1398_v5, %v1336_v53  ;;  %v1341_v23 = vmul.f32 %v2394_v7, %v2394_v7  ;;  %v1353_v4 = vmul.f32 %v2526_v58, %v2526_v58  ;;  %p1958_p2 = scmp.lt.s32.totalorder %s1956_s28, %s1952_s27 }
 0x187   :  { %v1400_v13 = vadd.f32 %v1399_v9, %v1337_v6  ;;  %v1267_v17 = vadd.f32 %v1266_v8, %v2367_v37  ;;  %v1342_v37 = vmul.f32 %v2411_v25, %v2411_v25  ;;  %v1354_v6 = vmul.f32 %v2543_v14, %v2543_v14  ;;  %p1959_p3 = por %p1958_p2, %p1957_p1 }
 0x188   :  { %v1355_v9 = vmul.f32 %v2548_v30, %v2548_v30 }
 0x189   :  { %v1268_v20 = vadd.f32 %v1267_v17, %v2372_v47  ;;  %v1401_v21 = vadd.f32 %v1400_v13, %v1338_v62  ;;  %v1343_v47 = vmul.f32 %v2416_v35, %v2416_v35  ;;  %v1356_v13 = vmul.f32 %v2565_v50, %v2565_v50  ;;  %p1960_p4 = pnand %p1959_p3, %p1953_p0 }
 0x18b   :  { %v1269_v27 = vadd.f32 %v1268_v20, %v2389_v61  ;;  %v1402_v29 = vadd.f32 %v1401_v21, %v1339_v19  ;;  %v1344_v61 = vmul.f32 %v2433_v51, %v2433_v51  ;;  %v1357_v19 = vmul.f32 %v2570_v2, %v2570_v2 }
 0x18c   :  { %v1358_v21 = vmul.f32 %v2587_v24, %v2587_v24 }
 0x18d   :  { %v1270_v32 = vadd.f32 %v1269_v27, %v2394_v7  ;;  %v1403_v33 = vadd.f32 %v1402_v29, %v1340_v12  ;;  %v1345_v7 = vmul.f32 %v2438_v63, %v2438_v63  ;;  %v1359_v27 = vmul.f32 %v2592_v41, %v2592_v41 }
 0x18f   :  { %v1271_v34 = vadd.f32 %v1270_v32, %v2411_v25  ;;  %v1404_v10 = vadd.f32 %v1403_v33, %v1341_v23  ;;  %v1361_v33 = vmul.f32 %v2614_v18, %v2614_v18 }
 0x191   :  { %v1272_v36 = vadd.f32 %v1271_v34, %v2416_v35  ;;  %v1405_v38 = vadd.f32 %v1404_v10, %v1342_v37 }
 0x193   :  { %v1273_v39 = vadd.f32 %v1272_v36, %v2433_v51  ;;  %v1406_v42 = vadd.f32 %v1405_v38, %v1343_v47 }
 0x195   :  { %v1274_v15 = vadd.f32 %v1273_v39, %v2438_v63  ;;  %v1407_v43 = vadd.f32 %v1406_v42, %v1344_v61 }
 0x197   :  { %v1275_v25 = vadd.f32 %v1274_v15, %v2455_v16  ;;  %v1408_v48 = vadd.f32 %v1407_v43, %v1345_v7 }
 0x199   :  { %v1409_v35 = vadd.f32 %v1408_v48, %v1346_v46  ;;  %v1276_v49 = vadd.f32 %v1275_v25, %v2460_v28 }
 0x19b   :  { %v1410_v51 = vadd.f32 %v1409_v35, %v1347_v52  ;;  %v1277_v54 = vadd.f32 %v1276_v49, %v2477_v45 }
 0x19d   :  { %v1411_v63 = vadd.f32 %v1410_v51, %v1348_v55  ;;  %v1278_v22 = vadd.f32 %v1277_v54, %v2482_v57 }
 0x19f   :  { %v1412_v16 = vadd.f32 %v1411_v63, %v1349_v56  ;;  %v1279_v59 = vadd.f32 %v1278_v22, %v2499_v11 }
 0x1a1   :  { %v1413_v60 = vadd.f32 %v1412_v16, %v1350_v31  ;;  %v1280_v28 = vadd.f32 %v1279_v59, %v2504_v26 }
 0x1a3   :  { %v1414_v0 = vadd.f32 %v1413_v60, %v1351_v40  ;;  %v1281_v45 = vadd.f32 %v1280_v28, %v2521_v44 }
 0x1a5   :  { %v1415_v53 = vadd.f32 %v1414_v0, %v1352_v3  ;;  %v1282_v57 = vadd.f32 %v1281_v45, %v2526_v58 }
 0x1a7   :  { %v1416_v5 = vadd.f32 %v1415_v53, %v1353_v4  ;;  %v1283_v11 = vadd.f32 %v1282_v57, %v2543_v14 }
 0x1a9   :  { %v1417_v8 = vadd.f32 %v1416_v5, %v1354_v6  ;;  %v1284_v26 = vadd.f32 %v1283_v11, %v2548_v30 }
 0x1ab   :  { %v1418_v62 = vadd.f32 %v1417_v8, %v1355_v9  ;;  %v1285_v44 = vadd.f32 %v1284_v26, %v2565_v50  ;;  %v1360_v50 = vmul.f32 %v2609_v1, %v2609_v1 }
 0x1ad   :  { %v1419_v17 = vadd.f32 %v1418_v62, %v1356_v13  ;;  %v1286_v58 = vadd.f32 %v1285_v44, %v2570_v2 }
 0x1af   :  { %v1420_v20 = vadd.f32 %v1419_v17, %v1357_v19  ;;  %v1287_v14 = vadd.f32 %v1286_v58, %v2587_v24 }
 0x1b1   :  { %v1421_v12 = vadd.f32 %v1420_v20, %v1358_v21  ;;  %v1288_v30 = vadd.f32 %v1287_v14, %v2592_v41 }
 0x1b3   :  { %v1422_v29 = vadd.f32 %v1421_v12, %v1359_v27  ;;  %v1289_v23 = vadd.f32 %v1288_v30, %v2609_v1 }
 0x1b5   :  { %v1423_v32 = vadd.f32 %v1422_v29, %v1360_v50  ;;  %v1290_v2 = vadd.f32 %v1289_v23, %v2614_v18 }
 0x1b7   :  { %v1424_v37 = vadd.f32 %v1423_v32, %v1361_v33  ;;  %v1291_v24 = vrot.slane %v1290_v2, 4 }
 0x1b9   :  { %v1292_v34 = vadd.f32 %v1291_v24, %v1290_v2  ;;  %v1425_v10 = vrot.slane %v1424_v37, 4 }
 0x1bb   :  { %v1293_v47 = vrot.slane %v1292_v34, 2  ;;  %v1426_v36 = vadd.f32 %v1425_v10, %v1424_v37 }
 0x1bd   :  { %v1294_v38 = vadd.f32 %v1293_v47, %v1292_v34  ;;  %v1427_v41 = vrot.slane %v1426_v36, 2 }
 0x1bf   :  { %v1295_v61 = vrot.slane %v1294_v38, 1  ;;  %v1428_v39 = vadd.f32 %v1427_v41, %v1426_v36 }
 0x1c1   :  { %v1296_v1 = vadd.f32 %v1295_v61, %v1294_v38  ;;  %v1429_v42 = vrot.slane %v1428_v39, 1 }
 0x1c3   :  { %1297 = vst [vmem:[#allocation3] sm:$0x1] %v1296_v1  ;;  %v1430_v7 = vadd.f32 %v1429_v42, %v1428_v39 }
 0x1c4   :  { %1963 = shalt.err (!%p1960_p4)
}
 0x1c5   :  { %s1964_s6 = scalar_lea.hbm %s2773_s4, 16 }
 0x1c6   :  { %p1965_p5 = scmp.ne.s32.totalorder %s2773_s4, %s1964_s6  ;;  %p1968_p6 = scmp.lt.u32.totalorder %s1964_s6, %s2773_s4 }
 0x1c8   :  { %p1970_p7 = pnand %p1968_p6, %p1965_p5 }
 0x1ca   :  { %1973 = shalt.err (!%p1970_p7)
}
 0x1cb   :  { %1571 = dma.vmem_to_hbm [thread:$0]  %s1569_s24, 16, %s2773_s4, [#allocation4]   ;;  %1431 = vst [vmem:[#allocation5] sm:$0x1] %v1430_v7 }
 0x1cc   :  { %s1974_s11 = scalar_lea.vmem %s2737_s26, 16  ;;  %s1978_s12 = scalar_lea.vmem %s2737_s26, 32 }
 0x1cd   :  { %p1975_p8 = scmp.ne.s32.totalorder %s2737_s26, %s1974_s11  ;;  %p1979_p9 = scmp.lt.s32.totalorder %s2737_s26, %s2737_s26 }
 0x1ce   :  { %p1980_p10 = scmp.lt.s32.totalorder %s1978_s12, %s1974_s11 }
 0x1d0   :  { %p1981_p11 = por %p1980_p10, %p1979_p9 }
 0x1d2   :  { %p1982_p12 = pnand %p1981_p11, %p1975_p8 }
 0x1d4   :  { %1985 = shalt.err (!%p1982_p12)
}
 0x1d5   :  { %s1986_s15 = scalar_lea.hbm %s2774_s5, 16 }
 0x1d6   :  { %p1987_p13 = scmp.ne.s32.totalorder %s2774_s5, %s1986_s15  ;;  %p1990_p0 = scmp.lt.u32.totalorder %s1986_s15, %s2774_s5 }
 0x1d8   :  { %p1992_p1 = pnand %p1990_p0, %p1987_p13 }
 0x1da   :  { %1995 = shalt.err (!%p1992_p1)
}
 0x1db   :  { %1581 = dma.vmem_to_hbm [thread:$0]  %s2737_s26, 16, %s2774_s5, [#allocation6]  }
 0x1dc   :  { %1996 = dma.done.wait [#allocation4], 16  }
 0x1dd   :  { %1997 = vsyncadd [#allocation4], 4294967280 }
 0x1de   :  { %1998 = dma.done.wait [#allocation6], 16  }
 0x1df   :  { %1999 = vsyncadd [#allocation6], 4294967280 }
 0x1e0   :  { %1590 = vsyncpa [#allocation4], 1 }
 0x1e1   :  { %1591 = vsyncpa [#allocation6], 1 }

</bundles_post_ra>
